<compile_context>
chip_gen: v6e
topology: v6e:2x2x1
jax: 0.10.0
libtpu: 0.0.40
codegen_flags: <defaults>
</compile_context>

<pallas_src>
import math

import jax
import jax.numpy as jnp
from jax import lax
from jax.experimental import pallas as pl
from jax.experimental.pallas import tpu as pltpu

EPS = 1e-6


# ----------------------------------------------------------------------------
# Pallas kernel
# ----------------------------------------------------------------------------
def _glf_kernel(x_ref, pre_g_ref, pre_b_ref, dw_ref, rmask_ref, cmask_ref,
                wr_ref, wi_ref, cbt_ref, sbt_ref, car_ref, sar_ref,
                gct_ref, gst_ref, pg_l_ref, pb_l_ref, pg_g_ref, pb_g_ref,
                out_ref):
    C, H, W = x_ref.shape[1], x_ref.shape[2], x_ref.shape[3]
    C2 = C // 2
    Wp = cbt_ref.shape[1]
    bf16 = jnp.bfloat16
    f32 = jnp.float32

    x = x_ref[0].astype(f32)                         # (C, H, W)

    # ---- pre-norm: channels_first LayerNorm over the channel axis ----
    mu = jnp.mean(x, axis=0, keepdims=True)
    xc = x - mu
    var = jnp.mean(xc * xc, axis=0, keepdims=True)
    xn = pre_g_ref[...] * (xc * lax.rsqrt(var + EPS)) + pre_b_ref[...]

    # ---- local branch: depthwise 3x3 conv (padding=1, no bias) via rolls + masks ----
    x1 = xn[:C2]                                     # (C2, H, W)
    y1 = jnp.zeros((C2, H, W), f32)
    for ki in range(3):                              # row shifts (H axis, sublanes)
        di = ki - 1
        if di == 0:
            base = x1
        else:
            base = pltpu.roll(x1, shift=(-di) % H, axis=1) * rmask_ref[ki]
        for kj in range(3):                          # column shifts (W axis, lanes)
            dj = kj - 1
            if dj == 0:
                term = base
            else:
                term = pltpu.roll(base, shift=(-dj) % W, axis=2) * cmask_ref[kj]
            y1 = y1 + dw_ref[ki, kj] * term          # (C2,1,1) per-channel tap

    # ---- global branch: rfft2 * weight -> irfft2 ('ortho') as FLAT MXU matmuls ----
    def mm(a, b):
        return jnp.dot(a, b, preferred_element_type=f32)

    def t_hl(v):                                     # (C2*H, Wp) -> (C2*Wp, H)
        return jnp.transpose(v.reshape(C2, H, Wp), (0, 2, 1)).reshape(C2 * Wp, H)

    def t_lh(v):                                     # (C2*Wp, H) -> (C2*H, Wp)
        return jnp.transpose(v.reshape(C2, Wp, H), (0, 2, 1)).reshape(C2 * H, Wp)

    cbt, sbt = cbt_ref[...], sbt_ref[...]            # (W, Wp)   bf16, ortho scale folded
    car, sar = car_ref[...], sar_ref[...]            # (H, H)    bf16

    x2f = xn[C2:].reshape(C2 * H, W).astype(bf16)    # free merge (H % 8 == 0)
    # forward rfft along W:  Z = zr - i*zmi
    zr = mm(x2f, cbt)                                # (C2*H, Wp)
    zmi = mm(x2f, sbt)
    zrb, zmb = t_hl(zr).astype(bf16), t_hl(zmi).astype(bf16)     # (C2*Wp, H)
    # forward full FFT along H:  X = yr - i*ymi
    yr = mm(zrb, car) - mm(zmb, sar)
    ymi = mm(zmb, car) + mm(zrb, sar)
    # complex weight multiply (f32):  Xw = ur - i*umi
    wr, wi = wr_ref[...], wi_ref[...]                # (C2*Wp, H)
    ur = yr * wr + ymi * wi
    umi = ymi * wr - yr * wi
    urb, umb = ur.astype(bf16), umi.astype(bf16)
    # inverse FFT along H:  V = vr + i*vi
    vr = mm(urb, car) + mm(umb, sar)
    vi = mm(urb, sar) - mm(umb, car)
    vrb, vib = t_lh(vr).astype(bf16), t_lh(vi).astype(bf16)      # (C2*H, Wp)
    # inverse rfft along W (alpha + ortho scale folded into gct/gst)
    y2 = (mm(vrb, gct_ref[...]) - mm(vib, gst_ref[...])).reshape(C2, H, W)

    # ---- post-norm on the two halves (no concatenate) + interleaved store ----
    inv_c = 1.0 / C
    mu2 = (jnp.sum(y1, axis=0, keepdims=True) +
           jnp.sum(y2, axis=0, keepdims=True)) * inv_c
    yc1 = y1 - mu2
    yc2 = y2 - mu2
    var2 = (jnp.sum(yc1 * yc1, axis=0, keepdims=True) +
            jnp.sum(yc2 * yc2, axis=0, keepdims=True)) * inv_c
    r2 = lax.rsqrt(var2 + EPS)
    out_ref[0, :, 0, :, :] = pg_l_ref[...] * (yc1 * r2) + pb_l_ref[...]
    out_ref[0, :, 1, :, :] = pg_g_ref[...] * (yc2 * r2) + pb_g_ref[...]


# ----------------------------------------------------------------------------
# Constant builders (trace-time; scales folded, DFT matrices in bf16)
# ----------------------------------------------------------------------------
def _dft_matrices(H, W, Wp):
    Wr = W // 2 + 1
    s = 1.0 / math.sqrt(H * W)                       # 'ortho' scale folded into constants

    hm = (jnp.arange(H)[:, None] * jnp.arange(H)[None, :]) % H
    ang_h = (2.0 * jnp.pi / H) * hm.astype(jnp.float32)
    car, sar = jnp.cos(ang_h), jnp.sin(ang_h)        # (H, H)

    jl = (jnp.arange(W)[:, None] * jnp.arange(Wr)[None, :]) % W
    ang_w = (2.0 * jnp.pi / W) * jl.astype(jnp.float32)
    cbt = jnp.cos(ang_w) * s                         # (W, Wr) forward, scale folded
    sbt = jnp.sin(ang_w) * s
    cbt = jnp.pad(cbt, ((0, 0), (0, Wp - Wr)))       # pad freq dim to multiple of 8
    sbt = jnp.pad(sbt, ((0, 0), (0, Wp - Wr)))

    alpha = jnp.full((Wr,), 2.0, jnp.float32).at[0].set(1.0)
    if W % 2 == 0:
        alpha = alpha.at[W // 2].set(1.0)
    lj = (jnp.arange(Wr)[:, None] * jnp.arange(W)[None, :]) % W
    ang_i = (2.0 * jnp.pi / W) * lj.astype(jnp.float32)
    gct = alpha[:, None] * jnp.cos(ang_i) * s        # (Wr, W) inverse, alpha+scale folded
    gst = alpha[:, None] * jnp.sin(ang_i) * s
    gct = jnp.pad(gct, ((0, Wp - Wr), (0, 0)))       # padded freqs contribute nothing
    gst = jnp.pad(gst, ((0, Wp - Wr), (0, 0)))

    bf = jnp.bfloat16
    return (car.astype(bf), sar.astype(bf), cbt.astype(bf),
            sbt.astype(bf), gct.astype(bf), gst.astype(bf))


def _conv_masks(H, W):
    ih = jnp.arange(H)
    iw = jnp.arange(W)
    rmask = jnp.stack([((ih + d >= 0) & (ih + d < H)).astype(jnp.float32).reshape(1, H, 1)
                       for d in (-1, 0, 1)])         # (3, 1, H, 1)
    cmask = jnp.stack([((iw + d >= 0) & (iw + d < W)).astype(jnp.float32).reshape(1, 1, W)
                       for d in (-1, 0, 1)])         # (3, 1, 1, W)
    return rmask, cmask


def _bilinear_align_corners(x, out_h, out_w):
    """Bilinear resize over the last two dims, align_corners=True (F.interpolate)."""
    in_h, in_w = x.shape[-2], x.shape[-1]
    if (in_h, in_w) == (out_h, out_w):
        return x

    def src(out_n, in_n):
        if out_n == 1:
            return jnp.zeros((1,), jnp.float32)
        return jnp.arange(out_n, dtype=jnp.float32) * (in_n - 1) / (out_n - 1)

    ys, xs = src(out_h, in_h), src(out_w, in_w)
    y0 = jnp.clip(jnp.floor(ys).astype(jnp.int32), 0, in_h - 1)
    x0 = jnp.clip(jnp.floor(xs).astype(jnp.int32), 0, in_w - 1)
    y1 = jnp.minimum(y0 + 1, in_h - 1)
    x1 = jnp.minimum(x0 + 1, in_w - 1)
    wy = (ys - y0.astype(jnp.float32))[:, None]
    wx = (xs - x0.astype(jnp.float32))[None, :]

    v00 = x[..., y0[:, None], x0[None, :]]
    v01 = x[..., y0[:, None], x1[None, :]]
    v10 = x[..., y1[:, None], x0[None, :]]
    v11 = x[..., y1[:, None], x1[None, :]]
    return (v00 * (1 - wy) * (1 - wx) + v01 * (1 - wy) * wx +
            v10 * wy * (1 - wx) + v11 * wy * wx)


# ----------------------------------------------------------------------------
# pallas_call wrapper
# ----------------------------------------------------------------------------
def global_local_filter(x, params):
    B, C, H, W = x.shape
    assert C % 2 == 0, "GlobalLocalFilter requires an even channel count"
    C2 = C // 2
    Wr = W // 2 + 1
    Wp = ((Wr + 7) // 8) * 8                         # padded freq dim (free-view merges)

    # complex weight -> (possibly resized) real/imag parts, laid out as (C2*Wp, H)
    cw = jnp.transpose(params["complex_weight"], (0, 3, 1, 2))       # (C2, 2, h, w)
    cw = _bilinear_align_corners(cw, H, Wr)                           # (C2, 2, H, Wr)

    def weight_flat(w):                              # (C2, H, Wr) -> (C2*Wp, H)
        wt = jnp.transpose(w, (0, 2, 1))             # (C2, Wr, H)
        wt = jnp.pad(wt, ((0, 0), (0, Wp - Wr), (0, 0)))
        return wt.reshape(C2 * Wp, H).astype(jnp.float32)

    wr_t = weight_flat(cw[:, 0])
    wi_t = weight_flat(cw[:, 1])

    car, sar, cbt, sbt, gct, gst = _dft_matrices(H, W, Wp)
    rmask, cmask = _conv_masks(H, W)

    dww = jnp.transpose(params["dw_weight"].reshape(C2, 3, 3), (1, 2, 0))
    dww = dww.reshape(3, 3, C2, 1, 1).astype(jnp.float32)

    pre_g = params["pre_g"].reshape(C, 1, 1).astype(jnp.float32)
    pre_b = params["pre_b"].reshape(C, 1, 1).astype(jnp.float32)
    # post-norm params split per half; interleave happens at the store, so gamma/beta for
    # interleaved channel 2*c (local) / 2*c+1 (global) are the even / odd entries.
    pg_l = params["post_g"][0::2].reshape(C2, 1, 1).astype(jnp.float32)
    pg_g = params["post_g"][1::2].reshape(C2, 1, 1).astype(jnp.float32)
    pb_l = params["post_b"][0::2].reshape(C2, 1, 1).astype(jnp.float32)
    pb_g = params["post_b"][1::2].reshape(C2, 1, 1).astype(jnp.float32)

    inputs = [x, pre_g, pre_b, dww, rmask, cmask, wr_t, wi_t,
              cbt, sbt, car, sar, gct, gst, pg_l, pb_l, pg_g, pb_g]

    def const_spec(a):
        nd = a.ndim
        return pl.BlockSpec(a.shape, lambda b, _nd=nd: (0,) * _nd)

    in_specs = [pl.BlockSpec((1, C, H, W), lambda b: (b, 0, 0, 0))]
    in_specs += [const_spec(a) for a in inputs[1:]]
    out_specs = pl.BlockSpec((1, C2, 2, H, W), lambda b: (b, 0, 0, 0, 0))

    # VMEM budget derived from the actual block/constant sizes (feedback: v7x 64MiB ceiling)
    def _rup(n, m):
        return ((n + m - 1) // m) * m

    blk_in = C * _rup(H, 8) * _rup(W, 128) * 4
    blk_out = C2 * 2 * _rup(H, 8) * _rup(W, 128) * 4
    const_bytes = sum(int(a.size) * a.dtype.itemsize for a in inputs[1:])
    inter = 28 * C2 * _rup(H, 8) * _rup(max(W, Wp), 128) * 4
    est = 2 * (blk_in + blk_out) + 2 * const_bytes + inter + (8 << 20)
    vmem_limit = int(min(max(est, 32 << 20), 48 << 20))

    # advisory cost estimate (flat DFT matmuls dominate)
    mm_flops = 2 * C2 * (2 * H * W * Wp + 8 * Wp * H * H + 2 * H * Wp * W)
    cost = pl.CostEstimate(flops=int(B * (mm_flops + 60 * C * H * W)),
                           transcendentals=int(2 * B * H * W),
                           bytes_accessed=int(2 * B * C * H * W * 4))

    out = pl.pallas_call(
        _glf_kernel,
        out_shape=jax.ShapeDtypeStruct((B, C2, 2, H, W), jnp.float32),
        grid=(B,),
        in_specs=in_specs,
        out_specs=out_specs,
        compiler_params=pltpu.CompilerParams(
            dimension_semantics=("parallel",),
            vmem_limit_bytes=vmem_limit),
        cost_estimate=cost,
    )(*inputs)

    # (B, C2, 2, H, W) -> (B, C, H, W) is a free view and yields the interleaved
    # channel order [local_0, global_0, local_1, global_1, ...] -- no extra HBM pass.
    return out.reshape(B, C, H, W)


# ----------------------------------------------------------------------------
# Pure-JAX reference (mirrors the PyTorch forward) for validation
# ----------------------------------------------------------------------------
def reference(x, params):
    B, C, H, W = x.shape
    C2 = C // 2
    u = x.mean(axis=1, keepdims=True)
    s = ((x - u) ** 2).mean(axis=1, keepdims=True)
    xn = (x - u) / jnp.sqrt(s + EPS)
    xn = params["pre_g"][None, :, None, None] * xn + params["pre_b"][None, :, None, None]

    x1, x2 = xn[:, :C2], xn[:, C2:]
    x1 = lax.conv_general_dilated(
        x1, params["dw_weight"], window_strides=(1, 1), padding=((1, 1), (1, 1)),
        dimension_numbers=("NCHW", "OIHW", "NCHW"), feature_group_count=C2)

    X = jnp.fft.rfft2(x2.astype(jnp.float32), axes=(2, 3), norm="ortho")
    cw = jnp.transpose(params["complex_weight"], (0, 3, 1, 2))
    cw = _bilinear_align_corners(cw, X.shape[2], X.shape[3])
    X = X * (cw[:, 0] + 1j * cw[:, 1])[None]
    x2r = jnp.fft.irfft2(X, s=(H, W), axes=(2, 3), norm="ortho")

    y = jnp.stack([x1, x2r], axis=2).reshape(B, C, H, W)
    u2 = y.mean(axis=1, keepdims=True)
    s2 = ((y - u2) ** 2).mean(axis=1, keepdims=True)
    yn = (y - u2) / jnp.sqrt(s2 + EPS)
    return params["post_g"][None, :, None, None] * yn + params["post_b"][None, :, None, None]


# ----------------------------------------------------------------------------
if __name__ == "__main__":
    B, dim, H, W = 2, 8, 16, 16          # spatial 16x16 exercises the weight resize
    C2 = dim // 2
    key = jax.random.PRNGKey(0)
    kx, kw, kd, k1, k2, k3, k4 = jax.random.split(key, 7)

    params = dict(
        complex_weight=0.02 * jax.random.normal(kw, (C2, 14, 8, 2), jnp.float32),
        dw_weight=(1.0 / 3.0) * jax.random.normal(kd, (C2, 1, 3, 3), jnp.float32),
        pre_g=1.0 + 0.1 * jax.random.normal(k1, (dim,), jnp.float32),
        pre_b=0.1 * jax.random.normal(k2, (dim,), jnp.float32),
        post_g=1.0 + 0.1 * jax.random.normal(k3, (dim,), jnp.float32),
        post_b=0.1 * jax.random.normal(k4, (dim,), jnp.float32),
    )
    x = jax.random.normal(kx, (B, dim, H, W), jnp.float32)

    out = jax.block_until_ready(global_local_filter(x, params))
    ref = jax.block_until_ready(reference(x, params))

    assert out.shape == (B, dim, H, W)
    assert bool(jnp.isfinite(out).all())
    max_err = float(jnp.max(jnp.abs(out - ref)))
    assert max_err < 5e-2, f"max abs err {max_err}"
    print("KERNEL_OK")
</pallas_src>

<mosaic_0001>
module attributes {stable_mosaic.version = 11 : i64} {
  func.func @_glf_kernel(%arg0: i32, %arg1: memref<1x8x16x16xf32, #tpu.memory_space<vmem>>, %arg2: memref<8x1x1xf32, #tpu.memory_space<vmem>>, %arg3: memref<8x1x1xf32, #tpu.memory_space<vmem>>, %arg4: memref<3x3x4x1x1xf32, #tpu.memory_space<vmem>>, %arg5: memref<3x1x16x1xf32, #tpu.memory_space<vmem>>, %arg6: memref<3x1x1x16xf32, #tpu.memory_space<vmem>>, %arg7: memref<64x16xf32, #tpu.memory_space<vmem>>, %arg8: memref<64x16xf32, #tpu.memory_space<vmem>>, %arg9: memref<16x16xbf16, #tpu.memory_space<vmem>>, %arg10: memref<16x16xbf16, #tpu.memory_space<vmem>>, %arg11: memref<16x16xbf16, #tpu.memory_space<vmem>>, %arg12: memref<16x16xbf16, #tpu.memory_space<vmem>>, %arg13: memref<16x16xbf16, #tpu.memory_space<vmem>>, %arg14: memref<16x16xbf16, #tpu.memory_space<vmem>>, %arg15: memref<4x1x1xf32, #tpu.memory_space<vmem>>, %arg16: memref<4x1x1xf32, #tpu.memory_space<vmem>>, %arg17: memref<4x1x1xf32, #tpu.memory_space<vmem>>, %arg18: memref<4x1x1xf32, #tpu.memory_space<vmem>>, %arg19: memref<1x4x2x16x16xf32, #tpu.memory_space<vmem>>) attributes {dimension_semantics = [#tpu.dimension_semantics<parallel>], iteration_bounds = array<i64: 2>, scalar_prefetch = 0 : i64, scratch_operands = 0 : i64, tpu.core_type = #tpu.core_type<tc>, window_params = [{transform_indices = @transform_0, window_bounds = array<i64: 1, 8, 16, 16>}, {pipeline_mode = #tpu.pipeline_mode<synchronous>, transform_indices = @transform_1, window_bounds = array<i64: 8, 1, 1>}, {pipeline_mode = #tpu.pipeline_mode<synchronous>, transform_indices = @transform_2, window_bounds = array<i64: 8, 1, 1>}, {pipeline_mode = #tpu.pipeline_mode<synchronous>, transform_indices = @transform_3, window_bounds = array<i64: 3, 3, 4, 1, 1>}, {pipeline_mode = #tpu.pipeline_mode<synchronous>, transform_indices = @transform_4, window_bounds = array<i64: 3, 1, 16, 1>}, {pipeline_mode = #tpu.pipeline_mode<synchronous>, transform_indices = @transform_5, window_bounds = array<i64: 3, 1, 1, 16>}, {pipeline_mode = #tpu.pipeline_mode<synchronous>, transform_indices = @transform_6, window_bounds = array<i64: 64, 16>}, {pipeline_mode = #tpu.pipeline_mode<synchronous>, transform_indices = @transform_7, window_bounds = array<i64: 64, 16>}, {pipeline_mode = #tpu.pipeline_mode<synchronous>, transform_indices = @transform_8, window_bounds = array<i64: 16, 16>}, {pipeline_mode = #tpu.pipeline_mode<synchronous>, transform_indices = @transform_9, window_bounds = array<i64: 16, 16>}, {pipeline_mode = #tpu.pipeline_mode<synchronous>, transform_indices = @transform_10, window_bounds = array<i64: 16, 16>}, {pipeline_mode = #tpu.pipeline_mode<synchronous>, transform_indices = @transform_11, window_bounds = array<i64: 16, 16>}, {pipeline_mode = #tpu.pipeline_mode<synchronous>, transform_indices = @transform_12, window_bounds = array<i64: 16, 16>}, {pipeline_mode = #tpu.pipeline_mode<synchronous>, transform_indices = @transform_13, window_bounds = array<i64: 16, 16>}, {pipeline_mode = #tpu.pipeline_mode<synchronous>, transform_indices = @transform_14, window_bounds = array<i64: 4, 1, 1>}, {pipeline_mode = #tpu.pipeline_mode<synchronous>, transform_indices = @transform_15, window_bounds = array<i64: 4, 1, 1>}, {pipeline_mode = #tpu.pipeline_mode<synchronous>, transform_indices = @transform_16, window_bounds = array<i64: 4, 1, 1>}, {pipeline_mode = #tpu.pipeline_mode<synchronous>, transform_indices = @transform_17, window_bounds = array<i64: 4, 1, 1>}, {transform_indices = @transform_18, window_bounds = array<i64: 1, 4, 2, 16, 16>}]} {
    %c0 = arith.constant 0 : index
    %c0_0 = arith.constant 0 : index
    %c0_1 = arith.constant 0 : index
    %c0_2 = arith.constant 0 : index
    %0 = vector.load %arg1[%c0, %c0_0, %c0_1, %c0_2] : memref<1x8x16x16xf32, #tpu.memory_space<vmem>>, vector<1x8x16x16xf32>
    %1 = vector.shape_cast %0 : vector<1x8x16x16xf32> to vector<8x16x16xf32>
    %cst = arith.constant dense<0.000000e+00> : vector<16x16xf32>
    %2 = vector.multi_reduction <add>, %1, %cst [0] : vector<8x16x16xf32> to vector<16x16xf32>
    %3 = vector.shape_cast %2 : vector<16x16xf32> to vector<1x16x16xf32>
    %cst_3 = arith.constant 8.000000e+00 : f32
    %4 = vector.broadcast %cst_3 : f32 to vector<1x16x16xf32>
    %5 = arith.divf %3, %4 : vector<1x16x16xf32>
    %6 = vector.broadcast %5 : vector<1x16x16xf32> to vector<8x16x16xf32>
    %7 = arith.subf %1, %6 : vector<8x16x16xf32>
    %8 = arith.mulf %7, %7 : vector<8x16x16xf32>
    %cst_4 = arith.constant dense<0.000000e+00> : vector<16x16xf32>
    %9 = vector.multi_reduction <add>, %8, %cst_4 [0] : vector<8x16x16xf32> to vector<16x16xf32>
    %10 = vector.shape_cast %9 : vector<16x16xf32> to vector<1x16x16xf32>
    %cst_5 = arith.constant 8.000000e+00 : f32
    %11 = vector.broadcast %cst_5 : f32 to vector<1x16x16xf32>
    %12 = arith.divf %10, %11 : vector<1x16x16xf32>
    %c0_6 = arith.constant 0 : index
    %c0_7 = arith.constant 0 : index
    %c0_8 = arith.constant 0 : index
    %13 = vector.load %arg2[%c0_6, %c0_7, %c0_8] : memref<8x1x1xf32, #tpu.memory_space<vmem>>, vector<8x1x1xf32>
    %cst_9 = arith.constant 9.99999997E-7 : f32
    %14 = vector.broadcast %cst_9 : f32 to vector<1x16x16xf32>
    %15 = arith.addf %12, %14 : vector<1x16x16xf32>
    %16 = math.rsqrt %15 : vector<1x16x16xf32>
    %17 = vector.broadcast %16 : vector<1x16x16xf32> to vector<8x16x16xf32>
    %18 = arith.mulf %7, %17 : vector<8x16x16xf32>
    %19 = vector.broadcast %13 : vector<8x1x1xf32> to vector<8x16x16xf32>
    %20 = arith.mulf %19, %18 : vector<8x16x16xf32>
    %c0_10 = arith.constant 0 : index
    %c0_11 = arith.constant 0 : index
    %c0_12 = arith.constant 0 : index
    %21 = vector.load %arg3[%c0_10, %c0_11, %c0_12] : memref<8x1x1xf32, #tpu.memory_space<vmem>>, vector<8x1x1xf32>
    %22 = vector.broadcast %21 : vector<8x1x1xf32> to vector<8x16x16xf32>
    %23 = arith.addf %20, %22 : vector<8x16x16xf32>
    %24 = vector.extract_strided_slice %23 {offsets = [0, 0, 0], sizes = [4, 16, 16], strides = [1, 1, 1]} : vector<8x16x16xf32> to vector<4x16x16xf32>
    %cst_13 = arith.constant 0.000000e+00 : f32
    %25 = vector.broadcast %cst_13 : f32 to vector<4x16x16xf32>
    %c1_i32 = arith.constant 1 : i32
    %26 = tpu.dynamic_rotate %24 by %c1_i32 dim 1 : vector<4x16x16xf32>, i32 -> vector<4x16x16xf32>
    %c0_14 = arith.constant 0 : index
    %c0_15 = arith.constant 0 : index
    %c0_16 = arith.constant 0 : index
    %c0_17 = arith.constant 0 : index
    %27 = vector.load %arg5[%c0_14, %c0_15, %c0_16, %c0_17] : memref<3x1x16x1xf32, #tpu.memory_space<vmem>>, vector<1x1x16x1xf32>
    %28 = vector.shape_cast %27 : vector<1x1x16x1xf32> to vector<1x16x1xf32>
    %29 = vector.broadcast %28 : vector<1x16x1xf32> to vector<4x16x16xf32>
    %30 = arith.mulf %26, %29 : vector<4x16x16xf32>
    %c1_i32_18 = arith.constant 1 : i32
    %31 = tpu.dynamic_rotate %30 by %c1_i32_18 dim 2 : vector<4x16x16xf32>, i32 -> vector<4x16x16xf32>
    %c0_19 = arith.constant 0 : index
    %c0_20 = arith.constant 0 : index
    %c0_21 = arith.constant 0 : index
    %c0_22 = arith.constant 0 : index
    %32 = vector.load %arg6[%c0_19, %c0_20, %c0_21, %c0_22] : memref<3x1x1x16xf32, #tpu.memory_space<vmem>>, vector<1x1x1x16xf32>
    %33 = vector.shape_cast %32 : vector<1x1x1x16xf32> to vector<1x1x16xf32>
    %34 = vector.broadcast %33 : vector<1x1x16xf32> to vector<4x16x16xf32>
    %35 = arith.mulf %31, %34 : vector<4x16x16xf32>
    %c0_23 = arith.constant 0 : index
    %c0_24 = arith.constant 0 : index
    %c0_25 = arith.constant 0 : index
    %c0_26 = arith.constant 0 : index
    %c0_27 = arith.constant 0 : index
    %36 = vector.load %arg4[%c0_23, %c0_24, %c0_25, %c0_26, %c0_27] : memref<3x3x4x1x1xf32, #tpu.memory_space<vmem>>, vector<1x1x4x1x1xf32>
    %37 = vector.shape_cast %36 : vector<1x1x4x1x1xf32> to vector<4x1x1xf32>
    %38 = vector.broadcast %37 : vector<4x1x1xf32> to vector<4x16x16xf32>
    %39 = arith.mulf %38, %35 : vector<4x16x16xf32>
    %40 = arith.addf %25, %39 : vector<4x16x16xf32>
    %c0_28 = arith.constant 0 : index
    %c1 = arith.constant 1 : index
    %c0_29 = arith.constant 0 : index
    %c0_30 = arith.constant 0 : index
    %c0_31 = arith.constant 0 : index
    %41 = vector.load %arg4[%c0_28, %c1, %c0_29, %c0_30, %c0_31] : memref<3x3x4x1x1xf32, #tpu.memory_space<vmem>>, vector<1x1x4x1x1xf32>
    %42 = vector.shape_cast %41 : vector<1x1x4x1x1xf32> to vector<4x1x1xf32>
    %43 = vector.broadcast %42 : vector<4x1x1xf32> to vector<4x16x16xf32>
    %44 = arith.mulf %43, %30 : vector<4x16x16xf32>
    %45 = arith.addf %40, %44 : vector<4x16x16xf32>
    %c15_i32 = arith.constant 15 : i32
    %46 = tpu.dynamic_rotate %30 by %c15_i32 dim 2 : vector<4x16x16xf32>, i32 -> vector<4x16x16xf32>
    %c2 = arith.constant 2 : index
    %c0_32 = arith.constant 0 : index
    %c0_33 = arith.constant 0 : index
    %c0_34 = arith.constant 0 : index
    %47 = vector.load %arg6[%c2, %c0_32, %c0_33, %c0_34] : memref<3x1x1x16xf32, #tpu.memory_space<vmem>>, vector<1x1x1x16xf32>
    %48 = vector.shape_cast %47 : vector<1x1x1x16xf32> to vector<1x1x16xf32>
    %49 = vector.broadcast %48 : vector<1x1x16xf32> to vector<4x16x16xf32>
    %50 = arith.mulf %46, %49 : vector<4x16x16xf32>
    %c0_35 = arith.constant 0 : index
    %c2_36 = arith.constant 2 : index
    %c0_37 = arith.constant 0 : index
    %c0_38 = arith.constant 0 : index
    %c0_39 = arith.constant 0 : index
    %51 = vector.load %arg4[%c0_35, %c2_36, %c0_37, %c0_38, %c0_39] : memref<3x3x4x1x1xf32, #tpu.memory_space<vmem>>, vector<1x1x4x1x1xf32>
    %52 = vector.shape_cast %51 : vector<1x1x4x1x1xf32> to vector<4x1x1xf32>
    %53 = vector.broadcast %52 : vector<4x1x1xf32> to vector<4x16x16xf32>
    %54 = arith.mulf %53, %50 : vector<4x16x16xf32>
    %55 = arith.addf %45, %54 : vector<4x16x16xf32>
    %c1_i32_40 = arith.constant 1 : i32
    %56 = tpu.dynamic_rotate %24 by %c1_i32_40 dim 2 : vector<4x16x16xf32>, i32 -> vector<4x16x16xf32>
    %c0_41 = arith.constant 0 : index
    %c0_42 = arith.constant 0 : index
    %c0_43 = arith.constant 0 : index
    %c0_44 = arith.constant 0 : index
    %57 = vector.load %arg6[%c0_41, %c0_42, %c0_43, %c0_44] : memref<3x1x1x16xf32, #tpu.memory_space<vmem>>, vector<1x1x1x16xf32>
    %58 = vector.shape_cast %57 : vector<1x1x1x16xf32> to vector<1x1x16xf32>
    %59 = vector.broadcast %58 : vector<1x1x16xf32> to vector<4x16x16xf32>
    %60 = arith.mulf %56, %59 : vector<4x16x16xf32>
    %c1_45 = arith.constant 1 : index
    %c0_46 = arith.constant 0 : index
    %c0_47 = arith.constant 0 : index
    %c0_48 = arith.constant 0 : index
    %c0_49 = arith.constant 0 : index
    %61 = vector.load %arg4[%c1_45, %c0_46, %c0_47, %c0_48, %c0_49] : memref<3x3x4x1x1xf32, #tpu.memory_space<vmem>>, vector<1x1x4x1x1xf32>
    %62 = vector.shape_cast %61 : vector<1x1x4x1x1xf32> to vector<4x1x1xf32>
    %63 = vector.broadcast %62 : vector<4x1x1xf32> to vector<4x16x16xf32>
    %64 = arith.mulf %63, %60 : vector<4x16x16xf32>
    %65 = arith.addf %55, %64 : vector<4x16x16xf32>
    %c1_50 = arith.constant 1 : index
    %c1_51 = arith.constant 1 : index
    %c0_52 = arith.constant 0 : index
    %c0_53 = arith.constant 0 : index
    %c0_54 = arith.constant 0 : index
    %66 = vector.load %arg4[%c1_50, %c1_51, %c0_52, %c0_53, %c0_54] : memref<3x3x4x1x1xf32, #tpu.memory_space<vmem>>, vector<1x1x4x1x1xf32>
    %67 = vector.shape_cast %66 : vector<1x1x4x1x1xf32> to vector<4x1x1xf32>
    %68 = vector.broadcast %67 : vector<4x1x1xf32> to vector<4x16x16xf32>
    %69 = arith.mulf %68, %24 : vector<4x16x16xf32>
    %70 = arith.addf %65, %69 : vector<4x16x16xf32>
    %c15_i32_55 = arith.constant 15 : i32
    %71 = tpu.dynamic_rotate %24 by %c15_i32_55 dim 2 : vector<4x16x16xf32>, i32 -> vector<4x16x16xf32>
    %c2_56 = arith.constant 2 : index
    %c0_57 = arith.constant 0 : index
    %c0_58 = arith.constant 0 : index
    %c0_59 = arith.constant 0 : index
    %72 = vector.load %arg6[%c2_56, %c0_57, %c0_58, %c0_59] : memref<3x1x1x16xf32, #tpu.memory_space<vmem>>, vector<1x1x1x16xf32>
    %73 = vector.shape_cast %72 : vector<1x1x1x16xf32> to vector<1x1x16xf32>
    %74 = vector.broadcast %73 : vector<1x1x16xf32> to vector<4x16x16xf32>
    %75 = arith.mulf %71, %74 : vector<4x16x16xf32>
    %c1_60 = arith.constant 1 : index
    %c2_61 = arith.constant 2 : index
    %c0_62 = arith.constant 0 : index
    %c0_63 = arith.constant 0 : index
    %c0_64 = arith.constant 0 : index
    %76 = vector.load %arg4[%c1_60, %c2_61, %c0_62, %c0_63, %c0_64] : memref<3x3x4x1x1xf32, #tpu.memory_space<vmem>>, vector<1x1x4x1x1xf32>
    %77 = vector.shape_cast %76 : vector<1x1x4x1x1xf32> to vector<4x1x1xf32>
    %78 = vector.broadcast %77 : vector<4x1x1xf32> to vector<4x16x16xf32>
    %79 = arith.mulf %78, %75 : vector<4x16x16xf32>
    %80 = arith.addf %70, %79 : vector<4x16x16xf32>
    %c15_i32_65 = arith.constant 15 : i32
    %81 = tpu.dynamic_rotate %24 by %c15_i32_65 dim 1 : vector<4x16x16xf32>, i32 -> vector<4x16x16xf32>
    %c2_66 = arith.constant 2 : index
    %c0_67 = arith.constant 0 : index
    %c0_68 = arith.constant 0 : index
    %c0_69 = arith.constant 0 : index
    %82 = vector.load %arg5[%c2_66, %c0_67, %c0_68, %c0_69] : memref<3x1x16x1xf32, #tpu.memory_space<vmem>>, vector<1x1x16x1xf32>
    %83 = vector.shape_cast %82 : vector<1x1x16x1xf32> to vector<1x16x1xf32>
    %84 = vector.broadcast %83 : vector<1x16x1xf32> to vector<4x16x16xf32>
    %85 = arith.mulf %81, %84 : vector<4x16x16xf32>
    %c1_i32_70 = arith.constant 1 : i32
    %86 = tpu.dynamic_rotate %85 by %c1_i32_70 dim 2 : vector<4x16x16xf32>, i32 -> vector<4x16x16xf32>
    %c0_71 = arith.constant 0 : index
    %c0_72 = arith.constant 0 : index
    %c0_73 = arith.constant 0 : index
    %c0_74 = arith.constant 0 : index
    %87 = vector.load %arg6[%c0_71, %c0_72, %c0_73, %c0_74] : memref<3x1x1x16xf32, #tpu.memory_space<vmem>>, vector<1x1x1x16xf32>
    %88 = vector.shape_cast %87 : vector<1x1x1x16xf32> to vector<1x1x16xf32>
    %89 = vector.broadcast %88 : vector<1x1x16xf32> to vector<4x16x16xf32>
    %90 = arith.mulf %86, %89 : vector<4x16x16xf32>
    %c2_75 = arith.constant 2 : index
    %c0_76 = arith.constant 0 : index
    %c0_77 = arith.constant 0 : index
    %c0_78 = arith.constant 0 : index
    %c0_79 = arith.constant 0 : index
    %91 = vector.load %arg4[%c2_75, %c0_76, %c0_77, %c0_78, %c0_79] : memref<3x3x4x1x1xf32, #tpu.memory_space<vmem>>, vector<1x1x4x1x1xf32>
    %92 = vector.shape_cast %91 : vector<1x1x4x1x1xf32> to vector<4x1x1xf32>
    %93 = vector.broadcast %92 : vector<4x1x1xf32> to vector<4x16x16xf32>
    %94 = arith.mulf %93, %90 : vector<4x16x16xf32>
    %95 = arith.addf %80, %94 : vector<4x16x16xf32>
    %c2_80 = arith.constant 2 : index
    %c1_81 = arith.constant 1 : index
    %c0_82 = arith.constant 0 : index
    %c0_83 = arith.constant 0 : index
    %c0_84 = arith.constant 0 : index
    %96 = vector.load %arg4[%c2_80, %c1_81, %c0_82, %c0_83, %c0_84] : memref<3x3x4x1x1xf32, #tpu.memory_space<vmem>>, vector<1x1x4x1x1xf32>
    %97 = vector.shape_cast %96 : vector<1x1x4x1x1xf32> to vector<4x1x1xf32>
    %98 = vector.broadcast %97 : vector<4x1x1xf32> to vector<4x16x16xf32>
    %99 = arith.mulf %98, %85 : vector<4x16x16xf32>
    %100 = arith.addf %95, %99 : vector<4x16x16xf32>
    %c15_i32_85 = arith.constant 15 : i32
    %101 = tpu.dynamic_rotate %85 by %c15_i32_85 dim 2 : vector<4x16x16xf32>, i32 -> vector<4x16x16xf32>
    %c2_86 = arith.constant 2 : index
    %c0_87 = arith.constant 0 : index
    %c0_88 = arith.constant 0 : index
    %c0_89 = arith.constant 0 : index
    %102 = vector.load %arg6[%c2_86, %c0_87, %c0_88, %c0_89] : memref<3x1x1x16xf32, #tpu.memory_space<vmem>>, vector<1x1x1x16xf32>
    %103 = vector.shape_cast %102 : vector<1x1x1x16xf32> to vector<1x1x16xf32>
    %104 = vector.broadcast %103 : vector<1x1x16xf32> to vector<4x16x16xf32>
    %105 = arith.mulf %101, %104 : vector<4x16x16xf32>
    %c2_90 = arith.constant 2 : index
    %c2_91 = arith.constant 2 : index
    %c0_92 = arith.constant 0 : index
    %c0_93 = arith.constant 0 : index
    %c0_94 = arith.constant 0 : index
    %106 = vector.load %arg4[%c2_90, %c2_91, %c0_92, %c0_93, %c0_94] : memref<3x3x4x1x1xf32, #tpu.memory_space<vmem>>, vector<1x1x4x1x1xf32>
    %107 = vector.shape_cast %106 : vector<1x1x4x1x1xf32> to vector<4x1x1xf32>
    %108 = vector.broadcast %107 : vector<4x1x1xf32> to vector<4x16x16xf32>
    %109 = arith.mulf %108, %105 : vector<4x16x16xf32>
    %110 = arith.addf %100, %109 : vector<4x16x16xf32>
    %c0_95 = arith.constant 0 : index
    %c0_96 = arith.constant 0 : index
    %111 = vector.load %arg9[%c0_95, %c0_96] : memref<16x16xbf16, #tpu.memory_space<vmem>>, vector<16x16xbf16>
    %c0_97 = arith.constant 0 : index
    %c0_98 = arith.constant 0 : index
    %112 = vector.load %arg10[%c0_97, %c0_98] : memref<16x16xbf16, #tpu.memory_space<vmem>>, vector<16x16xbf16>
    %c0_99 = arith.constant 0 : index
    %c0_100 = arith.constant 0 : index
    %113 = vector.load %arg11[%c0_99, %c0_100] : memref<16x16xbf16, #tpu.memory_space<vmem>>, vector<16x16xbf16>
    %c0_101 = arith.constant 0 : index
    %c0_102 = arith.constant 0 : index
    %114 = vector.load %arg12[%c0_101, %c0_102] : memref<16x16xbf16, #tpu.memory_space<vmem>>, vector<16x16xbf16>
    %115 = vector.extract_strided_slice %23 {offsets = [4, 0, 0], sizes = [4, 16, 16], strides = [1, 1, 1]} : vector<8x16x16xf32> to vector<4x16x16xf32>
    %116 = vector.shape_cast %115 : vector<4x16x16xf32> to vector<64x16xf32>
    %117 = arith.truncf %116 : vector<64x16xf32> to vector<64x16xbf16>
    %cst_103 = arith.constant dense<0.000000e+00> : vector<64x16xf32>
    %118 = tpu.matmul %117, %111, %cst_103 {dimension_numbers = #tpu.dot_dimension_numbers<[1], [0], [0], [1], [0, 0, 1, 1], [], []>} : vector<64x16xbf16>, vector<16x16xbf16>, vector<64x16xf32> -> vector<64x16xf32>
    %cst_104 = arith.constant dense<0.000000e+00> : vector<64x16xf32>
    %119 = tpu.matmul %117, %112, %cst_104 {dimension_numbers = #tpu.dot_dimension_numbers<[1], [0], [0], [1], [0, 0, 1, 1], [], []>} : vector<64x16xbf16>, vector<16x16xbf16>, vector<64x16xf32> -> vector<64x16xf32>
    %120 = vector.shape_cast %118 : vector<64x16xf32> to vector<4x16x16xf32>
    %121 = tpu.transpose %120, [0, 2, 1] : vector<4x16x16xf32> -> vector<4x16x16xf32>
    %122 = vector.shape_cast %121 : vector<4x16x16xf32> to vector<64x16xf32>
    %123 = arith.truncf %122 : vector<64x16xf32> to vector<64x16xbf16>
    %124 = vector.shape_cast %119 : vector<64x16xf32> to vector<4x16x16xf32>
    %125 = tpu.transpose %124, [0, 2, 1] : vector<4x16x16xf32> -> vector<4x16x16xf32>
    %126 = vector.shape_cast %125 : vector<4x16x16xf32> to vector<64x16xf32>
    %127 = arith.truncf %126 : vector<64x16xf32> to vector<64x16xbf16>
    %cst_105 = arith.constant dense<0.000000e+00> : vector<64x16xf32>
    %128 = tpu.matmul %123, %113, %cst_105 {dimension_numbers = #tpu.dot_dimension_numbers<[1], [0], [0], [1], [0, 0, 1, 1], [], []>} : vector<64x16xbf16>, vector<16x16xbf16>, vector<64x16xf32> -> vector<64x16xf32>
    %cst_106 = arith.constant dense<0.000000e+00> : vector<64x16xf32>
    %129 = tpu.matmul %127, %114, %cst_106 {dimension_numbers = #tpu.dot_dimension_numbers<[1], [0], [0], [1], [0, 0, 1, 1], [], []>} : vector<64x16xbf16>, vector<16x16xbf16>, vector<64x16xf32> -> vector<64x16xf32>
    %130 = arith.subf %128, %129 : vector<64x16xf32>
    %cst_107 = arith.constant dense<0.000000e+00> : vector<64x16xf32>
    %131 = tpu.matmul %127, %113, %cst_107 {dimension_numbers = #tpu.dot_dimension_numbers<[1], [0], [0], [1], [0, 0, 1, 1], [], []>} : vector<64x16xbf16>, vector<16x16xbf16>, vector<64x16xf32> -> vector<64x16xf32>
    %cst_108 = arith.constant dense<0.000000e+00> : vector<64x16xf32>
    %132 = tpu.matmul %123, %114, %cst_108 {dimension_numbers = #tpu.dot_dimension_numbers<[1], [0], [0], [1], [0, 0, 1, 1], [], []>} : vector<64x16xbf16>, vector<16x16xbf16>, vector<64x16xf32> -> vector<64x16xf32>
    %133 = arith.addf %131, %132 : vector<64x16xf32>
    %c0_109 = arith.constant 0 : index
    %c0_110 = arith.constant 0 : index
    %134 = vector.load %arg7[%c0_109, %c0_110] : memref<64x16xf32, #tpu.memory_space<vmem>>, vector<64x16xf32>
    %c0_111 = arith.constant 0 : index
    %c0_112 = arith.constant 0 : index
    %135 = vector.load %arg8[%c0_111, %c0_112] : memref<64x16xf32, #tpu.memory_space<vmem>>, vector<64x16xf32>
    %136 = arith.mulf %130, %134 : vector<64x16xf32>
    %137 = arith.mulf %133, %135 : vector<64x16xf32>
    %138 = arith.addf %136, %137 : vector<64x16xf32>
    %139 = arith.mulf %133, %134 : vector<64x16xf32>
    %140 = arith.mulf %130, %135 : vector<64x16xf32>
    %141 = arith.subf %139, %140 : vector<64x16xf32>
    %142 = arith.truncf %138 : vector<64x16xf32> to vector<64x16xbf16>
    %143 = arith.truncf %141 : vector<64x16xf32> to vector<64x16xbf16>
    %cst_113 = arith.constant dense<0.000000e+00> : vector<64x16xf32>
    %144 = tpu.matmul %142, %113, %cst_113 {dimension_numbers = #tpu.dot_dimension_numbers<[1], [0], [0], [1], [0, 0, 1, 1], [], []>} : vector<64x16xbf16>, vector<16x16xbf16>, vector<64x16xf32> -> vector<64x16xf32>
    %cst_114 = arith.constant dense<0.000000e+00> : vector<64x16xf32>
    %145 = tpu.matmul %143, %114, %cst_114 {dimension_numbers = #tpu.dot_dimension_numbers<[1], [0], [0], [1], [0, 0, 1, 1], [], []>} : vector<64x16xbf16>, vector<16x16xbf16>, vector<64x16xf32> -> vector<64x16xf32>
    %146 = arith.addf %144, %145 : vector<64x16xf32>
    %cst_115 = arith.constant dense<0.000000e+00> : vector<64x16xf32>
    %147 = tpu.matmul %142, %114, %cst_115 {dimension_numbers = #tpu.dot_dimension_numbers<[1], [0], [0], [1], [0, 0, 1, 1], [], []>} : vector<64x16xbf16>, vector<16x16xbf16>, vector<64x16xf32> -> vector<64x16xf32>
    %cst_116 = arith.constant dense<0.000000e+00> : vector<64x16xf32>
    %148 = tpu.matmul %143, %113, %cst_116 {dimension_numbers = #tpu.dot_dimension_numbers<[1], [0], [0], [1], [0, 0, 1, 1], [], []>} : vector<64x16xbf16>, vector<16x16xbf16>, vector<64x16xf32> -> vector<64x16xf32>
    %149 = arith.subf %147, %148 : vector<64x16xf32>
    %150 = vector.shape_cast %146 : vector<64x16xf32> to vector<4x16x16xf32>
    %151 = tpu.transpose %150, [0, 2, 1] : vector<4x16x16xf32> -> vector<4x16x16xf32>
    %152 = vector.shape_cast %151 : vector<4x16x16xf32> to vector<64x16xf32>
    %153 = arith.truncf %152 : vector<64x16xf32> to vector<64x16xbf16>
    %154 = vector.shape_cast %149 : vector<64x16xf32> to vector<4x16x16xf32>
    %155 = tpu.transpose %154, [0, 2, 1] : vector<4x16x16xf32> -> vector<4x16x16xf32>
    %156 = vector.shape_cast %155 : vector<4x16x16xf32> to vector<64x16xf32>
    %157 = arith.truncf %156 : vector<64x16xf32> to vector<64x16xbf16>
    %c0_117 = arith.constant 0 : index
    %c0_118 = arith.constant 0 : index
    %158 = vector.load %arg13[%c0_117, %c0_118] : memref<16x16xbf16, #tpu.memory_space<vmem>>, vector<16x16xbf16>
    %cst_119 = arith.constant dense<0.000000e+00> : vector<64x16xf32>
    %159 = tpu.matmul %153, %158, %cst_119 {dimension_numbers = #tpu.dot_dimension_numbers<[1], [0], [0], [1], [0, 0, 1, 1], [], []>} : vector<64x16xbf16>, vector<16x16xbf16>, vector<64x16xf32> -> vector<64x16xf32>
    %c0_120 = arith.constant 0 : index
    %c0_121 = arith.constant 0 : index
    %160 = vector.load %arg14[%c0_120, %c0_121] : memref<16x16xbf16, #tpu.memory_space<vmem>>, vector<16x16xbf16>
    %cst_122 = arith.constant dense<0.000000e+00> : vector<64x16xf32>
    %161 = tpu.matmul %157, %160, %cst_122 {dimension_numbers = #tpu.dot_dimension_numbers<[1], [0], [0], [1], [0, 0, 1, 1], [], []>} : vector<64x16xbf16>, vector<16x16xbf16>, vector<64x16xf32> -> vector<64x16xf32>
    %162 = arith.subf %159, %161 : vector<64x16xf32>
    %163 = vector.shape_cast %162 : vector<64x16xf32> to vector<4x16x16xf32>
    %cst_123 = arith.constant dense<0.000000e+00> : vector<16x16xf32>
    %164 = vector.multi_reduction <add>, %110, %cst_123 [0] : vector<4x16x16xf32> to vector<16x16xf32>
    %165 = vector.shape_cast %164 : vector<16x16xf32> to vector<1x16x16xf32>
    %cst_124 = arith.constant dense<0.000000e+00> : vector<16x16xf32>
    %166 = vector.multi_reduction <add>, %163, %cst_124 [0] : vector<4x16x16xf32> to vector<16x16xf32>
    %167 = vector.shape_cast %166 : vector<16x16xf32> to vector<1x16x16xf32>
    %168 = arith.addf %165, %167 : vector<1x16x16xf32>
    %cst_125 = arith.constant 1.250000e-01 : f32
    %169 = vector.broadcast %cst_125 : f32 to vector<1x16x16xf32>
    %170 = arith.mulf %168, %169 : vector<1x16x16xf32>
    %171 = vector.broadcast %170 : vector<1x16x16xf32> to vector<4x16x16xf32>
    %172 = arith.subf %110, %171 : vector<4x16x16xf32>
    %173 = vector.broadcast %170 : vector<1x16x16xf32> to vector<4x16x16xf32>
    %174 = arith.subf %163, %173 : vector<4x16x16xf32>
    %175 = arith.mulf %172, %172 : vector<4x16x16xf32>
    %cst_126 = arith.constant dense<0.000000e+00> : vector<16x16xf32>
    %176 = vector.multi_reduction <add>, %175, %cst_126 [0] : vector<4x16x16xf32> to vector<16x16xf32>
    %177 = vector.shape_cast %176 : vector<16x16xf32> to vector<1x16x16xf32>
    %178 = arith.mulf %174, %174 : vector<4x16x16xf32>
    %cst_127 = arith.constant dense<0.000000e+00> : vector<16x16xf32>
    %179 = vector.multi_reduction <add>, %178, %cst_127 [0] : vector<4x16x16xf32> to vector<16x16xf32>
    %180 = vector.shape_cast %179 : vector<16x16xf32> to vector<1x16x16xf32>
    %181 = arith.addf %177, %180 : vector<1x16x16xf32>
    %cst_128 = arith.constant 1.250000e-01 : f32
    %182 = vector.broadcast %cst_128 : f32 to vector<1x16x16xf32>
    %183 = arith.mulf %181, %182 : vector<1x16x16xf32>
    %cst_129 = arith.constant 9.99999997E-7 : f32
    %184 = vector.broadcast %cst_129 : f32 to vector<1x16x16xf32>
    %185 = arith.addf %183, %184 : vector<1x16x16xf32>
    %186 = math.rsqrt %185 : vector<1x16x16xf32>
    %c0_130 = arith.constant 0 : index
    %c0_131 = arith.constant 0 : index
    %c0_132 = arith.constant 0 : index
    %187 = vector.load %arg15[%c0_130, %c0_131, %c0_132] : memref<4x1x1xf32, #tpu.memory_space<vmem>>, vector<4x1x1xf32>
    %188 = vector.broadcast %186 : vector<1x16x16xf32> to vector<4x16x16xf32>
    %189 = arith.mulf %172, %188 : vector<4x16x16xf32>
    %190 = vector.broadcast %187 : vector<4x1x1xf32> to vector<4x16x16xf32>
    %191 = arith.mulf %190, %189 : vector<4x16x16xf32>
    %c0_133 = arith.constant 0 : index
    %c0_134 = arith.constant 0 : index
    %c0_135 = arith.constant 0 : index
    %192 = vector.load %arg16[%c0_133, %c0_134, %c0_135] : memref<4x1x1xf32, #tpu.memory_space<vmem>>, vector<4x1x1xf32>
    %193 = vector.broadcast %192 : vector<4x1x1xf32> to vector<4x16x16xf32>
    %194 = arith.addf %191, %193 : vector<4x16x16xf32>
    %c0_136 = arith.constant 0 : index
    %c0_137 = arith.constant 0 : index
    %c0_138 = arith.constant 0 : index
    %c0_139 = arith.constant 0 : index
    %c0_140 = arith.constant 0 : index
    %195 = vector.load %arg19[%c0_136, %c0_137, %c0_138, %c0_139, %c0_140] : memref<1x4x2x16x16xf32, #tpu.memory_space<vmem>>, vector<1x4x1x16x16xf32>
    %196 = vector.shape_cast %195 : vector<1x4x1x16x16xf32> to vector<4x16x16xf32>
    %197 = vector.shape_cast %194 : vector<4x16x16xf32> to vector<1x4x1x16x16xf32>
    tpu.vector_store %arg19[%c0_136, %c0_137, %c0_138, %c0_139, %c0_140], %197 {strides = array<i32>} : memref<1x4x2x16x16xf32, #tpu.memory_space<vmem>>, vector<1x4x1x16x16xf32>,
    %c0_141 = arith.constant 0 : index
    %c0_142 = arith.constant 0 : index
    %c0_143 = arith.constant 0 : index
    %198 = vector.load %arg17[%c0_141, %c0_142, %c0_143] : memref<4x1x1xf32, #tpu.memory_space<vmem>>, vector<4x1x1xf32>
    %199 = vector.broadcast %186 : vector<1x16x16xf32> to vector<4x16x16xf32>
    %200 = arith.mulf %174, %199 : vector<4x16x16xf32>
    %201 = vector.broadcast %198 : vector<4x1x1xf32> to vector<4x16x16xf32>
    %202 = arith.mulf %201, %200 : vector<4x16x16xf32>
    %c0_144 = arith.constant 0 : index
    %c0_145 = arith.constant 0 : index
    %c0_146 = arith.constant 0 : index
    %203 = vector.load %arg18[%c0_144, %c0_145, %c0_146] : memref<4x1x1xf32, #tpu.memory_space<vmem>>, vector<4x1x1xf32>
    %204 = vector.broadcast %203 : vector<4x1x1xf32> to vector<4x16x16xf32>
    %205 = arith.addf %202, %204 : vector<4x16x16xf32>
    %c0_147 = arith.constant 0 : index
    %c0_148 = arith.constant 0 : index
    %c1_149 = arith.constant 1 : index
    %c0_150 = arith.constant 0 : index
    %c0_151 = arith.constant 0 : index
    %206 = vector.load %arg19[%c0_147, %c0_148, %c1_149, %c0_150, %c0_151] : memref<1x4x2x16x16xf32, #tpu.memory_space<vmem>>, vector<1x4x1x16x16xf32>
    %207 = vector.shape_cast %206 : vector<1x4x1x16x16xf32> to vector<4x16x16xf32>
    %208 = vector.shape_cast %205 : vector<4x16x16xf32> to vector<1x4x1x16x16xf32>
    tpu.vector_store %arg19[%c0_147, %c0_148, %c1_149, %c0_150, %c0_151], %208 {strides = array<i32>} : memref<1x4x2x16x16xf32, #tpu.memory_space<vmem>>, vector<1x4x1x16x16xf32>,
    return
  }
  func.func @transform_0(%arg0: i32) -> (i32, i32, i32, i32) {
    %c0_i32 = arith.constant 0 : i32
    %c0_i32_0 = arith.constant 0 : i32
    %c0_i32_1 = arith.constant 0 : i32
    %c0_i32_2 = arith.constant 0 : i32
    return %arg0, %c0_i32, %c0_i32_0, %c0_i32_1 : i32, i32, i32, i32
  }
  func.func @transform_1(%arg0: i32) -> (i32, i32, i32) {
    %c0_i32 = arith.constant 0 : i32
    %c0_i32_0 = arith.constant 0 : i32
    %c0_i32_1 = arith.constant 0 : i32
    %c0_i32_2 = arith.constant 0 : i32
    return %c0_i32, %c0_i32_0, %c0_i32_1 : i32, i32, i32
  }
  func.func @transform_2(%arg0: i32) -> (i32, i32, i32) {
    %c0_i32 = arith.constant 0 : i32
    %c0_i32_0 = arith.constant 0 : i32
    %c0_i32_1 = arith.constant 0 : i32
    %c0_i32_2 = arith.constant 0 : i32
    return %c0_i32, %c0_i32_0, %c0_i32_1 : i32, i32, i32
  }
  func.func @transform_3(%arg0: i32) -> (i32, i32, i32, i32, i32) {
    %c0_i32 = arith.constant 0 : i32
    %c0_i32_0 = arith.constant 0 : i32
    %c0_i32_1 = arith.constant 0 : i32
    %c0_i32_2 = arith.constant 0 : i32
    %c0_i32_3 = arith.constant 0 : i32
    %c0_i32_4 = arith.constant 0 : i32
    return %c0_i32, %c0_i32_0, %c0_i32_1, %c0_i32_2, %c0_i32_3 : i32, i32, i32, i32, i32
  }
  func.func @transform_4(%arg0: i32) -> (i32, i32, i32, i32) {
    %c0_i32 = arith.constant 0 : i32
    %c0_i32_0 = arith.constant 0 : i32
    %c0_i32_1 = arith.constant 0 : i32
    %c0_i32_2 = arith.constant 0 : i32
    %c0_i32_3 = arith.constant 0 : i32
    return %c0_i32, %c0_i32_0, %c0_i32_1, %c0_i32_2 : i32, i32, i32, i32
  }
  func.func @transform_5(%arg0: i32) -> (i32, i32, i32, i32) {
    %c0_i32 = arith.constant 0 : i32
    %c0_i32_0 = arith.constant 0 : i32
    %c0_i32_1 = arith.constant 0 : i32
    %c0_i32_2 = arith.constant 0 : i32
    %c0_i32_3 = arith.constant 0 : i32
    return %c0_i32, %c0_i32_0, %c0_i32_1, %c0_i32_2 : i32, i32, i32, i32
  }
  func.func @transform_6(%arg0: i32) -> (i32, i32) {
    %c0_i32 = arith.constant 0 : i32
    %c0_i32_0 = arith.constant 0 : i32
    %c0_i32_1 = arith.constant 0 : i32
    return %c0_i32, %c0_i32_0 : i32, i32
  }
  func.func @transform_7(%arg0: i32) -> (i32, i32) {
    %c0_i32 = arith.constant 0 : i32
    %c0_i32_0 = arith.constant 0 : i32
    %c0_i32_1 = arith.constant 0 : i32
    return %c0_i32, %c0_i32_0 : i32, i32
  }
  func.func @transform_8(%arg0: i32) -> (i32, i32) {
    %c0_i32 = arith.constant 0 : i32
    %c0_i32_0 = arith.constant 0 : i32
    %c0_i32_1 = arith.constant 0 : i32
    return %c0_i32, %c0_i32_0 : i32, i32
  }
  func.func @transform_9(%arg0: i32) -> (i32, i32) {
    %c0_i32 = arith.constant 0 : i32
    %c0_i32_0 = arith.constant 0 : i32
    %c0_i32_1 = arith.constant 0 : i32
    return %c0_i32, %c0_i32_0 : i32, i32
  }
  func.func @transform_10(%arg0: i32) -> (i32, i32) {
    %c0_i32 = arith.constant 0 : i32
    %c0_i32_0 = arith.constant 0 : i32
    %c0_i32_1 = arith.constant 0 : i32
    return %c0_i32, %c0_i32_0 : i32, i32
  }
  func.func @transform_11(%arg0: i32) -> (i32, i32) {
    %c0_i32 = arith.constant 0 : i32
    %c0_i32_0 = arith.constant 0 : i32
    %c0_i32_1 = arith.constant 0 : i32
    return %c0_i32, %c0_i32_0 : i32, i32
  }
  func.func @transform_12(%arg0: i32) -> (i32, i32) {
    %c0_i32 = arith.constant 0 : i32
    %c0_i32_0 = arith.constant 0 : i32
    %c0_i32_1 = arith.constant 0 : i32
    return %c0_i32, %c0_i32_0 : i32, i32
  }
  func.func @transform_13(%arg0: i32) -> (i32, i32) {
    %c0_i32 = arith.constant 0 : i32
    %c0_i32_0 = arith.constant 0 : i32
    %c0_i32_1 = arith.constant 0 : i32
    return %c0_i32, %c0_i32_0 : i32, i32
  }
  func.func @transform_14(%arg0: i32) -> (i32, i32, i32) {
    %c0_i32 = arith.constant 0 : i32
    %c0_i32_0 = arith.constant 0 : i32
    %c0_i32_1 = arith.constant 0 : i32
    %c0_i32_2 = arith.constant 0 : i32
    return %c0_i32, %c0_i32_0, %c0_i32_1 : i32, i32, i32
  }
  func.func @transform_15(%arg0: i32) -> (i32, i32, i32) {
    %c0_i32 = arith.constant 0 : i32
    %c0_i32_0 = arith.constant 0 : i32
    %c0_i32_1 = arith.constant 0 : i32
    %c0_i32_2 = arith.constant 0 : i32
    return %c0_i32, %c0_i32_0, %c0_i32_1 : i32, i32, i32
  }
  func.func @transform_16(%arg0: i32) -> (i32, i32, i32) {
    %c0_i32 = arith.constant 0 : i32
    %c0_i32_0 = arith.constant 0 : i32
    %c0_i32_1 = arith.constant 0 : i32
    %c0_i32_2 = arith.constant 0 : i32
    return %c0_i32, %c0_i32_0, %c0_i32_1 : i32, i32, i32
  }
  func.func @transform_17(%arg0: i32) -> (i32, i32, i32) {
    %c0_i32 = arith.constant 0 : i32
    %c0_i32_0 = arith.constant 0 : i32
    %c0_i32_1 = arith.constant 0 : i32
    %c0_i32_2 = arith.constant 0 : i32
    return %c0_i32, %c0_i32_0, %c0_i32_1 : i32, i32, i32
  }
  func.func @transform_18(%arg0: i32) -> (i32, i32, i32, i32, i32) {
    %c0_i32 = arith.constant 0 : i32
    %c0_i32_0 = arith.constant 0 : i32
    %c0_i32_1 = arith.constant 0 : i32
    %c0_i32_2 = arith.constant 0 : i32
    %c0_i32_3 = arith.constant 0 : i32
    return %arg0, %c0_i32, %c0_i32_0, %c0_i32_1, %c0_i32_2 : i32, i32, i32, i32, i32
  }
}

</mosaic_0001>

<bundles_post_ra>
// kernel: tpu_custom_call.1
= control target key start
LH: loop header
LB: loop body
LE: loop exit
PB: predicated region body
PF: predicated region fallthrough
CT: control target
= control target key end

     0   :  { %s6451_s0 = inlined_call_operand.vmem [shape: f32[2,8,16,16], index: 0, kind: input, shape index: {}]   ;;  %s6452_s1 = inlined_call_operand.vmem [shape: f32[8,1,1], index: 1, kind: input, shape index: {}]   ;;  %s6453_s2 = inlined_call_operand.vmem [shape: f32[8,1,1], index: 2, kind: input, shape index: {}]   ;;  %s6454_s3 = inlined_call_operand.vmem [shape: f32[3,3,4,1,1], index: 3, kind: input, shape index: {}]   ;;  %s6455_s4 = inlined_call_operand.vmem [shape: f32[3,1,16,1], index: 4, kind: input, shape index: {}]   ;;  %s6456_s5 = inlined_call_operand.hbm [shape: f32[3,1,1,16], index: 5, kind: input, shape index: {}]   ;;  %s6457_s6 = inlined_call_operand.vmem [shape: f32[64,16], index: 6, kind: input, shape index: {}]   ;;  %s6458_s7 = inlined_call_operand.vmem [shape: f32[64,16], index: 7, kind: input, shape index: {}]   ;;  %s6459_s8 = inlined_call_operand.vmem [shape: bf16[16,16], index: 8, kind: input, shape index: {}]   ;;  %s6460_s9 = inlined_call_operand.hbm [shape: bf16[16,16], index: 9, kind: input, shape index: {}]   ;;  %s6461_s10 = inlined_call_operand.hbm [shape: bf16[16,16], index: 10, kind: input, shape index: {}]   ;;  %s6462_s11 = inlined_call_operand.hbm [shape: bf16[16,16], index: 11, kind: input, shape index: {}]   ;;  %s6463_s12 = inlined_call_operand.vmem [shape: bf16[16,16], index: 12, kind: input, shape index: {}]   ;;  %s6464_s13 = inlined_call_operand.hbm [shape: bf16[16,16], index: 13, kind: input, shape index: {}]   ;;  %s6465_s14 = inlined_call_operand.vmem [shape: f32[4,1,1], index: 14, kind: input, shape index: {}]   ;;  %s6466_s15 = inlined_call_operand.vmem [shape: f32[4,1,1], index: 15, kind: input, shape index: {}]   ;;  %s6467_s16 = inlined_call_operand.vmem [shape: f32[4,1,1], index: 16, kind: input, shape index: {}]   ;;  %s6468_s17 = inlined_call_operand.vmem [shape: f32[4,1,1], index: 17, kind: input, shape index: {}]   ;;  %s6469_s18 = inlined_call_operand.hbm [shape: f32[2,4,2,16,16], index: 18, kind: output, shape index: {}]  }
   0x1   :  { %6508 = sst [smem:[#allocation37_spill]] %s6451_s0 }
   0x2   :  { %6509 = sst [smem:[#allocation38_spill]] %s6452_s1 }
   0x3   :  { %6510 = sst [smem:[#allocation39_spill]] %s6453_s2 }
   0x4   :  { %6511 = sst [smem:[#allocation40_spill]] %s6460_s9 }
   0x5   :  { %6512 = sst [smem:[#allocation41_spill]] %s6462_s11 }
   0x6   :  { %6513 = sst [smem:[#allocation42_spill]] %s6469_s18 }
   0x7   :  { %23 = vsyncpa [#allocation3], 0 }
   0x8   :  { %24 = vsyncpa [#allocation6], 0 }
   0x9   :  { %25 = vsyncpa [#allocation9], 0 }
   0xa   :  { %26 = vsyncpa [#allocation4], 0 }
   0xb   :  { %28 = vsyncpa [#allocation4 + $0x1], 0  ;;  %s4941_s27 = smov 0   ;;  %s4943_s28 = smov 0  }
   0xc   :  { %s4945_s29 = smov 0   ;;  %s4947_s30 = smov 0  }
   0xd LB: > { %6514 = sst [smem:[#allocation16_spill]] %s4814_s27  ;;  %s4962_s0 = sadd.s32 4294967295, %s4826_s30   ;;  %s4826_s30 = sphi %s4947_s30, %s6572_s30   ;;  %s4822_s29 = sphi %s4945_s29, %s6574_s29   ;;  %s4818_s28 = sphi %s4943_s28, %s6576_s28   ;;  %s4814_s27 = sphi %s4941_s27, %s6575_s27  }
   0xe   : > { %6515 = sst [smem:[#allocation17_spill]] %s4822_s29  ;;  %s4023_s19 = sadd.s32 4294967294, %s4826_s30  }
   0xf   : > { %6516 = sst [smem:[#allocation18_spill]] %s4826_s30  ;;  %s4966_s1 = sadd.s32 1, %s4826_s30  }
  0x10   : > { %6517 = sst [smem:[#allocation19_spill]] %s4966_s1  ;;  %s424_s20 = sadd.s32 1, %s4822_s29 }
  0x11   : > { %s421_s21 = ssub.s32 %s4826_s30, %s4966_s1  ;;  %p434_p0 = scmp.ne.s32.totalorder %s4822_s29, %s4818_s28 }
  0x12   : > { %p422_p1 = scmp.eq.s32.totalorder %s421_s21, 0  ;;  %p435_p2 = scmp.eq.s32.totalorder %s4962_s0, 1 }
  0x13   : > { %p440_p3 = scmp.ne.s32.totalorder %s4818_s28, %s4814_s27  ;;  %p441_p4 = scmp.eq.s32.totalorder %s4023_s19, 1 }
  0x14   : > { %s4977_s22 = scalar_select %p422_p1, %s4822_s29, %s424_s20  }
  0x15   : > { %p4979_p5 = por %p435_p2, %p434_p0  ;;  %p4983_p6 = por %p441_p4, %p440_p3 }
  0x16   : > { %6518 = sst [smem:[#allocation20_spill]] %s4977_s22  ;;  %p4024_p7 = scmp.ge.s32.totalorder %s4826_s30, 1 }
  0x17   : > { %s6520_s23 = scalar_select %p4983_p6, 1, 0 }
  0x18   : > { %p448_p8 = scmp.lt.s32.totalorder %s4826_s30, 3  ;;  %p6483_p9 = scmp.eq.s32.totalorder %s4962_s0, 0 }
  0x19   : > { %6521 = sst [smem:[#allocation21_spill]] %s6520_s23  ;;  %s4828_s25 = smov [#allocation5]  }
  0x1a   : > { %p4990_p10 = pnand %p4024_p7, %p448_p8  ;;  %s494_s26 = sshll.u32 %s4828_s25, 4  ;;  %s495_s26 = int_to_ptr.vmem [resolvable:$true] %s494_s26 }
  0x1b   : > { %s4829_s20 = smov [#allocation8]   ;;  %s4830_s22 = smov [#allocation2]  }
  0x1c   : > { %p4415_p11 = pneg %p4990_p10  ;;  %s520_s21 = sshll.u32 %s4829_s20, 4  ;;  %s521_s21 = int_to_ptr.vmem [resolvable:$true] %s520_s21 }
  0x1d   : > { %s472_s29 = sshll.u32 %s4830_s22, 4  ;;  %s4635_s25 = scalar_lea.vmem %s495_s26, 128  ;;  %s473_s29 = int_to_ptr.vmem [resolvable:$true] %s472_s29 }
  0x1e   : > { %p4998_p12 = pnand %p6483_p9, %p4415_p11  ;;  %p4636_p0 = scmp.ne.s32.totalorder %s495_s26, %s4635_s25 }
  0x1f   : > { %p4643_p3 = scmp.lt.s32.totalorder %s495_s26, %s495_s26  ;;  %p4644_p4 = scmp.lt.s32.totalorder %s4635_s25, %s4635_s25 }
  0x20   : > { %p5004_p13 = pneg %p4998_p12 }
  0x21   : > { %p4645_p7 = por %p4644_p4, %p4643_p3 }
  0x22   : > { %p4638_p1 = pnand %p4636_p0, %p5004_p13 }
  0x24   : > { %p4639_p2 = pneg %p4638_p1 }
  0x26   : > { %p4646_p8 = pnand %p4645_p7, %p4639_p2 }
  0x28   : > { %4649 = shalt.err (!%p4646_p8)
}
  0x29   : > { %s6479_s20 = smov 64   ;;  %s6481_s22 = smov 4  }
  0x2a   : > { %s6525_s9 = sld [smem:[#allocation40_spill]]  ;;  %s4661_s30 = scalar_lea.vmem %s521_s21, 128 }
  0x2b   : > { %p4662_p11 = scmp.ne.s32.totalorder %s521_s21, %s4661_s30  ;;  %p4669_p3 = scmp.lt.s32.totalorder %s521_s21, %s521_s21 }
  0x2c   : > { %p4670_p2 = scmp.lt.s32.totalorder %s4661_s30, %s4661_s30 }
  0x2d   : > { %p4664_p0 = pnand %p4662_p11, %p5004_p13 }
  0x2e   : > { %p4671_p4 = por %p4670_p2, %p4669_p3 }
  0x2f   : > { %p4665_p1 = pneg %p4664_p0 }
  0x30   : > { %4421 = dma.hbm_to_vmem [thread:$0]  (!%p4998_p12), %s6525_s9, 128, %s495_s26, [#allocation6], %s6479_s20, %s6479_s20, %s6481_s22  }
  0x31   : > { %p4672_p7 = pnand %p4671_p4, %p4665_p1 }
  0x33   : > { %4675 = shalt.err (!%p4672_p7)
}
  0x34   : > { %s6526_s11 = sld [smem:[#allocation41_spill]]  ;;  %s4687_s27 = scalar_lea.vmem %s473_s29, 48 }
  0x35   : > { %p4688_p8 = scmp.ne.s32.totalorder %s473_s29, %s4687_s27  ;;  %s4694_s30 = scalar_lea.vmem %s473_s29, 64 }
  0x36   : > { %p4695_p3 = scmp.lt.s32.totalorder %s473_s29, %s473_s29  ;;  %p4696_p1 = scmp.lt.s32.totalorder %s4694_s30, %s4687_s27 }
  0x37   : > { %p4690_p11 = pnand %p4688_p8, %p5004_p13 }
  0x38   : > { %p4697_p2 = por %p4696_p1, %p4695_p3 }
  0x39   : > { %p4691_p0 = pneg %p4690_p11 }
  0x3a   : > { %4427 = dma.hbm_to_vmem [thread:$0]  (!%p4998_p12), %s6526_s11, 128, %s521_s21, [#allocation9], %s6479_s20, %s6479_s20, %s6481_s22  }
  0x3b   : > { %p4698_p4 = pnand %p4697_p2, %p4691_p0 }
  0x3d   : > { %4701 = shalt.err (!%p4698_p4)
}
  0x3e   : > { %s4833_s23 = smov 16   ;;  %s4834_s26 = smov 1  }
  0x3f   : > { %4418 = dma.hbm_to_vmem [thread:$0]  (!%p4998_p12), %s6456_s5, 48, %s473_s29, [#allocation3], %s4833_s23, %s4833_s23, %s4834_s26  }
  0x40   : > { %s4835_s21 = smov [#allocation7]   ;;  %s4836_s22 = smov [#allocation10]  }
  0x41   : > { %s507_s20 = sshll.u32 %s4835_s21, 4  ;;  %s536_s9 = sshll.u32 %s4836_s22, 4  ;;  %s508_s20 = int_to_ptr.vmem [resolvable:$true] %s507_s20  ;;  %s537_s9 = int_to_ptr.vmem [resolvable:$true] %s536_s9 }
  0x42   : > { %s4713_s11 = scalar_lea.vmem %s508_s20, 128  ;;  %p4721_p0 = scmp.lt.s32.totalorder %s508_s20, %s508_s20 }
  0x43   : > { %p4714_p7 = scmp.ne.s32.totalorder %s508_s20, %s4713_s11  ;;  %p4722_p3 = scmp.lt.s32.totalorder %s4713_s11, %s4713_s11 }
  0x45   : > { %p4716_p8 = pnand %p4714_p7, %p5004_p13  ;;  %p4723_p1 = por %p4722_p3, %p4721_p0 }
  0x47   : > { %p4717_p11 = pneg %p4716_p8 }
  0x49   : > { %p4724_p2 = pnand %p4723_p1, %p4717_p11 }
  0x4b   : > { %4727 = shalt.err (!%p4724_p2)
}
  0x4c   : > { %s6527_s27 = smov 4   ;;  %s6528_s30 = smov 64  }
  0x4d   : > { %4424 = dma.hbm_to_vmem [thread:$0]  (!%p4998_p12), %s6461_s10, 128, %s508_s20, [#allocation6], %s6528_s30, %s6528_s30, %s6527_s27  }
  0x4e   : > { %s4739_s22 = scalar_lea.vmem %s537_s9, 128  ;;  %p4747_p9 = scmp.lt.s32.totalorder %s537_s9, %s537_s9 }
  0x4f   : > { %p4740_p4 = scmp.ne.s32.totalorder %s537_s9, %s4739_s22  ;;  %p4748_p0 = scmp.lt.s32.totalorder %s4739_s22, %s4739_s22 }
  0x51   : > { %p4742_p7 = pnand %p4740_p4, %p5004_p13  ;;  %p4749_p11 = por %p4748_p0, %p4747_p9 }
  0x53   : > { %p4743_p8 = pneg %p4742_p7 }
  0x55   : > { %p4750_p3 = pnand %p4749_p11, %p4743_p8 }
  0x57   : > { %4753 = shalt.err (!%p4750_p3)
}
  0x58   : > { %4430 = dma.hbm_to_vmem [thread:$0]  (!%p4998_p12), %s6464_s13, 128, %s537_s9, [#allocation9], %s6528_s30, %s6528_s30, %s6527_s27  }
  0x59   : > { %572 = sbr.rel (%p4990_p10) target bundleno = 1914 (0x77a), region = 92 }
  0x5e   : > { %p6529_p13 = scmp.eq.s32.totalorder %s4962_s0, 0 }
  0x60   : > { %4797 = dma.done.wait (%p6529_p13), [#allocation3], 48   ;;  %p6530_p1 = pmov %p6529_p13 }
  0x62   : > { %4799 = vsyncadd (%p6530_p1), [#allocation3], 4294967248  ;;  %p6531_p9 = pmov %p6530_p1 }
  0x63   : > { %p6532_p2 = pmov %p6530_p1 }
  0x64   : > { %4801 = dma.done.wait (%p6531_p9), [#allocation6], 256  }
  0x65   : > { %4803 = vsyncadd (%p6532_p2), [#allocation6], 4294967040  ;;  %p6533_p4 = pmov %p6530_p1 }
  0x66   : > { %p6534_p12 = pmov %p6530_p1 }
  0x67   : > { %4805 = dma.done.wait (%p6533_p4), [#allocation9], 256  }
  0x68   : > { %4807 = vsyncadd (%p6534_p12), [#allocation9], 4294967040  ;;  %v4837_v0 = vmov 0   ;;  %s6535_s24 = sld [smem:[#allocation39_spill]]  ;;  %p642_p10 = scmp.lt.s32.totalorder %s4962_s0, 1  ;;  %v4610_v9 = vld [vmem:[%s6459_s8] sm:$0xff]  }
  0x69   : > { %4497 = vset.pattern.permute.xlu1 %v4837_v0  ;;  %4496 = vset.pattern.permute.xlu0 %v4837_v0  ;;  %s6536_s18 = sld [smem:[#allocation38_spill]]  ;;  %v4611_v10 = vld [vmem:[#allocation5] sm:$0xff]   ;;  %vm664_vm0 = vcmask 130048   ;;  %vm1013_vm3 = vcmask 1047680   ;;  %vm3507_vm4 = vcmask 253048   ;;  %s639_s9 = sand.u32 1, %s4818_s28  }
  0x6a   : > { %s643_s20 = scalar_select %p642_p10, %s4962_s0, 1  ;;  %4273 = vmatprep.subr.bf16.mxu0 %v4610_v9  ;;  %4283 = vmatprep.subr.bf16.mxu1 %v4611_v10 }
  0x6b   : > { %4274 = vmatpush3.bf16.msra.mxu0 %v4610_v9  ;;  %4284 = vmatpush3.bf16.msra.mxu1 %v4611_v10  ;;  %s6537_s23 = sld [smem:[#allocation37_spill]]  ;;  %s4037_s1 = sshll.u32 %s639_s9, 7 }
  0x6c   : > { %s4211_s27 = sshll.u32 %s643_s20, 7  ;;  %s6568_s25 = sld [smem:[#allocation42_spill]] }
  0x6d   : > { %s4843_s29 = smov [#allocation11]  }
  0x6e   : > { %v4052_v1 = vld [vmem:[%s6535_s24 + $0x4] ss:$0 sm:$0xff]  ;;  %v4053_v3 = vld [vmem:[%s6535_s24 + $0x5] ss:$0 sm:$0xff]  ;;  %v4055_v7 = vld [vmem:[%s6535_s24 + $0x7] ss:$0 sm:$0xff] }
  0x6f   : > { %v4044_v2 = vld [vmem:[%s6536_s18 + $0x4] ss:$0 sm:$0xff]  ;;  %943 = vperm.xlu1 %4497, %v4052_v1   ;;  %v4045_v4 = vld [vmem:[%s6536_s18 + $0x5] ss:$0 sm:$0xff]  ;;  %v4047_v5 = vld [vmem:[%s6536_s18 + $0x7] ss:$0 sm:$0xff] }
  0x70   : > { %847 = vperm.xlu0 %4496, %v4044_v2   ;;  %v4046_v6 = vld [vmem:[%s6536_s18 + $0x6] ss:$0 sm:$0xff]  ;;  %s4758_s11 = sshll.u32 %s4843_s29, 4  ;;  %s4759_s11 = int_to_ptr.vmem [resolvable:$false] %s4758_s11 }
  0x71   : > { %v4054_v8 = vld [vmem:[%s6535_s24 + $0x6] ss:$0 sm:$0xff]  ;;  %s5101_s22 = scalar_lea.vmem %s6537_s23, %s4211_s27  ;;  %s4838_s23 = smov 16  }
  0x72   : > { %v648_v11 = vld [vmem:[%s5101_s22] sm:$0xff]  ;;  %v650_v12 = vld [vmem:[%s5101_s22 + $0x10] sm:$0xff]  ;;  %v649_v13 = vld [vmem:[%s5101_s22 + $0x8] sm:$0xff]  ;;  %s4840_s27 = smov 15   ;;  %s4760_s26 = scalar_lea.vmem %s4759_s11, 4096 }
  0x73   : > { %947 = vperm.xlu1 %4497, %v4053_v3   ;;  %v651_v14 = vld [vmem:[%s5101_s22 + $0x18] sm:$0xff]  ;;  %v665_v15 = vsel %vm664_vm0, %v648_v11, 0.0  ;;  %v666_v16 = vsel %vm664_vm0, %v650_v12, 0.0  ;;  %v652_v17 = vld [vmem:[%s5101_s22 + $0x20] sm:$0xff]  ;;  %v680_v18 = vsel %vm664_vm0, %v649_v13, 0.0  ;;  %v653_v20 = vld [vmem:[%s5101_s22 + $0x28] sm:$0xff] }
  0x74   : > { %851 = vperm.xlu0 %4496, %v4045_v4   ;;  %v681_v19 = vsel %vm664_vm0, %v651_v14, 0.0  ;;  %v667_v21 = vadd.f32 %v666_v16, %v665_v15  ;;  %v668_v22 = vsel %vm664_vm0, %v652_v17, 0.0  ;;  %v654_v24 = vld [vmem:[%s5101_s22 + $0x30] sm:$0xff]  ;;  %v683_v25 = vsel %vm664_vm0, %v653_v20, 0.0  ;;  %v655_v26 = vld [vmem:[%s5101_s22 + $0x38] sm:$0xff]  ;;  %v656_v30 = vld [vmem:[%s5101_s22 + $0x40] sm:$0xff] }
  0x75   : > { %v682_v23 = vadd.f32 %v681_v19, %v680_v18  ;;  %v670_v28 = vsel %vm664_vm0, %v654_v24, 0.0  ;;  %v685_v31 = vsel %vm664_vm0, %v655_v26, 0.0  ;;  %v657_v32 = vld [vmem:[%s5101_s22 + $0x48] sm:$0xff]  ;;  %v672_v34 = vsel %vm664_vm0, %v656_v30, 0.0  ;;  %v658_v36 = vld [vmem:[%s5101_s22 + $0x50] sm:$0xff]  ;;  %v659_v38 = vld [vmem:[%s5101_s22 + $0x58] sm:$0xff] }
  0x76   : > { %v669_v27 = vadd.f32 %v668_v22, %v667_v21  ;;  %v687_v37 = vsel %vm664_vm0, %v657_v32, 0.0  ;;  %v674_v40 = vsel %vm664_vm0, %v658_v36, 0.0  ;;  %v660_v42 = vld [vmem:[%s5101_s22 + $0x60] sm:$0xff]  ;;  %v689_v43 = vsel %vm664_vm0, %v659_v38, 0.0  ;;  %v661_v44 = vld [vmem:[%s5101_s22 + $0x68] sm:$0xff]  ;;  %v662_v48 = vld [vmem:[%s5101_s22 + $0x70] sm:$0xff] }
  0x77   : > { %859 = vperm.xlu1 %4497, %v4047_v5   ;;  %v684_v29 = vadd.f32 %v683_v25, %v682_v23  ;;  %v676_v46 = vsel %vm664_vm0, %v660_v42, 0.0  ;;  %v691_v49 = vsel %vm664_vm0, %v661_v44, 0.0  ;;  %v663_v50 = vld [vmem:[%s5101_s22 + $0x78] sm:$0xff]  ;;  %v678_v52 = vsel %vm664_vm0, %v662_v48, 0.0  ;;  %s4839_s22 = smov 1  }
  0x78   : > { %855 = vperm.xlu0 %4496, %v4046_v6   ;;  %v671_v33 = vadd.f32 %v670_v28, %v669_v27  ;;  %v693_v54 = vsel %vm664_vm0, %v663_v50, 0.0 }
  0x79   : > { %v686_v35 = vadd.f32 %v685_v31, %v684_v29 }
  0x7a   : > { %v673_v39 = vadd.f32 %v672_v34, %v671_v33 }
  0x7b   : > { %955 = vperm.xlu1 %4497, %v4055_v7   ;;  %v688_v41 = vadd.f32 %v687_v37, %v686_v35 }
  0x7c   : > { %951 = vperm.xlu0 %4496, %v4054_v8   ;;  %v675_v45 = vadd.f32 %v674_v40, %v673_v39 }
  0x7d   : > { %v690_v47 = vadd.f32 %v689_v43, %v688_v41 }
  0x7e   : > { %v677_v51 = vadd.f32 %v676_v46, %v675_v45 }
  0x7f   : > { %v692_v53 = vadd.f32 %v691_v49, %v690_v47 }
  0x80   : > { %v679_v55 = vadd.f32 %v678_v52, %v677_v51 }
  0x81   : > { %v694_v56 = vadd.f32 %v693_v54, %v692_v53 }
  0x82   : > { %v696_v57 = vmul.f32 0.125, %v679_v55 }
  0x83   : > { %v697_v58 = vmul.f32 0.125, %v694_v56 }
  0x84   : > { %v5135_v59 = vsub.f32 %v648_v11, %v696_v57  ;;  %v5137_v60 = vsub.f32 %v650_v12, %v696_v57  ;;  %v5143_v63 = vsub.f32 %v652_v17, %v696_v57  ;;  %v5155_v5 = vsub.f32 %v654_v24, %v696_v57 }
  0x85   : > { %v5139_v61 = vsub.f32 %v649_v13, %v697_v58  ;;  %v5141_v62 = vsub.f32 %v651_v14, %v697_v58  ;;  %v5149_v2 = vsub.f32 %v653_v20, %v697_v58  ;;  %v5161_v9 = vsub.f32 %v655_v26, %v697_v58 }
  0x86   : > { %v714_v0 = vmul.f32 %v5135_v59, %v5135_v59  ;;  %v716_v1 = vmul.f32 %v5137_v60, %v5137_v60  ;;  %v718_v6 = vmul.f32 %v5143_v63, %v5143_v63  ;;  %v706_v14 = vsub.f32 %v656_v30, %v696_v57 }
  0x87   : > { %v715_v3 = vmul.f32 %v5139_v61, %v5139_v61  ;;  %v717_v4 = vmul.f32 %v5141_v62, %v5141_v62  ;;  %v719_v10 = vmul.f32 %v5149_v2, %v5149_v2  ;;  %v720_v15 = vmul.f32 %v5155_v5, %v5155_v5 }
  0x88   : > { %v730_v7 = vsel %vm664_vm0, %v714_v0, 0.0  ;;  %v731_v8 = vsel %vm664_vm0, %v716_v1, 0.0  ;;  %v733_v16 = vsel %vm664_vm0, %v718_v6, 0.0  ;;  %v707_v18 = vsub.f32 %v657_v32, %v697_v58 }
  0x89   : > { %v745_v11 = vsel %vm664_vm0, %v715_v3, 0.0  ;;  %v746_v12 = vsel %vm664_vm0, %v717_v4, 0.0  ;;  %v732_v13 = vadd.f32 %v731_v8, %v730_v7  ;;  %v721_v19 = vmul.f32 %v5161_v9, %v5161_v9 }
  0x8a   : > { %v747_v17 = vadd.f32 %v746_v12, %v745_v11  ;;  %v748_v20 = vsel %vm664_vm0, %v719_v10, 0.0  ;;  %v708_v22 = vsub.f32 %v658_v36, %v696_v57  ;;  %v722_v23 = vmul.f32 %v706_v14, %v706_v14 }
  0x8b   : > { %v734_v21 = vadd.f32 %v733_v16, %v732_v13  ;;  %v735_v24 = vsel %vm664_vm0, %v720_v15, 0.0  ;;  %v709_v26 = vsub.f32 %v659_v38, %v697_v58  ;;  %v723_v27 = vmul.f32 %v707_v18, %v707_v18 }
  0x8c   : > { %v749_v25 = vadd.f32 %v748_v20, %v747_v17  ;;  %v750_v28 = vsel %vm664_vm0, %v721_v19, 0.0  ;;  %v710_v30 = vsub.f32 %v660_v42, %v696_v57  ;;  %v724_v31 = vmul.f32 %v708_v22, %v708_v22 }
  0x8d   : > { %v736_v29 = vadd.f32 %v735_v24, %v734_v21  ;;  %v737_v32 = vsel %vm664_vm0, %v722_v23, 0.0  ;;  %v711_v34 = vsub.f32 %v661_v44, %v697_v58  ;;  %v725_v35 = vmul.f32 %v709_v26, %v709_v26 }
  0x8e   : > { %v751_v33 = vadd.f32 %v750_v28, %v749_v25  ;;  %v752_v37 = vsel %vm664_vm0, %v723_v27, 0.0  ;;  %v712_v36 = vsub.f32 %v662_v48, %v696_v57  ;;  %v726_v40 = vmul.f32 %v710_v30, %v710_v30 }
  0x8f   : > { %v738_v39 = vadd.f32 %v737_v32, %v736_v29  ;;  %v739_v41 = vsel %vm664_vm0, %v724_v31, 0.0  ;;  %v713_v38 = vsub.f32 %v663_v50, %v697_v58  ;;  %v727_v45 = vmul.f32 %v711_v34, %v711_v34 }
  0x90   : > { %v753_v43 = vadd.f32 %v752_v37, %v751_v33  ;;  %v754_v46 = vsel %vm664_vm0, %v725_v35, 0.0  ;;  %v728_v42 = vmul.f32 %v712_v36, %v712_v36  ;;  %v741_v49 = vsel %vm664_vm0, %v726_v40, 0.0 }
  0x91   : > { %v740_v47 = vadd.f32 %v739_v41, %v738_v39  ;;  %v729_v52 = vmul.f32 %v713_v38, %v713_v38  ;;  %v756_v44 = vsel %vm664_vm0, %v727_v45, 0.0 }
  0x92   : > { %v755_v51 = vadd.f32 %v754_v46, %v753_v43  ;;  %v743_v54 = vsel %vm664_vm0, %v728_v42, 0.0  ;;  %v5205_v46 = vld [vmem:[#allocation8] sm:$0xff]  }
  0x93   : > { %v742_v53 = vadd.f32 %v741_v49, %v740_v47  ;;  %v758_v55 = vsel %vm664_vm0, %v729_v52, 0.0  ;;  %4303 = vmatprep.subr.bf16.mxu1 %v5205_v46 }
  0x94   : > { %v757_v48 = vadd.f32 %v756_v44, %v755_v51 }
  0x95   : > { %v744_v56 = vadd.f32 %v743_v54, %v742_v53 }
  0x96   : > { %v759_v57 = vadd.f32 %v758_v55, %v757_v48 }
  0x97   : > { %v760_v50 = vmul.f32 0.125, %v744_v56 }
  0x98   : > { %v761_v58 = vmul.f32 0.125, %v759_v57 }
  0x99   : > { %v770_v0 = vadd.f32 1e-06, %v760_v50 }
  0x9a   : > { %v771_v1 = vadd.f32 1e-06, %v761_v58 }
  0x9b   : > { %4616 = vrsqrt.f32 %v770_v0 }
  0x9c   : > { %4618 = vrsqrt.f32 %v771_v1 }
  0xa8   : > { %v5183_v3 = vpop.eup %4616 }
  0xa9   : > { %v5185_v4 = vpop.eup %4618  ;;  %v782_v6 = vmul.f32 %v5183_v3, %v706_v14  ;;  %v784_v13 = vmul.f32 %v5183_v3, %v708_v22  ;;  %v786_v25 = vmul.f32 %v5183_v3, %v710_v30 }
  0xaa   : > { %v783_v7 = vmul.f32 %v5185_v4, %v707_v18  ;;  %v785_v15 = vmul.f32 %v5185_v4, %v709_v26  ;;  %v787_v18 = vmul.f32 %v5185_v4, %v711_v34  ;;  %v788_v26 = vmul.f32 %v5183_v3, %v712_v36 }
  0xab   : > { %v789_v28 = vmul.f32 %v5185_v4, %v713_v38  ;;  %v5203_v38 = vld [vmem:[#allocation7] sm:$0xff]  }
  0xac   : > { %4293 = vmatprep.subr.bf16.mxu0 %v5203_v38 }
  0xea   : > { %v944_v8 = vpop.permute.xlu1 %943 }
  0xeb   : > { %v848_v10 = vpop.permute.xlu0 %847 }
  0xec   : > { %v870_v11 = vmul.f32 %v848_v10, %v782_v6  ;;  %v871_v12 = vmul.f32 %v848_v10, %v783_v7 }
  0xee   : > { %v966_v16 = vadd.f32 %v944_v8, %v870_v11  ;;  %v967_v17 = vadd.f32 %v944_v8, %v871_v12  ;;  %v948_v19 = vpop.permute.xlu1 %947 }
  0xef   : > { %v852_v20 = vpop.permute.xlu0 %851 }
  0xf0   : > { %v872_v21 = vmul.f32 %v852_v20, %v784_v13  ;;  %v873_v23 = vmul.f32 %v852_v20, %v785_v15  ;;  %v1975_v24 = vpack.c.bf16 %v967_v17, %v966_v16  ;;  %v4040_v16 = vld [vmem:[%s6536_s18] ss:$0 sm:$0xff]  ;;  %v4041_v17 = vld [vmem:[%s6536_s18 + $0x1] ss:$0 sm:$0xff] }
  0xf1   : > { %v4049_v20 = vld [vmem:[%s6535_s24 + $0x1] ss:$0 sm:$0xff] }
  0xf2   : > { %v968_v14 = vadd.f32 %v948_v19, %v872_v21  ;;  %v969_v27 = vadd.f32 %v948_v19, %v873_v23  ;;  %4275 = vmatprep.mubr.msk.bf16.mxu0 %vm664_vm0, %v1975_v24  ;;  %4285 = vmatprep.mubr.msk.bf16.mxu1 %vm664_vm0, %v1975_v24  ;;  %v860_v22 = vpop.permute.xlu1 %859  ;;  %v4042_v19 = vld [vmem:[%s6536_s18 + $0x2] ss:$0 sm:$0xff]  ;;  %v4043_v21 = vld [vmem:[%s6536_s18 + $0x3] ss:$0 sm:$0xff] }
  0xf3   : > { %v856_v29 = vpop.permute.xlu0 %855  ;;  %v876_v35 = vmul.f32 %v860_v22, %v788_v26  ;;  %v877_v37 = vmul.f32 %v860_v22, %v789_v28  ;;  %v4050_v23 = vld [vmem:[%s6535_s24 + $0x2] ss:$0 sm:$0xff]  ;;  %v4051_v24 = vld [vmem:[%s6535_s24 + $0x3] ss:$0 sm:$0xff]  ;;  %v4103_v22 = vld [vmem:[%s6455_s4 + $0x28] sm:$0xff] }
  0xf4   : > { %v1976_v31 = vpack.c.bf16 %v969_v27, %v968_v14  ;;  %v874_v32 = vmul.f32 %v856_v29, %v786_v25  ;;  %v875_v33 = vmul.f32 %v856_v29, %v787_v18  ;;  %v993_v25 = vld [vmem:[%s6455_s4] sm:$0xff]  ;;  %v994_v27 = vld [vmem:[%s6455_s4 + $0x8] sm:$0xff] }
  0xf5   : > { %v4048_v14 = vld [vmem:[%s6535_s24] ss:$0 sm:$0xff] }
  0xf6   : > { %4276 = vmatmul.mubr.msk.bf16.vlgmr.msra.gmra.mxu0 %vm664_vm0, %v1976_v31  ;;  %4286 = vmatmul.mubr.msk.bf16.vlgmr.msra.gmra.mxu1 %vm664_vm0, %v1976_v31  ;;  %v956_v30 = vpop.permute.xlu1 %955  ;;  %v4102_v18 = vld [vmem:[%s6455_s4 + $0x20] sm:$0xff] }
  0xf7   : > { %v952_v39 = vpop.permute.xlu0 %951  ;;  %v972_v34 = vadd.f32 %v956_v30, %v876_v35  ;;  %v973_v43 = vadd.f32 %v956_v30, %v877_v37  ;;  %4294 = vmatpush3.bf16.msra.mxu0 %v5203_v38  ;;  %4304 = vmatpush3.bf16.msra.mxu1 %v5205_v46 }
  0xf8   : > { %v970_v40 = vadd.f32 %v952_v39, %v874_v32  ;;  %v971_v41 = vadd.f32 %v952_v39, %v875_v33  ;;  %4313 = vmatprep.subr.bf16.mxu0 %v5205_v46  ;;  %4323 = vmatprep.subr.bf16.mxu1 %v5203_v38 }
  0xf9   : > { %v1978_v36 = vpack.c.bf16 %v973_v43, %v972_v34 }
  0xfa   : > { %v1977_v45 = vpack.c.bf16 %v971_v41, %v970_v40 }
  0xfc   : > { %4279 = vmatprep.mubr.msk.bf16.mxu0 %vm664_vm0, %v1977_v45  ;;  %4289 = vmatprep.mubr.msk.bf16.mxu1 %vm664_vm0, %v1977_v45 }
  0xfe   : > { %4280 = vmatmul.mubr.msk.bf16.gmra.mxu0 %vm664_vm0, %v1978_v36  ;;  %4290 = vmatmul.mubr.msk.bf16.gmra.mxu1 %vm664_vm0, %v1978_v36 }
 0x1b6   : > { %v4277_v47 = vpop.f32.mrf.mxu0  ;;  %v4287_v42 = vpop.f32.mrf.mxu1 }
 0x1b7   : > { %v4498_v49 = vpack.i.bf16 %v4287_v42, %v4277_v47 }
 0x1b8   : > { %v2031_v51 = vpop.f32.mrf.mxu0  ;;  %v2102_v52 = vpop.f32.mrf.mxu1 }
 0x1b9   : > { %v4512_v44 = vpack.i.bf16 %v2102_v52, %v2031_v51  ;;  %4499 = vxpose.xlu1.b32.start [1/2] (short) (narrow) %v4498_v49, 16 }
 0x1ba   : > { %v4278_v53 = vpop.f32.mrf.mxu0  ;;  %v4288_v54 = vpop.f32.mrf.mxu1 }
 0x1bb   : > { %v4500_v48 = vpack.i.bf16 %v4288_v54, %v4278_v53  ;;  %4513 = vxpose.xlu0.b32.start [1/2] (short) (narrow) %v4512_v44, 16 }
 0x1bc   : > { %v2034_v55 = vpop.f32.mrf.mxu0  ;;  %v2105_v56 = vpop.f32.mrf.mxu1 }
 0x1bd   : > { %v4514_v57 = vpack.i.bf16 %v2105_v56, %v2034_v55  ;;  %4501 = vxpose.xlu1.b32.end [2/2] (short) (narrow) %v4500_v48, 16 }
 0x1be   : > { %v4281_v50 = vpop.f32.mrf.mxu0  ;;  %v4291_v58 = vpop.f32.mrf.mxu1 }
 0x1bf   : > { %4515 = vxpose.xlu0.b32.end [2/2] (short) (narrow) %v4514_v57, 16  ;;  %v4540_v13 = vpack.i.bf16 %v4291_v58, %v4281_v50 }
 0x1c0   : > { %v2047_v0 = vpop.f32.mrf.mxu0  ;;  %v2118_v1 = vpop.f32.mrf.mxu1 }
 0x1c1   : > { %v4526_v6 = vpack.i.bf16 %v2118_v1, %v2047_v0 }
 0x1c2   : > { %v4282_v7 = vpop.f32.mrf.mxu0  ;;  %v4292_v8 = vpop.f32.mrf.mxu1 }
 0x1c3   : > { %4527 = vxpose.xlu0.b32.start [1/2] (short) (narrow) %v4526_v6, 16  ;;  %v4542_v15 = vpack.i.bf16 %v4292_v8, %v4282_v7 }
 0x1c4   : > { %v2050_v10 = vpop.f32.mrf.mxu0  ;;  %v2121_v11 = vpop.f32.mrf.mxu1 }
 0x1c5   : > { %v4528_v12 = vpack.i.bf16 %v2121_v11, %v2050_v10  ;;  %v777_v11 = vmul.f32 %v5185_v4, %v5141_v62  ;;  %v781_v62 = vmul.f32 %v5185_v4, %v5161_v9 }
 0x1c7   : > { %4529 = vxpose.xlu0.b32.end [2/2] (short) (narrow) %v4528_v12, 16  ;;  %v776_v12 = vmul.f32 %v5183_v3, %v5137_v60  ;;  %v780_v60 = vmul.f32 %v5183_v3, %v5155_v5 }
 0x1cb   : > { %4541 = vxpose.xlu0.b32.start [1/2] (short) (narrow) %v4540_v13, 16 }
 0x1cf   : > { %4543 = vxpose.xlu0.b32.end [2/2] (short) (narrow) %v4542_v15, 16 }
 0x1db   : > { %831 = vperm.xlu1 %4497, %v4040_v16  }
 0x1df   : > { %835 = vperm.xlu1 %4497, %v4041_v17   ;;  %v982_v17 = vlaneseq }
 0x1e3   : > { %839 = vperm.xlu1 %4497, %v4042_v19   ;;  %v779_v19 = vmul.f32 %v5185_v4, %v5149_v2  ;;  %v775_v2 = vmul.f32 %v5185_v4, %v5139_v61 }
 0x1e7   : > { %931 = vperm.xlu1 %4497, %v4049_v20   ;;  %v778_v20 = vmul.f32 %v5183_v3, %v5143_v63  ;;  %v774_v63 = vmul.f32 %v5183_v3, %v5135_v59 }
 0x1eb   : > { %843 = vperm.xlu1 %4497, %v4043_v21  }
 0x1ef   : > { %935 = vperm.xlu1 %4497, %v4050_v23  }
 0x1f3   : > { %939 = vperm.xlu1 %4497, %v4051_v24  }
 0x1f7   : > { %997 = vperm.xlu1 %4497, %v993_v25   ;;  %v5289_v25 = vshrl.u32 %v982_v17, 7 }
 0x1f8   : > { %927 = vperm.xlu0 %4496, %v4048_v14  }
 0x1f9   : > { %vm984_vm1 = vcmp.lt.s32.totalorder %v5289_v25, 1  ;;  %vm1638_vm2 = vcmp.lt.s32.totalorder %v5289_v25, 7 }
 0x1fb   : > { %1002 = vperm.xlu1 %4497, %v994_v27  }
 0x1ff   : > { %1652 = vperm.xlu1 %4497, %v4102_v18  }
 0x203   : > { %1657 = vperm.xlu1 %4497, %v4103_v22  }
 0x235   : > { %v4502_v26 = vpop.trf.xlu1 }
 0x236   : > { %v4506_v29 = vunpack.i.h.bf16 %v4502_v26  ;;  %v4503_v31 = vunpack.i.l.bf16 %v4502_v26 }
 0x237   : > { %v4516_v28 = vpop.trf.xlu0 }
 0x238   : > { %v4520_v37 = vunpack.i.h.bf16 %v4516_v28  ;;  %v4517_v30 = vunpack.i.l.bf16 %v4516_v28 }
 0x239   : > { %v4507_v32 = vpop.trf.xlu1 }
 0x23a   : > { %v4511_v33 = vunpack.i.h.bf16 %v4507_v32  ;;  %v4508_v35 = vunpack.i.l.bf16 %v4507_v32 }
 0x23b   : > { %v4521_v39 = vpop.trf.xlu0 }
 0x23c   : > { %v4525_v40 = vunpack.i.h.bf16 %v4521_v39  ;;  %v4522_v41 = vunpack.i.l.bf16 %v4521_v39  ;;  %v2262_v34 = vpack.c.bf16 %v4508_v35, %v4503_v31  ;;  %v2394_v43 = vpack.c.bf16 %v4511_v33, %v4506_v29 }
 0x23e   : > { %v2261_v45 = vpack.c.bf16 %v4522_v41, %v4517_v30  ;;  %v2393_v36 = vpack.c.bf16 %v4525_v40, %v4520_v37 }
 0x23f   : > { %v4530_v47 = vpop.trf.xlu0 }
 0x240   : > { %4295 = vmatprep.mubr.msk.bf16.mxu0 %vm664_vm0, %v2261_v45  ;;  %4305 = vmatprep.mubr.msk.bf16.mxu1 %vm664_vm0, %v2393_v36  ;;  %v4534_v42 = vunpack.i.h.bf16 %v4530_v47  ;;  %v4531_v49 = vunpack.i.l.bf16 %v4530_v47 }
 0x241   : > { %4296 = vmatmul.mubr.msk.bf16.vlgmr.msra.gmra.mxu0 %vm664_vm0, %v2262_v34  ;;  %4306 = vmatmul.mubr.msk.bf16.vlgmr.msra.gmra.mxu1 %vm664_vm0, %v2394_v43 }
 0x242   : > { %4314 = vmatpush3.bf16.msra.mxu0 %v5205_v46  ;;  %4324 = vmatpush3.bf16.msra.mxu1 %v5203_v38 }
 0x243   : > { %v4535_v51 = vpop.trf.xlu0  ;;  %4333 = vmatprep.subr.bf16.mxu0 %v5205_v46  ;;  %4343 = vmatprep.subr.bf16.mxu1 %v5203_v38 }
 0x244   : > { %v4539_v52 = vunpack.i.h.bf16 %v4535_v51  ;;  %v4536_v44 = vunpack.i.l.bf16 %v4535_v51 }
 0x246   : > { %v2263_v53 = vpack.c.bf16 %v4536_v44, %v4531_v49  ;;  %v2395_v54 = vpack.c.bf16 %v4539_v52, %v4534_v42 }
 0x247   : > { %v4544_v48 = vpop.trf.xlu0 }
 0x248   : > { %4299 = vmatprep.mubr.msk.bf16.mxu0 %vm664_vm0, %v2263_v53  ;;  %4309 = vmatprep.mubr.msk.bf16.mxu1 %vm664_vm0, %v2395_v54  ;;  %v4548_v55 = vunpack.i.h.bf16 %v4544_v48  ;;  %v4545_v56 = vunpack.i.l.bf16 %v4544_v48 }
 0x24b   : > { %v4549_v57 = vpop.trf.xlu0 }
 0x24c   : > { %v4553_v50 = vunpack.i.h.bf16 %v4549_v57  ;;  %v4550_v58 = vunpack.i.l.bf16 %v4549_v57 }
 0x24e   : > { %v2264_v0 = vpack.c.bf16 %v4550_v58, %v4545_v56  ;;  %v2396_v1 = vpack.c.bf16 %v4553_v50, %v4548_v55 }
 0x250   : > { %4300 = vmatmul.mubr.msk.bf16.gmra.mxu0 %vm664_vm0, %v2264_v0  ;;  %4310 = vmatmul.mubr.msk.bf16.gmra.mxu1 %vm664_vm0, %v2396_v1 }
 0x251   : > { %4315 = vmatprep.mubr.msk.bf16.mxu0 %vm664_vm0, %v2261_v45  ;;  %4325 = vmatprep.mubr.msk.bf16.mxu1 %vm664_vm0, %v2393_v36 }
 0x256   : > { %v832_v6 = vpop.permute.xlu1 %831 }
 0x257   : > { %v862_v61 = vmul.f32 %v832_v6, %v774_v63  ;;  %v863_v4 = vmul.f32 %v832_v6, %v775_v2  ;;  %v4065_v63 = vld [vmem:[%s6454_s3 + $0x4] ss:$0 sm:$0xff] }
 0x258   : > { %4316 = vmatmul.mubr.msk.bf16.vlgmr.msra.gmra.mxu0 %vm664_vm0, %v2262_v34  ;;  %4326 = vmatmul.mubr.msk.bf16.vlgmr.msra.gmra.mxu1 %vm664_vm0, %v2394_v43 }
 0x259   : > { %4319 = vmatprep.mubr.msk.bf16.mxu0 %vm664_vm0, %v2263_v53  ;;  %4329 = vmatprep.mubr.msk.bf16.mxu1 %vm664_vm0, %v2395_v54 }
 0x25a   : > { %v836_v7 = vpop.permute.xlu1 %835  ;;  %4334 = vmatpush3.bf16.msra.mxu0 %v5205_v46  ;;  %4344 = vmatpush3.bf16.msra.mxu1 %v5203_v38 }
 0x25b   : > { %4353 = vmatprep.subr.bf16.mxu0 %v5205_v46  ;;  %4363 = vmatprep.subr.bf16.mxu1 %v5203_v38  ;;  %v864_v15 = vmul.f32 %v836_v7, %v776_v12  ;;  %v865_v16 = vmul.f32 %v836_v7, %v777_v11 }
 0x25e   : > { %v840_v8 = vpop.permute.xlu1 %839 }
 0x25f   : > { %v866_v14 = vmul.f32 %v840_v8, %v778_v20  ;;  %v867_v27 = vmul.f32 %v840_v8, %v779_v19 }
 0x260   : > { %4320 = vmatmul.mubr.msk.bf16.gmra.mxu0 %vm664_vm0, %v2264_v0  ;;  %4330 = vmatmul.mubr.msk.bf16.gmra.mxu1 %vm664_vm0, %v2396_v1 }
 0x262   : > { %v932_v10 = vpop.permute.xlu1 %931 }
 0x263   : > { %v5281_v21 = vadd.f32 %v932_v10, %v864_v15  ;;  %v5283_v23 = vadd.f32 %v932_v10, %v865_v16 }
 0x265   : > { %6538 = vst [vmem:[#allocation22_spill] sm:$0xff] %v5281_v21  ;;  %6539 = vst [vmem:[#allocation23_spill] sm:$0xff] %v5283_v23  ;;  %v975_v18 = vrot.slane %v5281_v21, 7  ;;  %v979_v22 = vrot.slane %v5283_v23, 7  ;;  %v1631_v8 = vrot.slane %v5281_v21, 1  ;;  %v1635_v10 = vrot.slane %v5283_v23, 1 }
 0x266   : > { %v844_v13 = vpop.permute.xlu1 %843 }
 0x267   : > { %v868_v26 = vmul.f32 %v844_v13, %v780_v60  ;;  %v869_v9 = vmul.f32 %v844_v13, %v781_v62  ;;  %v990_v3 = vsel %vm984_vm1, %v979_v22, %v975_v18  ;;  %v986_v48 = vsel %vm984_vm1, %v975_v18, %v979_v22 }
 0x268   : > { %v1640_v12 = vsel %vm1638_vm2, %v1631_v8, %v1635_v10  ;;  %v1644_v18 = vsel %vm1638_vm2, %v1635_v10, %v1631_v8 }
 0x26a   : > { %v936_v24 = vpop.permute.xlu1 %935 }
 0x26b   : > { %v5297_v28 = vadd.f32 %v936_v24, %v866_v14  ;;  %v5299_v5 = vadd.f32 %v936_v24, %v867_v27 }
 0x26d   : > { %6540 = vst [vmem:[#allocation24_spill] sm:$0xff] %v5297_v28  ;;  %6541 = vst [vmem:[#allocation25_spill] sm:$0xff] %v5299_v5  ;;  %v976_v33 = vrot.slane %v5297_v28, 7  ;;  %v980_v35 = vrot.slane %v5299_v5, 7  ;;  %v1632_v13 = vrot.slane %v5297_v28, 1  ;;  %v1636_v15 = vrot.slane %v5299_v5, 1 }
 0x26e   : > { %v940_v29 = vpop.permute.xlu1 %939 }
 0x26f   : > { %v5302_v31 = vadd.f32 %v940_v29, %v868_v26  ;;  %v5304_v32 = vadd.f32 %v940_v29, %v869_v9  ;;  %v991_v43 = vsel %vm984_vm1, %v980_v35, %v976_v33  ;;  %v987_v56 = vsel %vm984_vm1, %v976_v33, %v980_v35  ;;  %v4067_v26 = vld [vmem:[%s6454_s3 + $0x6] ss:$0 sm:$0xff]  ;;  %v4074_v33 = vld [vmem:[%s6454_s3 + $0x8] ss:$0 sm:$0xff] }
 0x270   : > { %v1641_v17 = vsel %vm1638_vm2, %v1632_v13, %v1636_v15  ;;  %v1645_v9 = vsel %vm1638_vm2, %v1636_v15, %v1632_v13 }
 0x271   : > { %6542 = vst [vmem:[#allocation26_spill] sm:$0xff] %v5302_v31  ;;  %6543 = vst [vmem:[#allocation27_spill] sm:$0xff] %v5304_v32  ;;  %v977_v41 = vrot.slane %v5302_v31, 7  ;;  %v981_v34 = vrot.slane %v5304_v32, 7  ;;  %v1633_v19 = vrot.slane %v5302_v31, 1  ;;  %v1637_v20 = vrot.slane %v5304_v32, 1 }
 0x272   : > { %v998_v59 = vpop.permute.xlu1 %997 }
 0x273   : > { %v928_v37 = vpop.permute.xlu0 %927  ;;  %v5310_v30 = vmul.f32 %v998_v59, %v990_v3  ;;  %v5324_v47 = vmul.f32 %v998_v59, %v991_v43  ;;  %v992_v49 = vsel %vm984_vm1, %v981_v34, %v977_v41  ;;  %v988_v50 = vsel %vm984_vm1, %v977_v41, %v981_v34  ;;  %v4066_v3 = vld [vmem:[%s6454_s3 + $0x5] ss:$0 sm:$0xff] }
 0x274   : > { %v5312_v39 = vadd.f32 %v928_v37, %v862_v61  ;;  %v5314_v40 = vadd.f32 %v928_v37, %v863_v4  ;;  %v5338_v44 = vmul.f32 %v998_v59, %v992_v49  ;;  %v1642_v24 = vsel %vm1638_vm2, %v1633_v19, %v1637_v20  ;;  %v4075_v61 = vld [vmem:[%s6454_s3 + $0x9] ss:$0 sm:$0xff] }
 0x275   : > { %1020 = vrot.lane.b32.xlu0 %v5310_v30, %s4838_s23  ;;  %v1646_v4 = vsel %vm1638_vm2, %v1637_v20, %v1633_v19  ;;  %v4099_v19 = vld [vmem:[%s6454_s3 + $0x15] ss:$0 sm:$0xff] }
 0x276   : > { %6544 = vst [vmem:[#allocation28_spill] sm:$0xff] %v5314_v40  ;;  %v974_v45 = vrot.slane %v5312_v39, 7  ;;  %v978_v36 = vrot.slane %v5314_v40, 7  ;;  %6545 = vst [vmem:[#allocation29_spill] sm:$0xff] %v5338_v44  ;;  %v1003_v53 = vpop.permute.xlu1 %1002  ;;  %v1630_v0 = vrot.slane %v5312_v39, 1  ;;  %v1634_v1 = vrot.slane %v5314_v40, 1 }
 0x277   : > { %v5350_v55 = vmul.f32 %v1003_v53, %v986_v48  ;;  %v5358_v57 = vmul.f32 %v1003_v53, %v987_v56  ;;  %v5366_v58 = vmul.f32 %v1003_v53, %v988_v50  ;;  %v4090_v56 = vld [vmem:[%s6454_s3 + $0x10] ss:$0 sm:$0xff] }
 0x278   : > { %v989_v42 = vsel %vm984_vm1, %v978_v36, %v974_v45  ;;  %v985_v52 = vsel %vm984_vm1, %v974_v45, %v978_v36  ;;  %v1639_v7 = vsel %vm1638_vm2, %v1630_v0, %v1634_v1  ;;  %v1643_v27 = vsel %vm1638_vm2, %v1634_v1, %v1630_v0  ;;  %v4068_v45 = vld [vmem:[%s6454_s3 + $0x7] ss:$0 sm:$0xff] }
 0x279   : > { %1026 = vrot.lane.b32.xlu0 %v5324_v47, %s4838_s23  ;;  %v5332_v51 = vmul.f32 %v998_v59, %v989_v42  ;;  %v5342_v54 = vmul.f32 %v1003_v53, %v985_v52  ;;  %v4069_v42 = vld [vmem:[#allocation2 + $0x2] ss:$0 sm:$0xff] }
 0x27a   : > { %v1653_v6 = vpop.permute.xlu1 %1652 }
 0x27b   : > { %1014 = vrot.lane.b32.xlu1 %v5332_v51, %s4838_s23  ;;  %v5381_v11 = vmul.f32 %v1653_v6, %v1639_v7  ;;  %v5391_v16 = vmul.f32 %v1653_v6, %v1640_v12  ;;  %v5401_v62 = vmul.f32 %v1653_v6, %v1641_v17  ;;  %v5409_v14 = vmul.f32 %v1653_v6, %v1642_v24  ;;  %v4092_v12 = vld [vmem:[%s6454_s3 + $0x12] ss:$0 sm:$0xff] }
 0x27d   : > { %1032 = vrot.lane.b32.xlu0 %v5338_v44, %s4838_s23  ;;  %6546 = vst [vmem:[#allocation30_spill] sm:$0xff] %v5381_v11  ;;  %6547 = vst [vmem:[#allocation31_spill] sm:$0xff] %v5391_v16 }
 0x27e   : > { %6548 = vst [vmem:[#allocation32_spill] sm:$0xff] %v5401_v62  ;;  %v1658_v60 = vpop.permute.xlu1 %1657 }
 0x27f   : > { %1017 = vrot.lane.b32.xlu1 %v5342_v54, %s4838_s23  ;;  %v5415_v2 = vmul.f32 %v1658_v60, %v1643_v27  ;;  %v5424_v22 = vmul.f32 %v1658_v60, %v1644_v18  ;;  %v5433_v29 = vmul.f32 %v1658_v60, %v1645_v9  ;;  %v5442_v59 = vmul.f32 %v1658_v60, %v1646_v4 }
 0x281   : > { %1331 = vrot.lane.b32.xlu0 %v5312_v39, %s4838_s23  ;;  %6549 = vst [vmem:[#allocation33_spill] sm:$0xff] %v5442_v59 }
 0x283   : > { %1023 = vrot.lane.b32.xlu1 %v5350_v55, %s4838_s23 }
 0x285   : > { %1337 = vrot.lane.b32.xlu0 %v5281_v21, %s4838_s23 }
 0x287   : > { %1029 = vrot.lane.b32.xlu1 %v5358_v57, %s4838_s23 }
 0x289   : > { %1343 = vrot.lane.b32.xlu0 %v5297_v28, %s4838_s23 }
 0x28b   : > { %1035 = vrot.lane.b32.xlu1 %v5366_v58, %s4838_s23 }
 0x28d   : > { %1349 = vrot.lane.b32.xlu0 %v5302_v31, %s4838_s23 }
 0x28f   : > { %1334 = vrot.lane.b32.xlu1 %v5314_v40, %s4838_s23 }
 0x291   : > { %1668 = vrot.lane.b32.xlu0 %v5381_v11, %s4838_s23 }
 0x293   : > { %1340 = vrot.lane.b32.xlu1 %v5283_v23, %s4838_s23 }
 0x295   : > { %1674 = vrot.lane.b32.xlu0 %v5391_v16, %s4838_s23 }
 0x297   : > { %1346 = vrot.lane.b32.xlu1 %v5299_v5, %s4838_s23 }
 0x299   : > { %1680 = vrot.lane.b32.xlu0 %v5401_v62, %s4838_s23 }
 0x29b   : > { %1352 = vrot.lane.b32.xlu1 %v5304_v32, %s4838_s23 }
 0x29d   : > { %1686 = vrot.lane.b32.xlu0 %v5409_v14, %s4838_s23 }
 0x29f   : > { %1671 = vrot.lane.b32.xlu1 %v5415_v2, %s4838_s23 }
 0x2a1   : > { %1161 = vperm.xlu0 %4496, %v4065_v63  }
 0x2a3   : > { %1677 = vrot.lane.b32.xlu1 %v5424_v22, %s4838_s23 }
 0x2a5   : > { %1169 = vperm.xlu0 %4496, %v4067_v26  }
 0x2a7   : > { %1683 = vrot.lane.b32.xlu1 %v5433_v29, %s4838_s23 }
 0x2a9   : > { %1272 = vperm.xlu0 %4496, %v4075_v61  }
 0x2ab   : > { %1689 = vrot.lane.b32.xlu1 %v5442_v59, %s4838_s23 }
 0x2af   : > { %1165 = vperm.xlu1 %4497, %v4066_v3  }
 0x2b3   : > { %1268 = vperm.xlu1 %4497, %v4074_v33  }
 0x2e7   : > { %v1021_v37 = vpop.permute.xlu0 %1020 }
 0x2e8   : > { %v1022_v34 = vsel %vm1013_vm3, %v1021_v37, %v5310_v30 }
 0x2eb   : > { %v5466_v49 = vpop.permute.xlu0 %1026 }
 0x2ed   : > { %v1015_v35 = vpop.permute.xlu1 %1014 }
 0x2ee   : > { %v1016_v25 = vsel %vm1013_vm3, %v1015_v35, %v5332_v51 }
 0x2ef   : > { %1038 = vrot.lane.b32.xlu1 %v1016_v25, %s4838_s23  ;;  %v1033_v48 = vpop.permute.xlu0 %1032 }
 0x2f0   : > { %v1034_v7 = vsel %vm1013_vm3, %v1033_v48, %v5338_v44  ;;  %v2711_v48 = vld [vmem:[%s6458_s7 + $0x10] sm:$0xff] }
 0x2f1   : > { %v1018_v41 = vpop.permute.xlu1 %1017 }
 0x2f2   : > { %v1019_v43 = vsel %vm1013_vm3, %v1018_v41, %v5342_v54 }
 0x2f3   : > { %1042 = vrot.lane.b32.xlu1 %v1022_v34, %s4838_s23  ;;  %1040 = vrot.lane.b32.xlu0 %v1019_v43, %s4838_s23  ;;  %v5474_v1 = vpop.permute.xlu0 %1331  ;;  %v4100_v34 = vld [vmem:[%s6454_s3 + $0x16] ss:$0 sm:$0xff] }
 0x2f4   : > { %6550 = vst [vmem:[#allocation34_spill] sm:$0xff] %v5474_v1 }
 0x2f5   : > { %v5464_v36 = vpop.permute.xlu1 %1023 }
 0x2f7   : > { %1173 = vperm.xlu1 %4497, %v4068_v45   ;;  %v5484_v17 = vpop.permute.xlu0 %1337 }
 0x2f8   : > { %6551 = vst [vmem:[#allocation35_spill] sm:$0xff] %v5484_v17 }
 0x2f9   : > { %v1030_v52 = vpop.permute.xlu1 %1029 }
 0x2fa   : > { %v1031_v53 = vsel %vm1013_vm3, %v1030_v52, %v5358_v57 }
 0x2fb   : > { %1231 = vrot.lane.b32.xlu1 %v4069_v42, %s4839_s22  ;;  %v5489_v18 = vpop.permute.xlu0 %1343  ;;  %s4841_s22 = smov 14  }
 0x2fc   : > { %6552 = vst [vmem:[#allocation36_spill] sm:$0xff] %v5489_v18 }
 0x2fd   : > { %v5478_v8 = vpop.permute.xlu1 %1035 }
 0x2ff   : > { %1048 = vrot.lane.b32.xlu1 %v1031_v53, %s4838_s23  ;;  %v1350_v43 = vpop.permute.xlu0 %1349  ;;  %v2703_v53 = vld [vmem:[%s6457_s6 + $0x10] sm:$0xff] }
 0x301   : > { %v4297_v50 = vpop.f32.mrf.mxu0  ;;  %v4307_v0 = vpop.f32.mrf.mxu1 }
 0x302   : > { %v1335_v20 = vpop.permute.xlu1 %1334  ;;  %v2565_v45 = vsub.f32 %v4297_v50, %v4307_v0  ;;  %v2709_v50 = vld [vmem:[%s6458_s7] sm:$0xff]  ;;  %v2704_v0 = vld [vmem:[%s6457_s6 + $0x18] sm:$0xff] }
 0x303   : > { %1470 = vperm.xlu1 %4497, %v4090_v56   ;;  %v2449_v6 = vpop.f32.mrf.mxu0  ;;  %v2532_v10 = vpop.f32.mrf.mxu1  ;;  %v1336_v9 = vsel %vm1013_vm3, %v1335_v20, %v5314_v40  ;;  %v2701_v56 = vld [vmem:[%s6457_s6] sm:$0xff]  ;;  %v2712_v20 = vld [vmem:[%s6458_s7 + $0x18] sm:$0xff] }
 0x304   : > { %v2563_v42 = vsub.f32 %v2449_v6, %v2532_v10 }
 0x305   : > { %v4298_v13 = vpop.f32.mrf.mxu0  ;;  %v4308_v15 = vpop.f32.mrf.mxu1 }
 0x306   : > { %v1341_v61 = vpop.permute.xlu1 %1340  ;;  %v2749_v44 = vmul.f32 %v2709_v50, %v2563_v42 }
 0x307   : > { %1050 = vrot.lane.b32.xlu1 %v1034_v7, %s4838_s23  ;;  %v2452_v60 = vpop.f32.mrf.mxu0  ;;  %v2535_v24 = vpop.f32.mrf.mxu1  ;;  %v1342_v25 = vsel %vm1013_vm3, %v1341_v61, %v5283_v23  ;;  %v2566_v7 = vsub.f32 %v4298_v13, %v4308_v15  ;;  %v2702_v13 = vld [vmem:[%s6457_s6 + $0x8] sm:$0xff]  ;;  %v5525_v61 = vsel %vm1013_vm3, %v1350_v43, %v5302_v31  ;;  %v2751_v23 = vmul.f32 %v2711_v48, %v2565_v45  ;;  %v2705_v43 = vld [vmem:[%s6457_s6 + $0x20] sm:$0xff] }
 0x308   : > { %v2564_v6 = vsub.f32 %v2452_v60, %v2535_v24  ;;  %v2717_v60 = vmul.f32 %v2701_v56, %v2563_v42  ;;  %v2710_v24 = vld [vmem:[%s6458_s7 + $0x8] sm:$0xff] }
 0x309   : > { %v2720_v59 = vmul.f32 %v2704_v0, %v2566_v7 }
 0x30a   : > { %v1347_v10 = vpop.permute.xlu1 %1346  ;;  %v2718_v11 = vmul.f32 %v2702_v13, %v2564_v6 }
 0x30b   : > { %1478 = vperm.xlu1 %4497, %v4092_v12  }
 0x30f   : > { %1571 = vperm.xlu1 %4497, %v4099_v19  }
 0x310   : > { %v4301_v27 = vpop.f32.mrf.mxu0  ;;  %v4311_v63 = vpop.f32.mrf.mxu1 }
 0x312   : > { %v2465_v26 = vpop.f32.mrf.mxu0  ;;  %v2548_v4 = vpop.f32.mrf.mxu1 }
 0x313   : > { %1357 = vrot.lane.b32.xlu1 %v1336_v9, %s4838_s23  ;;  %v2567_v62 = vsub.f32 %v2465_v26, %v2548_v4  ;;  %v2713_v26 = vld [vmem:[%s6458_s7 + $0x20] sm:$0xff] }
 0x314   : > { %v4302_v3 = vpop.f32.mrf.mxu0  ;;  %v4312_v33 = vpop.f32.mrf.mxu1 }
 0x316   : > { %v5494_v35 = vpop.f32.mrf.mxu0  ;;  %v2551_v37 = vpop.f32.mrf.mxu1 }
 0x317   : > { %1361 = vrot.lane.b32.xlu1 %v1342_v25, %s4838_s23  ;;  %v2719_v25 = vmul.f32 %v2703_v53, %v2565_v45 }
 0x318   : > { %v4317_v41 = vpop.f32.mrf.mxu0  ;;  %v4327_v52 = vpop.f32.mrf.mxu1 }
 0x31a   : > { %v2605_v12 = vpop.f32.mrf.mxu0  ;;  %v2670_v19 = vpop.f32.mrf.mxu1 }
 0x31b   : > { %1575 = vperm.xlu1 %4497, %v4100_v34   ;;  %v2671_v15 = vadd.f32 %v2670_v19, %v2605_v12  ;;  %v2679_v34 = vadd.f32 %v4327_v52, %v4317_v41  ;;  %v1348_v12 = vsel %vm1013_vm3, %v1347_v10, %v5299_v5  ;;  %v2752_v19 = vmul.f32 %v2712_v20, %v2566_v7  ;;  %v4116_v10 = vld [vmem:[%s6454_s3 + $0x1c] ss:$0 sm:$0xff] }
 0x31c   : > { %v4318_v9 = vpop.f32.mrf.mxu0  ;;  %v4328_v40 = vpop.f32.mrf.mxu1  ;;  %v2750_v41 = vmul.f32 %v2710_v24, %v2564_v6  ;;  %v5536_v52 = vsub.f32 %v4301_v27, %v4311_v63  ;;  %v2570_v5 = vsub.f32 %v4302_v3, %v4312_v33  ;;  %v2708_v27 = vld [vmem:[%s6457_s6 + $0x38] sm:$0xff]  ;;  %v2568_v3 = vsub.f32 %v5494_v35, %v2551_v37  ;;  %v2714_v35 = vld [vmem:[%s6458_s7 + $0x28] sm:$0xff] }
 0x31d   : > { %v2725_v45 = vmul.f32 %v2709_v50, %v2671_v15  ;;  %v2682_v31 = vadd.f32 %v4328_v40, %v4318_v9  ;;  %v2741_v4 = vmul.f32 %v2701_v56, %v2671_v15  ;;  %v2743_v50 = vmul.f32 %v2703_v53, %v2679_v34 }
 0x31e   : > { %v2608_v16 = vpop.f32.mrf.mxu0  ;;  %v2673_v32 = vpop.f32.mrf.mxu1  ;;  %v2727_v63 = vmul.f32 %v2711_v48, %v2679_v34 }
 0x31f   : > { %1365 = vrot.lane.b32.xlu1 %v1348_v12, %s4838_s23  ;;  %v2674_v42 = vadd.f32 %v2673_v32, %v2608_v16  ;;  %v2728_v40 = vmul.f32 %v2712_v20, %v2682_v31  ;;  %v2744_v9 = vmul.f32 %v2704_v0, %v2682_v31  ;;  %v2721_v12 = vmul.f32 %v2705_v43, %v2567_v62  ;;  %v2716_v16 = vld [vmem:[%s6458_s7 + $0x38] sm:$0xff]  ;;  %v2706_v0 = vld [vmem:[%s6457_s6 + $0x28] sm:$0xff] }
 0x320   : > { %v4321_v7 = vpop.f32.mrf.mxu0  ;;  %v4331_v18 = vpop.f32.mrf.mxu1  ;;  %v5547_v32 = vmul.f32 %v2713_v26, %v2567_v62  ;;  %v2733_v33 = vadd.f32 %v2725_v45, %v2717_v60  ;;  %v2757_v48 = vsub.f32 %v2741_v4, %v2749_v44  ;;  %v2759_v34 = vsub.f32 %v2743_v50, %v2751_v23  ;;  %v2707_v23 = vld [vmem:[%s6457_s6 + $0x30] sm:$0xff]  ;;  %v4118_v50 = vld [vmem:[%s6454_s3 + $0x1e] ss:$0 sm:$0xff] }
 0x321   : > { %v2726_v6 = vmul.f32 %v2710_v24, %v2674_v42  ;;  %v2742_v28 = vmul.f32 %v2702_v13, %v2674_v42  ;;  %v2760_v31 = vsub.f32 %v2744_v9, %v2752_v19  ;;  %v2736_v20 = vadd.f32 %v2728_v40, %v2720_v59 }
 0x322   : > { %v2621_v56 = vpop.f32.mrf.mxu0  ;;  %v2686_v53 = vpop.f32.mrf.mxu1  ;;  %v2724_v24 = vmul.f32 %v2708_v27, %v2570_v5  ;;  %v2695_v42 = vadd.f32 %v4331_v18, %v4321_v7  ;;  %v2756_v1 = vmul.f32 %v2716_v16, %v2570_v5  ;;  %v2735_v37 = vadd.f32 %v2727_v63, %v2719_v25  ;;  %v2715_v5 = vld [vmem:[%s6458_s7 + $0x30] sm:$0xff] }
 0x323   : > { %1807 = vperm.xlu1 %4497, %v4116_v10   ;;  %v2734_v13 = vadd.f32 %v2726_v6, %v2718_v11  ;;  %v2758_v15 = vsub.f32 %v2742_v28, %v2750_v41  ;;  %v2687_v17 = vadd.f32 %v2686_v53, %v2621_v56  ;;  %v2722_v10 = vmul.f32 %v2706_v0, %v2568_v3 }
 0x324   : > { %v4322_v62 = vpop.f32.mrf.mxu0  ;;  %v4332_v21 = vpop.f32.mrf.mxu1  ;;  %v2770_v44 = vpack.c.bf16 %v2760_v31, %v2759_v34  ;;  %v2766_v18 = vpack.c.bf16 %v2736_v20, %v2735_v37  ;;  %v2747_v4 = vmul.f32 %v2707_v23, %v2695_v42  ;;  %v2731_v40 = vmul.f32 %v2715_v5, %v2695_v42 }
 0x325   : > { %v2765_v60 = vpack.c.bf16 %v2734_v13, %v2733_v33  ;;  %v2769_v19 = vpack.c.bf16 %v2758_v15, %v2757_v48  ;;  %v2729_v59 = vmul.f32 %v2713_v26, %v2687_v17  ;;  %v2698_v11 = vadd.f32 %v4332_v21, %v4322_v62  ;;  %v5569_v21 = vpop.permute.xlu1 %1352  ;;  %v5584_v20 = vpop.permute.xlu0 %1668  ;;  %v4126_v62 = vld [vmem:[%s6454_s3 + $0x22] ss:$0 sm:$0xff] }
 0x326   : > { %v2624_v45 = vpop.f32.mrf.mxu0  ;;  %v2689_v28 = vpop.f32.mrf.mxu1  ;;  %v2745_v25 = vmul.f32 %v2705_v43, %v2687_v17  ;;  %v2754_v26 = vmul.f32 %v2714_v35, %v2568_v3  ;;  %v2723_v43 = vmul.f32 %v2707_v23, %v5536_v52  ;;  %v2755_v63 = vmul.f32 %v2715_v5, %v5536_v52  ;;  %v4085_v5 = vld [vmem:[%s6454_s3 + $0xf] ss:$0 sm:$0xff] }
 0x327   : > { %1367 = vrot.lane.b32.xlu1 %v5525_v61, %s4838_s23  ;;  %v2690_v41 = vadd.f32 %v2689_v28, %v2624_v45  ;;  %4335 = vmatprep.mubr.msk.bf16.mxu0 %vm664_vm0, %v2769_v19  ;;  %v2732_v61 = vmul.f32 %v2716_v16, %v2698_v11  ;;  %v2748_v7 = vmul.f32 %v2708_v27, %v2698_v11  ;;  %v4060_v45 = vld [vmem:[%s6454_s3 + $0x3] ss:$0 sm:$0xff] }
 0x328   : > { %4345 = vmatprep.mubr.msk.bf16.mxu1 %vm664_vm0, %v2765_v60  ;;  %4336 = vmatmul.mubr.msk.bf16.vlgmr.msra.gmra.mxu0 %vm664_vm0, %v2770_v44  ;;  %v2737_v6 = vadd.f32 %v2729_v59, %v2721_v12  ;;  %v2761_v27 = vsub.f32 %v2745_v25, %v5547_v32  ;;  %v2763_v31 = vsub.f32 %v2747_v4, %v2755_v63 }
 0x329   : > { %v2730_v9 = vmul.f32 %v2714_v35, %v2690_v41  ;;  %v2746_v17 = vmul.f32 %v2706_v0, %v2690_v41  ;;  %4346 = vmatmul.mubr.msk.bf16.vlgmr.msra.gmra.mxu1 %vm664_vm0, %v2766_v18  ;;  %4354 = vmatpush3.bf16.msra.mxu0 %v5205_v46  ;;  %v2764_v56 = vsub.f32 %v2748_v7, %v2756_v1  ;;  %v4125_v46 = vld [vmem:[%s6454_s3 + $0x21] ss:$0 sm:$0xff]  ;;  %v1672_v52 = vpop.permute.xlu1 %1671  ;;  %v5594_v32 = vpop.permute.xlu0 %1674 }
 0x32a   : > { %4364 = vmatpush3.bf16.msra.mxu1 %v5203_v38  ;;  %v2740_v16 = vadd.f32 %v2732_v61, %v2724_v24  ;;  %v2739_v53 = vadd.f32 %v2731_v40, %v2723_v43  ;;  %v1673_v38 = vsel %vm1013_vm3, %v1672_v52, %v5415_v2 }
 0x32b   : > { %v2738_v3 = vadd.f32 %v2730_v9, %v2722_v10  ;;  %v2762_v33 = vsub.f32 %v2746_v17, %v2754_v26  ;;  %1815 = vperm.xlu1 %4497, %v4118_v50   ;;  %v2772_v1 = vpack.c.bf16 %v2764_v56, %v2763_v31  ;;  %v4083_v10 = vld [vmem:[%s6454_s3 + $0xd] ss:$0 sm:$0xff] }
 0x32c   : > { %v2768_v12 = vpack.c.bf16 %v2740_v16, %v2739_v53 }
 0x32d   : > { %v2767_v0 = vpack.c.bf16 %v2738_v3, %v2737_v6  ;;  %v2771_v48 = vpack.c.bf16 %v2762_v33, %v2761_v27  ;;  %v1678_v13 = vpop.permute.xlu1 %1677  ;;  %v5606_v24 = vpop.permute.xlu0 %1680 }
 0x32e   : > { %v1679_v15 = vsel %vm1013_vm3, %v1678_v13, %v5424_v22 }
 0x32f   : > { %4339 = vmatprep.mubr.msk.bf16.mxu0 %vm664_vm0, %v2771_v48  ;;  %4349 = vmatprep.mubr.msk.bf16.mxu1 %vm664_vm0, %v2767_v0 }
 0x330   : > { %1908 = vperm.xlu1 %4497, %v4125_v46   ;;  %4340 = vmatmul.mubr.msk.bf16.gmra.mxu0 %vm664_vm0, %v2772_v1 }
 0x331   : > { %4350 = vmatmul.mubr.msk.bf16.gmra.mxu1 %vm664_vm0, %v2768_v12  ;;  %4355 = vmatprep.mubr.msk.bf16.mxu0 %vm664_vm0, %v2765_v60  ;;  %v1684_v34 = vpop.permute.xlu1 %1683  ;;  %v1687_v35 = vpop.permute.xlu0 %1686  ;;  %v4057_v60 = vld [vmem:[%s6454_s3] ss:$0 sm:$0xff] }
 0x332   : > { %4365 = vmatprep.mubr.msk.bf16.mxu1 %vm664_vm0, %v2769_v19  ;;  %v1685_v42 = vsel %vm1013_vm3, %v1684_v34, %v5433_v29  ;;  %v1688_v37 = vsel %vm1013_vm3, %v1687_v35, %v5409_v14  ;;  %v4059_v19 = vld [vmem:[%s6454_s3 + $0x2] ss:$0 sm:$0xff] }
 0x334   : > { %1694 = vrot.lane.b32.xlu1 %v1673_v38, %s4838_s23 }
 0x335   : > { %v5631_v59 = vpop.permute.xlu1 %1689 }
 0x338   : > { %1698 = vrot.lane.b32.xlu1 %v1679_v15, %s4838_s23  ;;  %4356 = vmatmul.mubr.msk.bf16.vlgmr.msra.gmra.mxu0 %vm664_vm0, %v2766_v18 }
 0x339   : > { %4366 = vmatmul.mubr.msk.bf16.vlgmr.msra.gmra.mxu1 %vm664_vm0, %v2770_v44  ;;  %4359 = vmatprep.mubr.msk.bf16.mxu0 %vm664_vm0, %v2767_v0  ;;  %v5629_v44 = vpop.permute.xlu0 %1161  ;;  %v5635_v28 = vpop.permute.xlu1 %1165 }
 0x33a   : > { %4369 = vmatprep.mubr.msk.bf16.mxu1 %vm664_vm0, %v2771_v48  ;;  %v1176_v11 = vmul.f32 %v5629_v44, %v5332_v51  ;;  %v1178_v23 = vmul.f32 %v5635_v28, %v5310_v30 }
 0x33c   : > { %1912 = vperm.xlu1 %4497, %v4126_v62  }
 0x33d   : > { %v5644_v18 = vpop.permute.xlu0 %1169  ;;  %v5648_v41 = vpop.permute.xlu1 %1268 }
 0x33e   : > { %v1181_v25 = vmul.f32 %v5644_v18, %v5358_v57 }
 0x340   : > { %1702 = vrot.lane.b32.xlu1 %v1685_v42, %s4838_s23  ;;  %4360 = vmatmul.mubr.msk.bf16.gmra.mxu0 %vm664_vm0, %v2768_v12 }
 0x341   : > { %4370 = vmatmul.mubr.msk.bf16.gmra.mxu1 %vm664_vm0, %v2772_v1  ;;  %v5655_v61 = vpop.permute.xlu0 %1272 }
 0x344   : > { %1704 = vrot.lane.b32.xlu1 %v1688_v37, %s4838_s23 }
 0x348   : > { %1104 = vperm.xlu1 %4497, %v4057_v60  }
 0x34c   : > { %1112 = vperm.xlu1 %4497, %v4059_v19  }
 0x350   : > { %1116 = vperm.xlu1 %4497, %v4060_v45  }
 0x354   : > { %1417 = vperm.xlu1 %4497, %v4083_v10  }
 0x358   : > { %1192 = vrot.lane.b32.xlu1 %v1176_v11, %s4840_s27 }
 0x35c   : > { %1196 = vrot.lane.b32.xlu1 %v1178_v23, %s4840_s27 }
 0x360   : > { %1425 = vperm.xlu1 %4497, %v4085_v5  }
 0x361   : > { %v5651_v26 = vpop.permute.xlu1 %1038 }
 0x364   : > { %1202 = vrot.lane.b32.xlu1 %v1181_v25, %s4840_s27 }
 0x365   : > { %v5653_v4 = vpop.permute.xlu1 %1042  ;;  %v1041_v50 = vpop.permute.xlu0 %1040 }
 0x366   : > { %v5661_v40 = vsel %vm1013_vm3, %v1041_v50, %v5342_v54 }
 0x372   : > { %v5657_v7 = vpop.permute.xlu1 %1173 }
 0x376   : > { %v5663_v9 = vpop.permute.xlu1 %1231 }
 0x377   : > { %v1235_v17 = vmul.f32 %v5663_v9, %v5661_v40 }
 0x379   : > { %v1284_v43 = vmul.f32 %v5648_v41, %v1235_v17 }
 0x37b   : > { %1301 = vrot.lane.b32.xlu1 %v1284_v43, %s4841_s22 }
 0x3e8   : > { %v4337_v63 = vpop.f32.mrf.mxu0 }
 0x3e9   : > { %v4347_v6 = vpop.f32.mrf.mxu1 }
 0x3ea   : > { %v2819_v56 = vpop.f32.mrf.mxu0  ;;  %v2905_v62 = vadd.f32 %v4347_v6, %v4337_v63  ;;  %v4614_v63 = vld [vmem:[%s6463_s12] sm:$0xff]  }
 0x3eb   : > { %v2896_v27 = vpop.f32.mrf.mxu1  ;;  %v4615_v6 = vld [vmem:[#allocation10] sm:$0xff]   ;;  %4373 = vmatprep.subr.bf16.mxu0 %v4614_v63 }
 0x3ec   : > { %v4338_v16 = vpop.f32.mrf.mxu0  ;;  %v2897_v43 = vadd.f32 %v2896_v27, %v2819_v56  ;;  %4383 = vmatprep.subr.bf16.mxu1 %v4615_v6  ;;  %4374 = vmatpush3.bf16.msra.mxu0 %v4614_v63  ;;  %v6556_v63 = vld [vmem:[#allocation24_spill] sm:$0xff] }
 0x3ed   : > { %v4348_v3 = vpop.f32.mrf.mxu1  ;;  %4384 = vmatpush3.bf16.msra.mxu1 %v4615_v6  ;;  %v6557_v6 = vld [vmem:[#allocation36_spill] sm:$0xff] }
 0x3ee   : > { %v2822_v33 = vpop.f32.mrf.mxu0  ;;  %v2908_v45 = vadd.f32 %v4348_v3, %v4338_v16 }
 0x3ef   : > { %v2899_v31 = vpop.f32.mrf.mxu1 }
 0x3f0   : > { %v4341_v53 = vpop.f32.mrf.mxu0  ;;  %v2900_v16 = vadd.f32 %v2899_v31, %v2822_v33 }
 0x3f1   : > { %v4351_v0 = vpop.f32.mrf.mxu1 }
 0x3f2   : > { %v2835_v48 = vpop.f32.mrf.mxu0  ;;  %v2921_v27 = vadd.f32 %v4351_v0, %v4341_v53  ;;  %v1025_v53 = vsel %vm1013_vm3, %v5464_v36, %v5350_v55  ;;  %v4076_v0 = vld [vmem:[%s6454_s3 + $0xa] ss:$0 sm:$0xff]  ;;  %v4091_v36 = vld [vmem:[%s6454_s3 + $0x11] ss:$0 sm:$0xff] }
 0x3f3   : > { %v2912_v46 = vpop.f32.mrf.mxu1 }
 0x3f4   : > { %v4342_v52 = vpop.f32.mrf.mxu0 }
 0x3f5   : > { %v4352_v1 = vpop.f32.mrf.mxu1 }
 0x3f6   : > { %v2838_v12 = vpop.f32.mrf.mxu0 }
 0x3f7   : > { %v2915_v38 = vpop.f32.mrf.mxu1 }
 0x3f8   : > { %v4357_v13 = vpop.f32.mrf.mxu0 }
 0x3f9   : > { %v4367_v15 = vpop.f32.mrf.mxu1 }
 0x3fa   : > { %v3059_v34 = vsub.f32 %v4357_v13, %v4367_v15  ;;  %v2961_v42 = vpop.f32.mrf.mxu0 }
 0x3fb   : > { %v3026_v35 = vpop.f32.mrf.mxu1 }
 0x3fc   : > { %v4554_v37 = vpack.i.bf16 %v3059_v34, %v2905_v62  ;;  %v4358_v60 = vpop.f32.mrf.mxu0  ;;  %v3057_v5 = vsub.f32 %v2961_v42, %v3026_v35 }
 0x3fd   : > { %v4368_v19 = vpop.f32.mrf.mxu1 }
 0x3fe   : > { %v3060_v10 = vsub.f32 %v4358_v60, %v4368_v19  ;;  %4555 = vxpose.xlu0.b32.start [1/2] (short) (narrow) %v4554_v37, 16  ;;  %v2964_v11 = vpop.f32.mrf.mxu0  ;;  %v4568_v13 = vpack.i.bf16 %v3057_v5, %v2897_v43  ;;  %v2924_v19 = vadd.f32 %v4352_v1, %v4342_v52  ;;  %v2913_v5 = vadd.f32 %v2912_v46, %v2835_v48  ;;  %v4077_v46 = vld [vmem:[%s6454_s3 + $0xb] ss:$0 sm:$0xff] }
 0x3ff   : > { %v3029_v23 = vpop.f32.mrf.mxu1  ;;  %v1028_v48 = vsel %vm1013_vm3, %v5466_v49, %v5324_v47  ;;  %v1037_v52 = vsel %vm1013_vm3, %v5478_v8, %v5366_v58  ;;  %v4098_v49 = vld [vmem:[%s6454_s3 + $0x14] ss:$0 sm:$0xff]  ;;  %v6553_v1 = vld [vmem:[#allocation34_spill] sm:$0xff]  ;;  %v4093_v8 = vld [vmem:[%s6454_s3 + $0x13] ss:$0 sm:$0xff] }
 0x400   : > { %v4556_v25 = vpack.i.bf16 %v3060_v10, %v2908_v45  ;;  %v4361_v50 = vpop.f32.mrf.mxu0  ;;  %v3058_v15 = vsub.f32 %v2964_v11, %v3029_v23 }
 0x401   : > { %v4371_v17 = vpop.f32.mrf.mxu1 }
 0x402   : > { %4557 = vxpose.xlu0.b32.end [2/2] (short) (narrow) %v4556_v25, 16  ;;  %v2977_v62 = vpop.f32.mrf.mxu0  ;;  %v4570_v3 = vpack.i.bf16 %v3058_v15, %v2900_v16  ;;  %v3063_v42 = vsub.f32 %v4361_v50, %v4371_v17  ;;  %v2916_v25 = vadd.f32 %v2915_v38, %v2838_v12  ;;  %v1333_v12 = vsel %vm1013_vm3, %v6553_v1, %v5312_v39  ;;  %v6554_v38 = vld [vmem:[#allocation22_spill] sm:$0xff]  ;;  %v6555_v50 = vld [vmem:[#allocation35_spill] sm:$0xff]  ;;  %v4101_v15 = vld [vmem:[%s6454_s3 + $0x17] ss:$0 sm:$0xff] }
 0x403   : > { %v3042_v34 = vpop.f32.mrf.mxu1  ;;  %v1339_v17 = vsel %vm1013_vm3, %v6555_v50, %v6554_v38  ;;  %v6562_v50 = vld [vmem:[#allocation33_spill] sm:$0xff] }
 0x404   : > { %v4362_v35 = vpop.f32.mrf.mxu0  ;;  %v4582_v37 = vpack.i.bf16 %v3063_v42, %v2921_v27  ;;  %v3061_v45 = vsub.f32 %v2977_v62, %v3042_v34  ;;  %v4117_v62 = vld [vmem:[%s6454_s3 + $0x1d] ss:$0 sm:$0xff]  ;;  %v6558_v34 = vld [vmem:[#allocation27_spill] sm:$0xff] }
 0x405   : > { %v4372_v56 = vpop.f32.mrf.mxu1  ;;  %v1354_v16 = vsel %vm1013_vm3, %v5569_v21, %v6558_v34 }
 0x406   : > { %4569 = vxpose.xlu0.b32.start [1/2] (short) (narrow) %v4568_v13, 16  ;;  %v3064_v60 = vsub.f32 %v4362_v35, %v4372_v56  ;;  %v2980_v11 = vpop.f32.mrf.mxu0  ;;  %v4596_v33 = vpack.i.bf16 %v3061_v45, %v2913_v5  ;;  %v1345_v13 = vsel %vm1013_vm3, %v6557_v6, %v6556_v63  ;;  %v6559_v35 = vld [vmem:[#allocation30_spill] sm:$0xff] }
 0x407   : > { %v3045_v23 = vpop.f32.mrf.mxu1  ;;  %v1670_v56 = vsel %vm1013_vm3, %v5584_v20, %v6559_v35 }
 0x408   : > { %v4584_v10 = vpack.i.bf16 %v3064_v60, %v2924_v19  ;;  %v3062_v31 = vsub.f32 %v2980_v11, %v3045_v23  ;;  %v4119_v19 = vld [vmem:[%s6454_s3 + $0x1f] ss:$0 sm:$0xff] }
 0x40a   : > { %4571 = vxpose.xlu0.b32.end [2/2] (short) (narrow) %v4570_v3, 16  ;;  %v4598_v43 = vpack.i.bf16 %v3062_v31, %v2916_v25  ;;  %v4124_v3 = vld [vmem:[%s6454_s3 + $0x20] ss:$0 sm:$0xff] }
 0x40e   : > { %4583 = vxpose.xlu0.b32.start [1/2] (short) (narrow) %v4582_v37, 16  ;;  %v6560_v37 = vld [vmem:[#allocation31_spill] sm:$0xff] }
 0x40f   : > { %v1676_v60 = vsel %vm1013_vm3, %v5594_v32, %v6560_v37 }
 0x412   : > { %4585 = vxpose.xlu0.b32.end [2/2] (short) (narrow) %v4584_v10, 16 }
 0x416   : > { %4597 = vxpose.xlu0.b32.start [1/2] (short) (narrow) %v4596_v33, 16 }
 0x41a   : > { %4599 = vxpose.xlu0.b32.end [2/2] (short) (narrow) %v4598_v43, 16 }
 0x443   : > { %1044 = vrot.lane.b32.xlu0 %v1025_v53, %s4838_s23 }
 0x447   : > { %1276 = vperm.xlu0 %4496, %v4076_v0  }
 0x44b   : > { %1046 = vrot.lane.b32.xlu0 %v1028_v48, %s4838_s23  ;;  %v6561_v48 = vld [vmem:[#allocation32_spill] sm:$0xff] }
 0x44f   : > { %1280 = vperm.xlu0 %4496, %v4077_v46   ;;  %v1682_v46 = vsel %vm1013_vm3, %v5606_v24, %v6561_v48 }
 0x453   : > { %1474 = vperm.xlu0 %4496, %v4091_v36   ;;  %v5738_v36 = vpop.permute.xlu1 %1048 }
 0x457   : > { %1052 = vrot.lane.b32.xlu0 %v1037_v52, %s4838_s23  ;;  %v5748_v24 = vpop.permute.xlu1 %1470 }
 0x45b   : > { %1567 = vperm.xlu0 %4496, %v4098_v49   ;;  %v4127_v49 = vld [vmem:[%s6454_s3 + $0x23] ss:$0 sm:$0xff] }
 0x45f   : > { %1355 = vrot.lane.b32.xlu0 %v1333_v12, %s4838_s23 }
 0x463   : > { %1359 = vrot.lane.b32.xlu0 %v1339_v17, %s4838_s23  ;;  %v1691_v17 = vsel %vm1013_vm3, %v5631_v59, %v6562_v50  ;;  %v4056_v59 = vld [vmem:[#allocation2] ss:$0 sm:$0xff] }
 0x467   : > { %1482 = vperm.xlu0 %4496, %v4093_v8   ;;  %v4058_v8 = vld [vmem:[%s6454_s3 + $0x1] ss:$0 sm:$0xff] }
 0x46b   : > { %1363 = vrot.lane.b32.xlu0 %v1345_v13, %s4838_s23 }
 0x46f   : > { %1579 = vperm.xlu0 %4496, %v4101_v15  }
 0x473   : > { %1811 = vperm.xlu0 %4496, %v4117_v62  }
 0x477   : > { %1369 = vrot.lane.b32.xlu0 %v1354_v16, %s4838_s23 }
 0x47a   : > { %v4558_v42 = vpop.trf.xlu0 }
 0x47b   : > { %1904 = vperm.xlu0 %4496, %v4124_v3   ;;  %v4559_v31 = vunpack.i.l.bf16 %v4558_v42  ;;  %v4562_v25 = vunpack.i.h.bf16 %v4558_v42  ;;  %v1051_v3 = vpop.permute.xlu1 %1050 }
 0x47e   : > { %v4563_v27 = vpop.trf.xlu0 }
 0x47f   : > { %1692 = vrot.lane.b32.xlu0 %v1670_v56, %s4838_s23  ;;  %v4567_v45 = vunpack.i.h.bf16 %v4563_v27  ;;  %v4564_v10 = vunpack.i.l.bf16 %v4563_v27 }
 0x481   : > { %v3194_v32 = vpack.c.bf16 %v4564_v10, %v4559_v31  ;;  %v3326_v52 = vpack.c.bf16 %v4567_v45, %v4562_v25  ;;  %v1179_v25 = vmul.f32 %v5635_v28, %v5350_v55  ;;  %v5795_v28 = vsel %vm1013_vm3, %v5653_v4, %v5310_v30  ;;  %v4108_v4 = vld [vmem:[%s6454_s3 + $0x18] ss:$0 sm:$0xff] }
 0x482   : > { %v4572_v21 = vpop.trf.xlu0 }
 0x483   : > { %1696 = vrot.lane.b32.xlu0 %v1676_v60, %s4838_s23  ;;  %v4576_v11 = vunpack.i.h.bf16 %v4572_v21  ;;  %v4573_v23 = vunpack.i.l.bf16 %v4572_v21 }
 0x486   : > { %v4577_v5 = vpop.trf.xlu0 }
 0x487   : > { %v4581_v20 = vunpack.i.h.bf16 %v4577_v5  ;;  %v4578_v33 = vunpack.i.l.bf16 %v4577_v5  ;;  %1819 = vperm.xlu0 %4496, %v4119_v19   ;;  %v4084_v5 = vld [vmem:[%s6454_s3 + $0xe] ss:$0 sm:$0xff] }
 0x489   : > { %v3193_v43 = vpack.c.bf16 %v4578_v33, %v4573_v23  ;;  %v3325_v53 = vpack.c.bf16 %v4581_v20, %v4576_v11  ;;  %v5761_v11 = vpop.permute.xlu1 %1478  ;;  %v4082_v23 = vld [vmem:[%s6454_s3 + $0xc] ss:$0 sm:$0xff]  ;;  %v1177_v33 = vmul.f32 %v5629_v44, %v5342_v54 }
 0x48a   : > { %v4586_v0 = vpop.trf.xlu0 }
 0x48b   : > { %4375 = vmatprep.mubr.msk.bf16.mxu0 %vm664_vm0, %v3193_v43  ;;  %4385 = vmatprep.mubr.msk.bf16.mxu1 %vm664_vm0, %v3325_v53  ;;  %v4587_v27 = vunpack.i.l.bf16 %v4586_v0  ;;  %v4590_v60 = vunpack.i.h.bf16 %v4586_v0  ;;  %v5783_v43 = vsel %vm1013_vm3, %v5651_v26, %v5332_v51  ;;  %v1180_v53 = vmul.f32 %v5644_v18, %v5324_v47 }
 0x48c   : > { %1700 = vrot.lane.b32.xlu0 %v1682_v46, %s4838_s23  ;;  %4376 = vmatmul.mubr.msk.bf16.vlgmr.msra.gmra.mxu0 %vm664_vm0, %v3194_v32  ;;  %v1234_v54 = vmul.f32 %v5663_v9, %v5783_v43  ;;  %v1236_v51 = vmul.f32 %v5663_v9, %v5795_v28 }
 0x48d   : > { %4386 = vmatmul.mubr.msk.bf16.vlgmr.msra.gmra.mxu1 %vm664_vm0, %v3326_v52  ;;  %v5770_v20 = vpop.permute.xlu1 %1571 }
 0x48e   : > { %v4591_v1 = vpop.trf.xlu0  ;;  %v1283_v32 = vmul.f32 %v5648_v41, %v1234_v54  ;;  %v1285_v46 = vmul.f32 %v5655_v61, %v1236_v51  ;;  %v6564_v54 = vld [vmem:[#allocation28_spill] sm:$0xff] }
 0x48f   : > { %v4595_v6 = vunpack.i.h.bf16 %v4591_v1  ;;  %v4592_v13 = vunpack.i.l.bf16 %v4591_v1 }
 0x490   : > { %1916 = vperm.xlu0 %4496, %v4127_v49   ;;  %v6563_v49 = vld [vmem:[#allocation29_spill] sm:$0xff] }
 0x491   : > { %v3196_v45 = vpack.c.bf16 %v4592_v13, %v4587_v27  ;;  %v3328_v10 = vpack.c.bf16 %v4595_v6, %v4590_v60  ;;  %v5775_v31 = vpop.permute.xlu1 %1357  ;;  %v1182_v1 = vmul.f32 %v5657_v7, %v6563_v49 }
 0x492   : > { %v4600_v12 = vpop.trf.xlu0 }
 0x493   : > { %v4604_v15 = vunpack.i.h.bf16 %v4600_v12  ;;  %v4601_v62 = vunpack.i.l.bf16 %v4600_v12  ;;  %v1183_v12 = vmul.f32 %v5657_v7, %v5366_v58 }
 0x494   : > { %1706 = vrot.lane.b32.xlu0 %v1691_v17, %s4838_s23 }
 0x495   : > { %v5789_v44 = vpop.permute.xlu1 %1361 }
 0x496   : > { %v4605_v16 = vpop.trf.xlu0 }
 0x497   : > { %v4609_v42 = vunpack.i.h.bf16 %v4605_v16  ;;  %v4606_v56 = vunpack.i.l.bf16 %v4605_v16 }
 0x498   : > { %1108 = vperm.xlu0 %4496, %v4058_v8  }
 0x499   : > { %v3195_v21 = vpack.c.bf16 %v4606_v56, %v4601_v62  ;;  %v3327_v19 = vpack.c.bf16 %v4609_v42, %v4604_v15  ;;  %v5801_v18 = vpop.permute.xlu1 %1575  ;;  %v5838_v15 = vsel %vm1013_vm3, %v1051_v3, %v6563_v49 }
 0x49a   : > { %v1240_v16 = vmul.f32 %v5663_v9, %v5838_v15 }
 0x49b   : > { %4379 = vmatprep.mubr.msk.bf16.mxu0 %vm664_vm0, %v3195_v21  ;;  %4389 = vmatprep.mubr.msk.bf16.mxu1 %vm664_vm0, %v3327_v19  ;;  %v1485_v21 = vmul.f32 %v5748_v24, %v5312_v39 }
 0x49c   : > { %1068 = vrot.lane.b32.xlu0 %v4056_v59, %s4840_s27  ;;  %4380 = vmatmul.mubr.msk.bf16.gmra.mxu0 %vm664_vm0, %v3196_v45 }
 0x49d   : > { %4390 = vmatmul.mubr.msk.bf16.gmra.mxu1 %vm664_vm0, %v3328_v10  ;;  %v5815_v52 = vpop.permute.xlu1 %1365 }
 0x4a0   : > { %1413 = vperm.xlu0 %4496, %v4082_v23  }
 0x4a1   : > { %v5831_v17 = vpop.permute.xlu1 %1807 }
 0x4a4   : > { %1421 = vperm.xlu0 %4496, %v4084_v5  }
 0x4a8   : > { %1194 = vrot.lane.b32.xlu0 %v1177_v33, %s4840_s27 }
 0x4ac   : > { %1198 = vrot.lane.b32.xlu0 %v1179_v25, %s4840_s27  ;;  %v4111_v25 = vld [vmem:[%s6454_s3 + $0x1b] ss:$0 sm:$0xff] }
 0x4b0   : > { %1200 = vrot.lane.b32.xlu0 %v1180_v53, %s4840_s27 }
 0x4b4   : > { %1299 = vrot.lane.b32.xlu0 %v1283_v32, %s4841_s22  ;;  %v5882_v32 = vsel %vm1013_vm3, %v5775_v31, %v6564_v54 }
 0x4b5   : > { %v1045_v26 = vpop.permute.xlu0 %1044 }
 0x4b6   : > { %v5805_v0 = vsel %vm1013_vm3, %v1045_v26, %v5350_v55  ;;  %v4109_v55 = vld [vmem:[%s6454_s3 + $0x19] ss:$0 sm:$0xff]  ;;  %v6565_v26 = vld [vmem:[#allocation25_spill] sm:$0xff] }
 0x4b7   : > { %v1237_v30 = vmul.f32 %v5663_v9, %v5805_v0 }
 0x4b8   : > { %1303 = vrot.lane.b32.xlu0 %v1285_v46, %s4841_s22  ;;  %v1490_v46 = vmul.f32 %v5761_v11, %v6565_v26 }
 0x4b9   : > { %v1286_v41 = vmul.f32 %v5655_v61, %v1237_v30  ;;  %v5826_v61 = vsel %vm1013_vm3, %v5738_v36, %v5358_v57  ;;  %v5840_v36 = vpop.permute.xlu1 %1367  ;;  %v6566_v30 = vld [vmem:[#allocation23_spill] sm:$0xff] }
 0x4ba   : > { %v1239_v6 = vmul.f32 %v5663_v9, %v5826_v61 }
 0x4bb   : > { %1305 = vrot.lane.b32.xlu1 %v1286_v41, %s4841_s22  ;;  %v5889_v41 = vsel %vm1013_vm3, %v5789_v44, %v6566_v30 }
 0x4bc   : > { %1750 = vperm.xlu0 %4496, %v4108_v4   ;;  %v1534_v4 = vmul.f32 %v5882_v32, %v5663_v9 }
 0x4bd   : > { %v5852_v3 = vpop.permute.xlu1 %1815 }
 0x4bf   : > { %1754 = vperm.xlu1 %4497, %v4109_v55   ;;  %v1536_v55 = vmul.f32 %v5889_v41, %v5663_v9 }
 0x4c0   : > { %1204 = vrot.lane.b32.xlu0 %v1182_v1, %s4840_s27 }
 0x4c1   : > { %v5861_v59 = vpop.permute.xlu1 %1908 }
 0x4c2   : > { %v1277_v8 = vpop.permute.xlu0 %1276 }
 0x4c3   : > { %1206 = vrot.lane.b32.xlu1 %v1183_v12, %s4840_s27  ;;  %v1288_v13 = vmul.f32 %v1277_v8, %v1239_v6  ;;  %v1489_v12 = vmul.f32 %v5761_v11, %v6556_v63 }
 0x4c5   : > { %v5875_v53 = vpop.permute.xlu1 %1694 }
 0x4c6   : > { %v1047_v57 = vpop.permute.xlu0 %1046 }
 0x4c7   : > { %v5844_v62 = vsel %vm1013_vm3, %v1047_v57, %v5324_v47  ;;  %1309 = vrot.lane.b32.xlu1 %v1288_v13, %s4841_s22  ;;  %v4110_v47 = vld [vmem:[%s6454_s3 + $0x1a] ss:$0 sm:$0xff]  ;;  %v1585_v13 = vmul.f32 %v5770_v20, %v1536_v55 }
 0x4c8   : > { %v1238_v7 = vmul.f32 %v5663_v9, %v5844_v62 }
 0x4c9   : > { %v5898_v49 = vpop.permute.xlu1 %1698 }
 0x4ca   : > { %v1287_v42 = vmul.f32 %v1277_v8, %v1238_v7  ;;  %v1281_v56 = vpop.permute.xlu0 %1280 }
 0x4cb   : > { %v1289_v27 = vmul.f32 %v1281_v56, %v1240_v16 }
 0x4cc   : > { %1307 = vrot.lane.b32.xlu0 %v1287_v42, %s4841_s22 }
 0x4cd   : > { %1311 = vrot.lane.b32.xlu1 %v1289_v27, %s4841_s22  ;;  %v5921_v7 = vpop.permute.xlu1 %1912 }
 0x4ce   : > { %v1475_v60 = vpop.permute.xlu0 %1474 }
 0x4cf   : > { %v1487_v45 = vmul.f32 %v1475_v60, %v6554_v38 }
 0x4d0   : > { %1758 = vperm.xlu0 %4496, %v4110_v47  }
 0x4d1   : > { %1501 = vrot.lane.b32.xlu1 %v1485_v21, %s4840_s27 }
 0x4d2   : > { %v1053_v19 = vpop.permute.xlu0 %1052 }
 0x4d3   : > { %v5866_v10 = vsel %vm1013_vm3, %v1053_v19, %v5366_v58  ;;  %v1486_v58 = vmul.f32 %v5748_v24, %v6564_v54  ;;  %v1488_v24 = vmul.f32 %v1475_v60, %v6566_v30  ;;  %v1703_v60 = vpop.permute.xlu1 %1702  ;;  %v6567_v19 = vld [vmem:[#allocation26_spill] sm:$0xff] }
 0x4d4   : > { %v1241_v23 = vmul.f32 %v5663_v9, %v5866_v10 }
 0x4d5   : > { %1505 = vrot.lane.b32.xlu1 %v1487_v45, %s4840_s27 }
 0x4d6   : > { %v1290_v5 = vmul.f32 %v1281_v56, %v1241_v23  ;;  %v1568_v33 = vpop.permute.xlu0 %1567 }
 0x4d7   : > { %v1583_v1 = vmul.f32 %v1568_v33, %v1534_v4 }
 0x4d8   : > { %1313 = vrot.lane.b32.xlu0 %v1290_v5, %s4841_s22 }
 0x4d9   : > { %1762 = vperm.xlu1 %4497, %v4111_v25  }
 0x4da   : > { %v1356_v51 = vpop.permute.xlu0 %1355 }
 0x4db   : > { %v5902_v44 = vsel %vm1013_vm3, %v1356_v51, %v5312_v39  ;;  %v5918_v39 = vsel %vm1013_vm3, %v5815_v52, %v6565_v26 }
 0x4dc   : > { %1503 = vrot.lane.b32.xlu0 %v1486_v58, %s4840_s27  ;;  %v1533_v8 = vmul.f32 %v5902_v44, %v5663_v9 }
 0x4dd   : > { %1511 = vrot.lane.b32.xlu1 %v1490_v46, %s4840_s27 }
 0x4de   : > { %v1360_v31 = vpop.permute.xlu0 %1359  ;;  %v1582_v11 = vmul.f32 %v1568_v33, %v1533_v8  ;;  %v1705_v33 = vpop.permute.xlu1 %1704  ;;  %v1826_v8 = vmul.f32 %v5852_v3, %v6561_v48 }
 0x4df   : > { %v5913_v57 = vsel %vm1013_vm3, %v1360_v31, %v6554_v38  ;;  %v1538_v38 = vmul.f32 %v5918_v39, %v5663_v9 }
 0x4e0   : > { %1507 = vrot.lane.b32.xlu0 %v1488_v24, %s4840_s27  ;;  %v1535_v16 = vmul.f32 %v5913_v57, %v5663_v9 }
 0x4e1   : > { %1600 = vrot.lane.b32.xlu1 %v1583_v1, %s4841_s22  ;;  %v1587_v47 = vmul.f32 %v5801_v18, %v1538_v38 }
 0x4e2   : > { %v1483_v6 = vpop.permute.xlu0 %1482  ;;  %v1584_v52 = vmul.f32 %v5770_v20, %v1535_v16  ;;  %v5946_v20 = vsel %vm1013_vm3, %v5840_v36, %v6567_v19  ;;  %v5958_v30 = vpop.permute.xlu1 %1104 }
 0x4e3   : > { %v1492_v56 = vmul.f32 %v1483_v6, %v6558_v34  ;;  %v1491_v45 = vmul.f32 %v1483_v6, %v6567_v19  ;;  %v1539_v58 = vmul.f32 %v5946_v20, %v5663_v9  ;;  %v1827_v6 = vmul.f32 %v5852_v3, %v5433_v29 }
 0x4e4   : > { %1509 = vrot.lane.b32.xlu0 %v1489_v12, %s4840_s27 }
 0x4e5   : > { %1604 = vrot.lane.b32.xlu1 %v1585_v13, %s4841_s22 }
 0x4e6   : > { %v1364_v42 = vpop.permute.xlu0 %1363  ;;  %v5968_v24 = vpop.permute.xlu1 %1112 }
 0x4e7   : > { %v5935_v21 = vsel %vm1013_vm3, %v1364_v42, %v6556_v63 }
 0x4e8   : > { %1598 = vrot.lane.b32.xlu0 %v1582_v11, %s4841_s22  ;;  %v1537_v23 = vmul.f32 %v5935_v21, %v5663_v9 }
 0x4e9   : > { %1515 = vrot.lane.b32.xlu1 %v1492_v56, %s4840_s27 }
 0x4ea   : > { %v1580_v27 = vpop.permute.xlu0 %1579  ;;  %v1586_v63 = vmul.f32 %v5801_v18, %v1537_v23  ;;  %v1823_v18 = vmul.f32 %v5831_v17, %v5415_v2  ;;  %v5991_v16 = vpop.permute.xlu1 %1116 }
 0x4eb   : > { %v1588_v26 = vmul.f32 %v1580_v27, %v1539_v58 }
 0x4ec   : > { %1602 = vrot.lane.b32.xlu0 %v1584_v52, %s4841_s22 }
 0x4ed   : > { %1608 = vrot.lane.b32.xlu1 %v1587_v47, %s4841_s22 }
 0x4ee   : > { %v1812_v5 = vpop.permute.xlu0 %1811 }
 0x4ef   : > { %v1824_v31 = vmul.f32 %v1812_v5, %v6560_v37  ;;  %v1825_v55 = vmul.f32 %v1812_v5, %v5424_v22 }
 0x4f0   : > { %1513 = vrot.lane.b32.xlu0 %v1491_v45, %s4840_s27 }
 0x4f2   : > { %v1370_v25 = vpop.permute.xlu0 %1369 }
 0x4f3   : > { %v5951_v54 = vsel %vm1013_vm3, %v1370_v25, %v6558_v34  ;;  %v1822_v34 = vmul.f32 %v5831_v17, %v6559_v35  ;;  %v5979_v17 = vsel %vm1013_vm3, %v5875_v53, %v5415_v2 }
 0x4f4   : > { %v1540_v51 = vmul.f32 %v5951_v54, %v5663_v9  ;;  %1606 = vrot.lane.b32.xlu0 %v1586_v63, %s4841_s22  ;;  %v1871_v53 = vmul.f32 %v5979_v17, %v5663_v9 }
 0x4f6   : > { %v1589_v46 = vmul.f32 %v1580_v27, %v1540_v51  ;;  %v1905_v36 = vpop.permute.xlu0 %1904  ;;  %v6010_v27 = vsel %vm1013_vm3, %v1703_v60, %v5433_v29 }
 0x4f7   : > { %v1920_v42 = vmul.f32 %v1905_v36, %v1871_v53  ;;  %v1875_v45 = vmul.f32 %v6010_v27, %v5663_v9 }
 0x4f8   : > { %1612 = vrot.lane.b32.xlu1 %v1589_v46, %s4841_s22  ;;  %1610 = vrot.lane.b32.xlu0 %v1588_v26, %s4841_s22 }
 0x4f9   : > { %v1924_v25 = vmul.f32 %v5921_v7, %v1875_v45 }
 0x4fa   : > { %v1693_v4 = vpop.permute.xlu0 %1692 }
 0x4fb   : > { %v1708_v12 = vsel %vm1013_vm3, %v1693_v4, %v6559_v35  ;;  %v5989_v35 = vsel %vm1013_vm3, %v5898_v49, %v5424_v22 }
 0x4fc   : > { %1840 = vrot.lane.b32.xlu1 %v1823_v18, %s4840_s27  ;;  %1838 = vrot.lane.b32.xlu0 %v1822_v34, %s4840_s27  ;;  %v1870_v13 = vmul.f32 %v1708_v12, %v5663_v9  ;;  %v1873_v3 = vmul.f32 %v5989_v35, %v5663_v9 }
 0x4fe   : > { %v1697_v1 = vpop.permute.xlu0 %1696  ;;  %v1919_v38 = vmul.f32 %v1905_v36, %v1870_v13  ;;  %v1922_v56 = vmul.f32 %v5861_v59, %v1873_v3 }
 0x4ff   : > { %v1710_v2 = vsel %vm1013_vm3, %v1697_v1, %v6560_v37  ;;  %v6004_v37 = vpop.permute.xlu1 %1417 }
 0x500   : > { %1844 = vrot.lane.b32.xlu1 %v1825_v55, %s4840_s27  ;;  %1842 = vrot.lane.b32.xlu0 %v1824_v31, %s4840_s27  ;;  %v1872_v22 = vmul.f32 %v1710_v2, %v5663_v9 }
 0x502   : > { %v1820_v11 = vpop.permute.xlu0 %1819  ;;  %v1921_v52 = vmul.f32 %v5861_v59, %v1872_v22 }
 0x503   : > { %v1828_v23 = vmul.f32 %v1820_v11, %v5409_v14  ;;  %v1829_v5 = vmul.f32 %v1820_v11, %v6562_v50  ;;  %v1193_v63 = vpop.permute.xlu1 %1192 }
 0x504   : > { %1848 = vrot.lane.b32.xlu1 %v1827_v6, %s4840_s27  ;;  %1846 = vrot.lane.b32.xlu0 %v1826_v8, %s4840_s27 }
 0x506   : > { %v1701_v49 = vpop.permute.xlu0 %1700 }
 0x507   : > { %v1712_v47 = vsel %vm1013_vm3, %v1701_v49, %v6561_v48  ;;  %v6027_v48 = vsel %vm1013_vm3, %v1705_v33, %v5409_v14 }
 0x508   : > { %1937 = vrot.lane.b32.xlu1 %v1920_v42, %s4841_s22  ;;  %1935 = vrot.lane.b32.xlu0 %v1919_v38, %s4841_s22  ;;  %v1874_v59 = vmul.f32 %v1712_v47, %v5663_v9  ;;  %v1876_v46 = vmul.f32 %v6027_v48, %v5663_v9 }
 0x50a   : > { %v1923_v58 = vmul.f32 %v5921_v7, %v1874_v59 }
 0x50b   : > { %v1917_v19 = vpop.permute.xlu0 %1916 }
 0x50c   : > { %1941 = vrot.lane.b32.xlu1 %v1922_v56, %s4841_s22  ;;  %1939 = vrot.lane.b32.xlu0 %v1921_v52, %s4841_s22  ;;  %v1925_v36 = vmul.f32 %v1917_v19, %v1876_v46 }
 0x50f   : > { %v1707_v29 = vpop.permute.xlu0 %1706 }
 0x510   : > { %v1715_v60 = vsel %vm1013_vm3, %v1707_v29, %v6562_v50  ;;  %1852 = vrot.lane.b32.xlu1 %v1829_v5, %s4840_s27  ;;  %1850 = vrot.lane.b32.xlu0 %v1828_v23, %s4840_s27  ;;  %v1197_v50 = vpop.permute.xlu1 %1196 }
 0x511   : > { %v1877_v51 = vmul.f32 %v1715_v60, %v5663_v9 }
 0x513   : > { %v1109_v26 = vpop.permute.xlu0 %1108  ;;  %v1926_v34 = vmul.f32 %v1917_v19, %v1877_v51 }
 0x514   : > { %1945 = vrot.lane.b32.xlu1 %v1924_v25, %s4841_s22  ;;  %1943 = vrot.lane.b32.xlu0 %v1923_v58, %s4841_s22  ;;  %v6051_v55 = vpop.permute.xlu1 %1425 }
 0x517   : > { %v6036_v18 = vpop.permute.xlu0 %1068 }
 0x518   : > { %1949 = vrot.lane.b32.xlu1 %v1926_v34, %s4841_s22  ;;  %1947 = vrot.lane.b32.xlu0 %v1925_v36, %s4841_s22  ;;  %v1379_v14 = vmul.f32 %v5902_v44, %v6036_v18  ;;  %v1383_v7 = vmul.f32 %v5935_v21, %v6036_v18  ;;  %v1074_v9 = vmul.f32 %v6036_v18, %v5805_v0  ;;  %v1203_v42 = vpop.permute.xlu1 %1202  ;;  %s4842_s22 = smov 113  }
 0x519   : > { %v1380_v33 = vmul.f32 %v5882_v32, %v6036_v18  ;;  %v1073_v4 = vmul.f32 %v6036_v18, %v5795_v28  ;;  %v1716_v31 = vmul.f32 %v1708_v12, %v6036_v18  ;;  %v1718_v44 = vmul.f32 %v1710_v2, %v6036_v18 }
 0x51a   : > { %v1122_v8 = vmul.f32 %v1109_v26, %v1074_v9  ;;  %v1384_v0 = vmul.f32 %v5918_v39, %v6036_v18  ;;  %v1072_v32 = vmul.f32 %v6036_v18, %v5661_v40  ;;  %v6059_v11 = vmul.f32 %v1712_v47, %v6036_v18 }
 0x51b   : > { %v1414_v1 = vpop.permute.xlu0 %1413  ;;  %v1121_v21 = vmul.f32 %v1109_v26, %v1073_v4  ;;  %v1381_v12 = vmul.f32 %v5913_v57, %v6036_v18  ;;  %v6064_v2 = vmul.f32 %v1715_v60, %v6036_v18  ;;  %v1386_v38 = vmul.f32 %v5951_v54, %v6036_v18 }
 0x51c   : > { %v1428_v6 = vmul.f32 %v1414_v1, %v1379_v14  ;;  %v1429_v13 = vmul.f32 %v1414_v1, %v1380_v33  ;;  %v1120_v39 = vmul.f32 %v5958_v30, %v1072_v32  ;;  %v1302_v49 = vpop.permute.xlu1 %1301  ;;  %v1075_v52 = vmul.f32 %v6036_v18, %v5844_v62 }
 0x51d   : > { %v1071_v57 = vmul.f32 %v6036_v18, %v5783_v43  ;;  %v1382_v5 = vmul.f32 %v5889_v41, %v6036_v18  ;;  %v1218_v46 = vadd.f32 %v1197_v50, %v1121_v21  ;;  %v1717_v41 = vmul.f32 %v5979_v17, %v6036_v18 }
 0x51e   : > { %v1123_v23 = vmul.f32 %v5968_v24, %v1075_v52  ;;  %v1719_v4 = vmul.f32 %v5989_v35, %v6036_v18  ;;  %v1076_v50 = vmul.f32 %v6036_v18, %v5826_v61 }
 0x51f   : > { %v1422_v28 = vpop.permute.xlu0 %1421  ;;  %v1119_v54 = vmul.f32 %v5958_v30, %v1071_v57  ;;  %v1431_v62 = vmul.f32 %v6004_v37, %v1382_v5  ;;  %v1430_v30 = vmul.f32 %v6004_v37, %v1381_v12 }
 0x520   : > { %v1432_v53 = vmul.f32 %v1422_v28, %v1383_v7  ;;  %v1433_v3 = vmul.f32 %v1422_v28, %v1384_v0  ;;  %v1124_v17 = vmul.f32 %v5968_v24, %v1076_v50 }
 0x521   : > { %v1216_v58 = vadd.f32 %v1193_v63, %v1119_v54 }
 0x522   : > { %v1221_v0 = vadd.f32 %v1203_v42, %v1124_v17 }
 0x523   : > { %v1195_v22 = vpop.permute.xlu0 %1194 }
 0x524   : > { %v1217_v40 = vadd.f32 %v1195_v22, %v1120_v39  ;;  %v1721_v22 = vmul.f32 %v6010_v27, %v6036_v18 }
 0x526   : > { %v1324_v56 = vadd.f32 %v1302_v49, %v1217_v40 }
 0x527   : > { %v1199_v47 = vpop.permute.xlu0 %1198 }
 0x528   : > { %v1219_v19 = vadd.f32 %v1199_v47, %v1122_v8  ;;  %v6073_v45 = vadd.f32 %v1429_v13, %v1324_v56  ;;  %v1435_v47 = vmul.f32 %v6051_v55, %v1386_v38 }
 0x52b   : > { %v1201_v59 = vpop.permute.xlu0 %1200 }
 0x52c   : > { %v1220_v29 = vadd.f32 %v1201_v59, %v1123_v23 }
 0x52d   : > { %v1306_v60 = vpop.permute.xlu1 %1305 }
 0x52e   : > { %v1326_v25 = vadd.f32 %v1306_v60, %v1219_v19 }
 0x52f   : > { %v1300_v51 = vpop.permute.xlu0 %1299 }
 0x530   : > { %v1323_v43 = vadd.f32 %v1300_v51, %v1216_v58  ;;  %v6080_v26 = vadd.f32 %v1431_v62, %v1326_v25 }
 0x532   : > { %v1436_v36 = vadd.f32 %v1428_v6, %v1323_v43 }
 0x533   : > { %v1304_v34 = vpop.permute.xlu0 %1303 }
 0x534   : > { %v1325_v14 = vadd.f32 %v1304_v34, %v1218_v46 }
 0x536   : > { %v6085_v7 = vadd.f32 %v1430_v30, %v1325_v14 }
 0x537   : > { %v1751_v9 = vpop.permute.xlu0 %1750 }
 0x538   : > { %v6087_v33 = vmul.f32 %v1751_v9, %v1716_v31  ;;  %v1766_v63 = vmul.f32 %v1751_v9, %v1717_v41 }
 0x53a   : > { %v1755_v1 = vpop.permute.xlu1 %1754 }
 0x53b   : > { %v6093_v8 = vmul.f32 %v1755_v1, %v1718_v44  ;;  %v6095_v6 = vmul.f32 %v1755_v1, %v1719_v4  ;;  %v6097_v37 = vpop.permute.xlu0 %1204  ;;  %v1078_v44 = vmul.f32 %v6036_v18, %v5866_v10 }
 0x53d   : > { %v1126_v40 = vmul.f32 %v5991_v16, %v1078_v44 }
 0x53e   : > { %v1207_v13 = vpop.permute.xlu1 %1206 }
 0x53f   : > { %v1308_v21 = vpop.permute.xlu0 %1307 }
 0x540   : > { %v1327_v31 = vadd.f32 %v1308_v21, %v1220_v29 }
 0x542   : > { %v1310_v32 = vpop.permute.xlu1 %1309  ;;  %v6100_v28 = vadd.f32 %v1432_v53, %v1327_v31  ;;  %v1223_v53 = vadd.f32 %v1207_v13, %v1126_v40 }
 0x543   : > { %v1328_v35 = vadd.f32 %v1310_v32, %v1221_v0 }
 0x545   : > { %v6102_v12 = vadd.f32 %v1433_v3, %v1328_v35 }
 0x546   : > { %v6104_v61 = vpop.permute.xlu1 %1311 }
 0x54a   : > { %v1502_v39 = vpop.permute.xlu1 %1501 }
 0x54b   : > { %v6110_v24 = vpop.permute.xlu0 %1758  ;;  %v1525_v41 = vadd.f32 %v1502_v39, %v1436_v36 }
 0x54c   : > { %v6114_v42 = vmul.f32 %v6110_v24, %v1721_v22  ;;  %v4377_v49 = vpop.f32.mrf.mxu0 }
 0x54d   : > { %v4387_v3 = vpop.f32.mrf.mxu1 }
 0x54e   : > { %v1506_v52 = vpop.permute.xlu1 %1505  ;;  %v3383_v10 = vpop.f32.mrf.mxu0  ;;  %v6124_v46 = vsub.f32 %v4377_v49, %v4387_v3 }
 0x54f   : > { %v1314_v56 = vpop.permute.xlu0 %1313  ;;  %v3468_v23 = vpop.f32.mrf.mxu1 }
 0x550   : > { %v1330_v57 = vadd.f32 %v1314_v56, %v1223_v53  ;;  %v4378_v5 = vpop.f32.mrf.mxu0  ;;  %v6121_v25 = vsub.f32 %v3383_v10, %v3468_v23  ;;  %v3523_v31 = vsel %vm664_vm0, %v6124_v46, 0.0  ;;  %v1527_v53 = vadd.f32 %v1506_v52, %v6085_v7 }
 0x551   : > { %v4388_v59 = vpop.f32.mrf.mxu1 }
 0x552   : > { %v6117_v19 = vadd.f32 %v1435_v47, %v1330_v57  ;;  %v3386_v58 = vpop.f32.mrf.mxu0  ;;  %v3522_v9 = vsel %vm664_vm0, %v6121_v25, 0.0  ;;  %v6130_v1 = vsub.f32 %v4378_v5, %v4388_v59 }
 0x553   : > { %v1504_v27 = vpop.permute.xlu0 %1503  ;;  %v3471_v62 = vpop.f32.mrf.mxu1  ;;  %v3524_v39 = vadd.f32 %v3523_v31, %v3522_v9 }
 0x554   : > { %v6119_v54 = vpop.permute.xlu1 %1762  ;;  %v1526_v51 = vadd.f32 %v1504_v27, %v6073_v45  ;;  %v6128_v4 = vsub.f32 %v3386_v58, %v3471_v62  ;;  %v3530_v56 = vsel %vm664_vm0, %v6130_v1, 0.0 }
 0x557   : > { %v1508_v29 = vpop.permute.xlu0 %1507 }
 0x558   : > { %v1512_v60 = vpop.permute.xlu1 %1511  ;;  %v1528_v17 = vadd.f32 %v1508_v29, %v6080_v26  ;;  %v3529_v26 = vsel %vm664_vm0, %v6128_v4, 0.0 }
 0x559   : > { %v3531_v29 = vadd.f32 %v3530_v56, %v3529_v26 }
 0x55b   : > { %v1510_v43 = vpop.permute.xlu0 %1509 }
 0x55c   : > { %v4381_v38 = vpop.f32.mrf.mxu0  ;;  %v1601_v34 = vpop.permute.xlu1 %1600  ;;  %v1529_v9 = vadd.f32 %v1510_v43, %v6100_v28 }
 0x55d   : > { %v4391_v14 = vpop.f32.mrf.mxu1  ;;  %v1623_v30 = vadd.f32 %v1601_v34, %v1526_v51  ;;  %v1530_v51 = vadd.f32 %v1512_v60, %v6102_v12  ;;  %v1769_v12 = vmul.f32 %v6110_v24, %v6059_v11 }
 0x55e   : > { %v3399_v50 = vpop.f32.mrf.mxu0  ;;  %v6137_v0 = vsub.f32 %v4381_v38, %v4391_v14 }
 0x55f   : > { %v3484_v13 = vpop.f32.mrf.mxu1  ;;  %v1599_v45 = vpop.permute.xlu0 %1598  ;;  %v6133_v21 = vadd.f32 %v1766_v63, %v1623_v30 }
 0x560   : > { %v6139_v36 = vsub.f32 %v3399_v50, %v3484_v13  ;;  %v1622_v32 = vadd.f32 %v1599_v45, %v1525_v41  ;;  %v4382_v35 = vpop.f32.mrf.mxu0  ;;  %v1605_v44 = vpop.permute.xlu1 %1604  ;;  %v3527_v7 = vsel %vm664_vm0, %v6137_v0, 0.0  ;;  %v1772_v45 = vmul.f32 %v6119_v54, %v6064_v2 }
 0x561   : > { %v4392_v22 = vpop.f32.mrf.mxu1  ;;  %v1625_v40 = vadd.f32 %v1605_v44, %v1528_v17 }
 0x562   : > { %v3525_v63 = vsel %vm664_vm0, %v6139_v36, 0.0  ;;  %v3402_v49 = vpop.f32.mrf.mxu0  ;;  %v1773_v3 = vadd.f32 %v6087_v33, %v1622_v32  ;;  %v6152_v52 = vsub.f32 %v4382_v35, %v4392_v22 }
 0x563   : > { %v3526_v57 = vadd.f32 %v3525_v63, %v3524_v39  ;;  %v3487_v47 = vpop.f32.mrf.mxu1  ;;  %v1603_v10 = vpop.permute.xlu0 %1602  ;;  %v1776_v23 = vadd.f32 %v6095_v6, %v1625_v40  ;;  %v1385_v63 = vmul.f32 %v5946_v20, %v6036_v18 }
 0x564   : > { %v6154_v27 = vsub.f32 %v3402_v49, %v3487_v47  ;;  %v1624_v5 = vadd.f32 %v1603_v10, %v1527_v53  ;;  %v1516_v59 = vpop.permute.xlu1 %1515  ;;  %v3534_v34 = vsel %vm664_vm0, %v6152_v52, 0.0 }
 0x565   : > { %v3528_v58 = vadd.f32 %v3527_v7, %v3526_v57  ;;  %v1532_v50 = vadd.f32 %v1516_v59, %v6117_v19  ;;  %v1434_v47 = vmul.f32 %v6051_v55, %v1385_v63 }
 0x566   : > { %v3532_v33 = vsel %vm664_vm0, %v6154_v27, 0.0  ;;  %v1775_v62 = vadd.f32 %v6093_v8, %v1624_v5 }
 0x567   : > { %v3533_v38 = vadd.f32 %v3532_v33, %v3531_v29  ;;  %3538 = vrot.lane.b32.xlu0 %v3528_v58, %s4840_s27  ;;  %v1514_v6 = vpop.permute.xlu0 %1513 }
 0x568   : > { %v1609_v14 = vpop.permute.xlu1 %1608 }
 0x569   : > { %v3535_v30 = vadd.f32 %v3534_v34, %v3533_v38  ;;  %v1627_v41 = vadd.f32 %v1609_v14, %v1530_v51 }
 0x56b   : > { %3540 = vrot.lane.b32.xlu1 %v3535_v30, %s4840_s27  ;;  %v1607_v17 = vpop.permute.xlu0 %1606  ;;  %v1778_v8 = vadd.f32 %v6114_v42, %v1627_v41  ;;  %v1077_v42 = vmul.f32 %v6036_v18, %v5838_v15  ;;  %v1722_v15 = vmul.f32 %v6027_v48, %v6036_v18 }
 0x56c   : > { %v1626_v60 = vadd.f32 %v1607_v17, %v1529_v9  ;;  %v1613_v13 = vpop.permute.xlu1 %1612 }
 0x56d   : > { %v1629_v31 = vadd.f32 %v1613_v13, %v1532_v50  ;;  %v1125_v26 = vmul.f32 %v5991_v16, %v1077_v42  ;;  %v1771_v16 = vmul.f32 %v6119_v54, %v1722_v15 }
 0x56e   : > { %v1777_v32 = vadd.f32 %v1769_v12, %v1626_v60 }
 0x56f   : > { %v1780_v35 = vadd.f32 %v1772_v45, %v1629_v31  ;;  %v1611_v44 = vpop.permute.xlu0 %1610  ;;  %v1222_v2 = vadd.f32 %v6097_v37, %v1125_v26 }
 0x570   : > { %v1841_v43 = vpop.permute.xlu1 %1840 }
 0x571   : > { %v1329_v56 = vadd.f32 %v6104_v61, %v1222_v2  ;;  %v1863_v30 = vadd.f32 %v1841_v43, %v6133_v21 }
 0x573   : > { %v1839_v28 = vpop.permute.xlu0 %1838  ;;  %v1442_v10 = vadd.f32 %v1434_v47, %v1329_v56 }
 0x574   : > { %v1845_v39 = vpop.permute.xlu1 %1844  ;;  %v1862_v33 = vadd.f32 %v1839_v28, %v1773_v3 }
 0x575   : > { %v1531_v5 = vadd.f32 %v1514_v6, %v1442_v10  ;;  %v1865_v34 = vadd.f32 %v1845_v39, %v1776_v23 }
 0x577   : > { %v1843_v19 = vpop.permute.xlu0 %1842  ;;  %v1628_v29 = vadd.f32 %v1611_v44, %v1531_v5 }
 0x578   : > { %v1849_v40 = vpop.permute.xlu1 %1848  ;;  %v1864_v37 = vadd.f32 %v1843_v19, %v1775_v62 }
 0x579   : > { %v1779_v61 = vadd.f32 %v1771_v16, %v1628_v29  ;;  %v1867_v48 = vadd.f32 %v1849_v40, %v1778_v8 }
 0x57b   : > { %v1847_v22 = vpop.permute.xlu0 %1846 }
 0x57c   : > { %v1938_v11 = vpop.permute.xlu1 %1937  ;;  %v1866_v20 = vadd.f32 %v1847_v22, %v1777_v32 }
 0x57d   : > { %v6195_v62 = vadd.f32 %v1938_v11, %v1863_v30 }
 0x57f   : > { %v1936_v53 = vpop.permute.xlu0 %1935  ;;  %v3515_v45 = vsel %vm3507_vm4, %v6195_v62, 0.0 }
 0x580   : > { %v1942_v49 = vpop.permute.xlu1 %1941  ;;  %v6184_v55 = vadd.f32 %v1936_v53, %v1862_v33 }
 0x581   : > { %v6189_v18 = vadd.f32 %v1942_v49, %v1865_v34  ;;  %v4182_v34 = vld [vmem:[%s6465_s14] ss:$0 sm:$0xff] }
 0x582   : > { %v3508_v23 = vsel %vm3507_vm4, %v6184_v55, 0.0 }
 0x583   : > { %v1940_v24 = vpop.permute.xlu0 %1939  ;;  %v3516_v8 = vsel %vm3507_vm4, %v6189_v18, 0.0 }
 0x584   : > { %v1853_v7 = vpop.permute.xlu1 %1852  ;;  %v6182_v51 = vadd.f32 %v1940_v24, %v1864_v37  ;;  %v3517_v32 = vadd.f32 %v3516_v8, %v3515_v45  ;;  %v4189_v8 = vld [vmem:[%s6466_s15 + $0x3] ss:$0 sm:$0xff]  ;;  %v4194_v45 = vld [vmem:[%s6468_s17] ss:$0 sm:$0xff] }
 0x585   : > { %v1869_v9 = vadd.f32 %v1853_v7, %v1780_v35 }
 0x586   : > { %v3509_v54 = vsel %vm3507_vm4, %v6182_v51, 0.0 }
 0x587   : > { %v1851_v57 = vpop.permute.xlu0 %1850  ;;  %v3510_v17 = vadd.f32 %v3509_v54, %v3508_v23  ;;  %v4183_v54 = vld [vmem:[%s6465_s14 + $0x1] ss:$0 sm:$0xff]  ;;  %v4185_v23 = vld [vmem:[%s6465_s14 + $0x3] ss:$0 sm:$0xff] }
 0x588   : > { %v1946_v58 = vpop.permute.xlu1 %1945  ;;  %v1868_v14 = vadd.f32 %v1851_v57, %v1779_v61 }
 0x589   : > { %v6199_v50 = vadd.f32 %v1946_v58, %v1867_v48  ;;  %v4184_v48 = vld [vmem:[%s6465_s14 + $0x2] ss:$0 sm:$0xff] }
 0x58b   : > { %v1944_v59 = vpop.permute.xlu0 %1943  ;;  %v3518_v31 = vsel %vm3507_vm4, %v6199_v50, 0.0 }
 0x58c   : > { %v6186_v6 = vadd.f32 %v1944_v59, %v1866_v20  ;;  %v1950_v41 = vpop.permute.xlu1 %1949  ;;  %v3519_v43 = vadd.f32 %v3518_v31, %v3517_v32  ;;  %v4193_v31 = vld [vmem:[%s6467_s16 + $0x3] ss:$0 sm:$0xff]  ;;  %v4196_v32 = vld [vmem:[%s6468_s17 + $0x2] ss:$0 sm:$0xff] }
 0x58d   : > { %v6205_v12 = vadd.f32 %v1950_v41, %v1869_v9  ;;  %v4186_v41 = vld [vmem:[%s6466_s15] ss:$0 sm:$0xff]  ;;  %v4188_v9 = vld [vmem:[%s6466_s15 + $0x2] ss:$0 sm:$0xff] }
 0x58e   : > { %v3511_v21 = vsel %vm3507_vm4, %v6186_v6, 0.0 }
 0x58f   : > { %v1948_v38 = vpop.permute.xlu0 %1947  ;;  %v3512_v13 = vadd.f32 %v3511_v21, %v3510_v17  ;;  %v3520_v44 = vsel %vm3507_vm4, %v6205_v12, 0.0  ;;  %v4187_v21 = vld [vmem:[%s6466_s15 + $0x1] ss:$0 sm:$0xff]  ;;  %v4190_v17 = vld [vmem:[%s6467_s16] ss:$0 sm:$0xff] }
 0x590   : > { %v6193_v3 = vadd.f32 %v1948_v38, %v1868_v14  ;;  %v3521_v22 = vadd.f32 %v3520_v44, %v3519_v43  ;;  %v4197_v44 = vld [vmem:[%s6468_s17 + $0x3] ss:$0 sm:$0xff] }
 0x592   : > { %v3513_v60 = vsel %vm3507_vm4, %v6193_v3, 0.0 }
 0x593   : > { %v3514_v35 = vadd.f32 %v3513_v60, %v3512_v13  ;;  %v4192_v60 = vld [vmem:[%s6467_s16 + $0x2] ss:$0 sm:$0xff]  ;;  %v4191_v13 = vld [vmem:[%s6467_s16 + $0x1] ss:$0 sm:$0xff] }
 0x5d9   : > { %v3539_v28 = vpop.permute.xlu0 %3538 }
 0x5da   : > { %v3544_v19 = vadd.f32 %v3539_v28, %v3514_v35  ;;  %v4195_v35 = vld [vmem:[%s6468_s17 + $0x1] ss:$0 sm:$0xff] }
 0x5dc   : > { %v6215_v39 = vmul.f32 0.125, %v3544_v19 }
 0x5dd   : > { %v3541_v40 = vpop.permute.xlu1 %3540 }
 0x5de   : > { %v3545_v53 = vadd.f32 %v3541_v40, %v3521_v22  ;;  %3558 = vrot.lane.b32.xlu0 %v6215_v39, %s4842_s22  ;;  %v3548_v28 = vsub.f32 %v6184_v55, %v6215_v39  ;;  %v3550_v43 = vsub.f32 %v6182_v51, %v6215_v39  ;;  %v3554_v51 = vsub.f32 %v6193_v3, %v6215_v39 }
 0x5e0   : > { %v6219_v42 = vmul.f32 0.125, %v3545_v53  ;;  %v3572_v19 = vmul.f32 %v3548_v28, %v3548_v28  ;;  %v3574_v22 = vmul.f32 %v3550_v43, %v3550_v43 }
 0x5e2   : > { %3560 = vrot.lane.b32.xlu1 %v6219_v42, %s4842_s22  ;;  %v3549_v40 = vsub.f32 %v6195_v62, %v6219_v42  ;;  %v3551_v53 = vsub.f32 %v6189_v18, %v6219_v42  ;;  %v3553_v62 = vsub.f32 %v6199_v50, %v6219_v42 }
 0x5e4   : > { %v3575_v55 = vmul.f32 %v3551_v53, %v3551_v53 }
 0x5e6   : > { %v3588_v18 = vsel %vm3507_vm4, %v3575_v55, 0.0 }
 0x650   : > { %v3559_v11 = vpop.permute.xlu0 %3558 }
 0x651   : > { %v6224_v24 = vsub.f32 %v6121_v25, %v3559_v11  ;;  %v6227_v26 = vsub.f32 %v6124_v46, %v3559_v11  ;;  %v6230_v2 = vsub.f32 %v6139_v36, %v3559_v11  ;;  %v6233_v63 = vsub.f32 %v6137_v0, %v3559_v11 }
 0x652   : > { %v3552_v11 = vsub.f32 %v6186_v6, %v6215_v39 }
 0x653   : > { %v3594_v49 = vmul.f32 %v6224_v24, %v6224_v24  ;;  %v3596_v56 = vmul.f32 %v6227_v26, %v6227_v26  ;;  %v3598_v57 = vmul.f32 %v6230_v2, %v6230_v2  ;;  %v3600_v46 = vmul.f32 %v6233_v63, %v6233_v63 }
 0x654   : > { %v3561_v25 = vpop.permute.xlu1 %3560 }
 0x655   : > { %v3602_v47 = vsel %vm664_vm0, %v3594_v49, 0.0  ;;  %v3603_v36 = vsel %vm664_vm0, %v3596_v56, 0.0  ;;  %v6246_v0 = vsub.f32 %v6128_v4, %v3561_v25  ;;  %v6249_v7 = vsub.f32 %v6130_v1, %v3561_v25 }
 0x656   : > { %v3604_v10 = vadd.f32 %v3603_v36, %v3602_v47  ;;  %v6252_v5 = vsub.f32 %v6154_v27, %v3561_v25  ;;  %v6255_v59 = vsub.f32 %v6152_v52, %v3561_v25  ;;  %v3605_v15 = vsel %vm664_vm0, %v3598_v57, 0.0 }
 0x657   : > { %v3595_v29 = vmul.f32 %v6246_v0, %v6246_v0  ;;  %v3597_v16 = vmul.f32 %v6249_v7, %v6249_v7  ;;  %v3607_v27 = vsel %vm664_vm0, %v3600_v46, 0.0  ;;  %v3580_v49 = vsel %vm3507_vm4, %v3572_v19, 0.0 }
 0x658   : > { %v3599_v4 = vmul.f32 %v6252_v5, %v6252_v5  ;;  %v3606_v37 = vadd.f32 %v3605_v15, %v3604_v10  ;;  %v3601_v52 = vmul.f32 %v6255_v59, %v6255_v59  ;;  %v3581_v56 = vsel %vm3507_vm4, %v3574_v22, 0.0 }
 0x659   : > { %v3609_v1 = vsel %vm664_vm0, %v3595_v29, 0.0  ;;  %v3610_v58 = vsel %vm664_vm0, %v3597_v16, 0.0  ;;  %v3573_v57 = vmul.f32 %v3549_v40, %v3549_v40  ;;  %v3576_v25 = vmul.f32 %v3552_v11, %v3552_v11 }
 0x65a   : > { %v3608_v33 = vadd.f32 %v3607_v27, %v3606_v37  ;;  %v3611_v20 = vadd.f32 %v3610_v58, %v3609_v1  ;;  %v3612_v61 = vsel %vm664_vm0, %v3599_v4, 0.0  ;;  %v3614_v14 = vsel %vm664_vm0, %v3601_v52, 0.0 }
 0x65b   : > { %v3582_v46 = vadd.f32 %v3581_v56, %v3580_v49  ;;  %v3587_v47 = vsel %vm3507_vm4, %v3573_v57, 0.0  ;;  %v3578_v36 = vmul.f32 %v3554_v51, %v3554_v51  ;;  %v3583_v6 = vsel %vm3507_vm4, %v3576_v25, 0.0 }
 0x65c   : > { %3618 = vrot.lane.b32.xlu0 %v3608_v33, %s4840_s27  ;;  %v3613_v38 = vadd.f32 %v3612_v61, %v3611_v20  ;;  %v3555_v15 = vsub.f32 %v6205_v12, %v6219_v42  ;;  %v3577_v29 = vmul.f32 %v3553_v62, %v3553_v62  ;;  %v3589_v16 = vadd.f32 %v3588_v18, %v3587_v47 }
 0x65d   : > { %v3584_v10 = vadd.f32 %v3583_v6, %v3582_v46  ;;  %v3585_v3 = vsel %vm3507_vm4, %v3578_v36, 0.0 }
 0x65e   : > { %v3615_v30 = vadd.f32 %v3614_v14, %v3613_v38  ;;  %v3579_v4 = vmul.f32 %v3555_v15, %v3555_v15  ;;  %v3590_v37 = vsel %vm3507_vm4, %v3577_v29, 0.0 }
 0x65f   : > { %v3586_v39 = vadd.f32 %v3585_v3, %v3584_v10  ;;  %v3591_v1 = vadd.f32 %v3590_v37, %v3589_v16 }
 0x660   : > { %3665 = vperm.xlu0 %4496, %v4182_v34   ;;  %3620 = vrot.lane.b32.xlu1 %v3615_v30, %s4840_s27  ;;  %v3592_v58 = vsel %vm3507_vm4, %v3579_v4, 0.0  ;;  %s4212_s27 = sshll.u32 %s4962_s0, 11  ;;  %s6411_s0 = scalar_lea.sflag [#allocation4], %s639_s9 }
 0x661   : > { %v3593_v33 = vadd.f32 %v3592_v58, %v3591_v1  ;;  %s6403_s21 = scalar_lea.hbm %s6568_s25, %s4212_s27 }
 0x664   : > { %3673 = vperm.xlu0 %4496, %v4184_v48   ;;  %3669 = vperm.xlu1 %4497, %v4183_v54  }
 0x668   : > { %3713 = vperm.xlu0 %4496, %v4186_v41   ;;  %3677 = vperm.xlu1 %4497, %v4185_v23  }
 0x66c   : > { %3721 = vperm.xlu0 %4496, %v4188_v9   ;;  %3717 = vperm.xlu1 %4497, %v4187_v21  }
 0x670   : > { %3817 = vperm.xlu0 %4496, %v4190_v17   ;;  %3725 = vperm.xlu1 %4497, %v4189_v8  }
 0x674   : > { %3825 = vperm.xlu0 %4496, %v4192_v60   ;;  %3821 = vperm.xlu1 %4497, %v4191_v13  }
 0x678   : > { %3865 = vperm.xlu0 %4496, %v4194_v45   ;;  %3829 = vperm.xlu1 %4497, %v4193_v31  }
 0x67c   : > { %3873 = vperm.xlu0 %4496, %v4196_v32   ;;  %3869 = vperm.xlu1 %4497, %v4195_v35  }
 0x680   : > { %3877 = vperm.xlu1 %4497, %v4197_v44  }
 0x6ce   : > { %v3619_v50 = vpop.permute.xlu0 %3618 }
 0x6cf   : > { %v3624_v27 = vadd.f32 %v3619_v50, %v3586_v39 }
 0x6d1   : > { %v3626_v52 = vmul.f32 0.125, %v3624_v27 }
 0x6d2   : > { %v3621_v61 = vpop.permute.xlu1 %3620 }
 0x6d3   : > { %v3628_v20 = vadd.f32 1e-06, %v3626_v52  ;;  %v3625_v38 = vadd.f32 %v3621_v61, %v3593_v33 }
 0x6d5   : > { %4620 = vrsqrt.f32 %v3628_v20  ;;  %v3627_v12 = vmul.f32 0.125, %v3625_v38 }
 0x6d7   : > { %v3629_v42 = vadd.f32 1e-06, %v3627_v12 }
 0x6d9   : > { %4622 = vrsqrt.f32 %v3629_v42 }
 0x6db   : > { %v3666_v34 = vpop.permute.xlu0 %3665 }
 0x6df   : > { %v3670_v14 = vpop.permute.xlu1 %3669  ;;  %v3674_v30 = vpop.permute.xlu0 %3673 }
 0x6e2   : > { %v4621_v48 = vpop.eup %4620 }
 0x6e3   : > { %v3636_v54 = vmul.f32 %v4621_v48, %v3548_v28  ;;  %v3638_v41 = vmul.f32 %v4621_v48, %v3550_v43  ;;  %3782 = vrot.lane.b32.xlu0 %v4621_v48, %s4842_s22  ;;  %v3678_v23 = vpop.permute.xlu1 %3677  ;;  %v3714_v21 = vpop.permute.xlu0 %3713  ;;  %v3640_v60 = vmul.f32 %v4621_v48, %v3552_v11  ;;  %v3642_v56 = vmul.f32 %v4621_v48, %v3554_v51 }
 0x6e5   : > { %v3680_v9 = vmul.f32 %v3666_v34, %v3636_v54  ;;  %v3682_v8 = vmul.f32 %v3670_v14, %v3638_v41  ;;  %v3684_v44 = vmul.f32 %v3674_v30, %v3640_v60  ;;  %v3686_v25 = vmul.f32 %v3678_v23, %v3642_v56 }
 0x6e6   : > { %v4623_v17 = vpop.eup %4622 }
 0x6e7   : > { %v3728_v13 = vadd.f32 %v3714_v21, %v3680_v9  ;;  %v3637_v45 = vmul.f32 %v4623_v17, %v3549_v40  ;;  %v3639_v31 = vmul.f32 %v4623_v17, %v3551_v53  ;;  %v3718_v32 = vpop.permute.xlu1 %3717  ;;  %3784 = vrot.lane.b32.xlu1 %v4623_v17, %s4842_s22  ;;  %v3641_v19 = vmul.f32 %v4623_v17, %v3553_v62  ;;  %v3722_v49 = vpop.permute.xlu0 %3721 }
 0x6e8   : > { %v3730_v28 = vadd.f32 %v3718_v32, %v3682_v8  ;;  %v3732_v11 = vadd.f32 %v3722_v49, %v3684_v44  ;;  %v3643_v53 = vmul.f32 %v4623_v17, %v3555_v15 }
 0x6e9   : > { %3744 = vrot.lane.b32.xlu0 %v3728_v13, %s4842_s22  ;;  %v3681_v35 = vmul.f32 %v3666_v34, %v3637_v45  ;;  %v3683_v43 = vmul.f32 %v3670_v14, %v3639_v31  ;;  %v3685_v40 = vmul.f32 %v3674_v30, %v3641_v19 }
 0x6ea   : > { %v3687_v62 = vmul.f32 %v3678_v23, %v3643_v53 }
 0x6eb   : > { %v3729_v22 = vadd.f32 %v3714_v21, %v3681_v35  ;;  %v3731_v57 = vadd.f32 %v3718_v32, %v3683_v43  ;;  %v3726_v55 = vpop.permute.xlu1 %3725  ;;  %v3733_v47 = vadd.f32 %v3722_v49, %v3685_v40  ;;  %v3818_v18 = vpop.permute.xlu0 %3817 }
 0x6ec   : > { %v3734_v46 = vadd.f32 %v3726_v55, %v3686_v25  ;;  %v3735_v51 = vadd.f32 %v3726_v55, %v3687_v62 }
 0x6ed   : > { %3748 = vrot.lane.b32.xlu0 %v3730_v28, %s4842_s22  ;;  %3746 = vrot.lane.b32.xlu1 %v3729_v22, %s4842_s22 }
 0x6ef   : > { %v3822_v36 = vpop.permute.xlu1 %3821  ;;  %v3826_v6 = vpop.permute.xlu0 %3825 }
 0x6f1   : > { %3752 = vrot.lane.b32.xlu0 %v3732_v11, %s4842_s22  ;;  %3750 = vrot.lane.b32.xlu1 %v3731_v57, %s4842_s22 }
 0x6f3   : > { %v3830_v10 = vpop.permute.xlu1 %3829  ;;  %v3866_v15 = vpop.permute.xlu0 %3865 }
 0x6f5   : > { %3756 = vrot.lane.b32.xlu0 %v3734_v46, %s4842_s22  ;;  %3754 = vrot.lane.b32.xlu1 %v3733_v47, %s4842_s22 }
 0x6f7   : > { %v3870_v29 = vpop.permute.xlu1 %3869  ;;  %v3874_v16 = vpop.permute.xlu0 %3873 }
 0x6f9   : > { %3758 = vrot.lane.b32.xlu1 %v3735_v51, %s4842_s22  ;;  %s6366_s22 = scalar_lea.vmem [#allocation11], %s4037_s1 }
 0x6fa   : > { %s3911_s23 = sshll.u32 %s6366_s22, 4  ;;  %s6405_s23 = int_to_ptr.vmem [resolvable:$true] %s3911_s23 }
 0x6fb   : > { %v3878_v39 = vpop.permute.xlu1 %3877  ;;  %s4754_s30 = scalar_lea.vmem %s6405_s23, 2048  ;;  %p4761_p11 = scmp.lt.s32.totalorder %s6405_s23, %s4759_s11 }
 0x6fc   : > { %p4755_p7 = scmp.ne.s32.totalorder %s6405_s23, %s4754_s30  ;;  %p4762_p3 = scmp.lt.s32.totalorder %s4760_s26, %s4754_s30 }
 0x6fe   : > { %p4756_p8 = pnand %p4755_p7, %p4979_p5  ;;  %p4763_p13 = por %p4762_p3, %p4761_p11 }
 0x700   : > { %p4757_p0 = pneg %p4756_p8 }
 0x702   : > { %p4764_p1 = pnand %p4763_p13, %p4757_p0 }
 0x755   : > { %v3783_v3 = vpop.permute.xlu0 %3782 }
 0x756   : > { %v3788_v4 = vmul.f32 %v3783_v3, %v6224_v24  ;;  %v3790_v37 = vmul.f32 %v3783_v3, %v6227_v26  ;;  %v3792_v50 = vmul.f32 %v3783_v3, %v6230_v2  ;;  %v3794_v1 = vmul.f32 %v3783_v3, %v6233_v63 }
 0x758   : > { %v3832_v27 = vmul.f32 %v3818_v18, %v3788_v4  ;;  %v3834_v52 = vmul.f32 %v3822_v36, %v3790_v37  ;;  %v3836_v58 = vmul.f32 %v3826_v6, %v3792_v50  ;;  %v3838_v33 = vmul.f32 %v3830_v10, %v3794_v1 }
 0x759   : > { %v3785_v42 = vpop.permute.xlu1 %3784 }
 0x75a   : > { %v3880_v20 = vadd.f32 %v3866_v15, %v3832_v27  ;;  %v3882_v61 = vadd.f32 %v3870_v29, %v3834_v52  ;;  %v3884_v38 = vadd.f32 %v3874_v16, %v3836_v58  ;;  %v3886_v12 = vadd.f32 %v3878_v39, %v3838_v33 }
 0x75b   : > { %v3789_v34 = vmul.f32 %v3785_v42, %v6246_v0  ;;  %v3791_v14 = vmul.f32 %v3785_v42, %v6249_v7  ;;  %v3793_v24 = vmul.f32 %v3785_v42, %v6252_v5  ;;  %v3795_v26 = vmul.f32 %v3785_v42, %v6255_v59  ;;  %v3745_v2 = vpop.permute.xlu0 %3744 }
 0x75c   : > { %4198 = vst.msk [vmem:[%s6366_s22 + $0x10] sm:$0xff] %vm664_vm0, %v3880_v20  ;;  %4200 = vst.msk [vmem:[%s6366_s22 + $0x30] sm:$0xff] %vm664_vm0, %v3882_v61 }
 0x75d   : > { %4202 = vst.msk [vmem:[%s6366_s22 + $0x50] sm:$0xff] %vm664_vm0, %v3884_v38  ;;  %4204 = vst.msk [vmem:[%s6366_s22 + $0x70] sm:$0xff] %vm664_vm0, %v3886_v12  ;;  %v3833_v63 = vmul.f32 %v3818_v18, %v3789_v34  ;;  %v3835_v0 = vmul.f32 %v3822_v36, %v3791_v14  ;;  %v3837_v7 = vmul.f32 %v3826_v6, %v3793_v24 }
 0x75e   : > { %3768 = vst.msk [vmem:[%s6366_s22] sm:$0xff] %vm664_vm0, %v3745_v2  ;;  %v3839_v5 = vmul.f32 %v3830_v10, %v3795_v26 }
 0x75f   : > { %v3881_v59 = vadd.f32 %v3866_v15, %v3833_v63  ;;  %v3883_v30 = vadd.f32 %v3870_v29, %v3835_v0  ;;  %v3885_v48 = vadd.f32 %v3874_v16, %v3837_v7  ;;  %v3749_v41 = vpop.permute.xlu0 %3748  ;;  %v3747_v23 = vpop.permute.xlu1 %3746 }
 0x760   : > { %v3887_v54 = vadd.f32 %v3878_v39, %v3839_v5  ;;  %3770 = vst.msk [vmem:[%s6366_s22 + $0x20] sm:$0xff] %vm664_vm0, %v3749_v41  ;;  %3769 = vst.msk [vmem:[%s6366_s22 + $0x8] sm:$0xff] %vm664_vm0, %v3747_v23 }
 0x761   : > { %4199 = vst.msk [vmem:[%s6366_s22 + $0x18] sm:$0xff] %vm664_vm0, %v3881_v59  ;;  %4201 = vst.msk [vmem:[%s6366_s22 + $0x38] sm:$0xff] %vm664_vm0, %v3883_v30 }
 0x762   : > { %4203 = vst.msk [vmem:[%s6366_s22 + $0x58] sm:$0xff] %vm664_vm0, %v3885_v48  ;;  %4205 = vst.msk [vmem:[%s6366_s22 + $0x78] sm:$0xff] %vm664_vm0, %v3887_v54 }
 0x763   : > { %v3753_v9 = vpop.permute.xlu0 %3752  ;;  %v3751_v21 = vpop.permute.xlu1 %3750 }
 0x764   : > { %3772 = vst.msk [vmem:[%s6366_s22 + $0x40] sm:$0xff] %vm664_vm0, %v3753_v9  ;;  %3771 = vst.msk [vmem:[%s6366_s22 + $0x28] sm:$0xff] %vm664_vm0, %v3751_v21 }
 0x767   : > { %v3757_v17 = vpop.permute.xlu0 %3756  ;;  %v3755_v8 = vpop.permute.xlu1 %3754 }
 0x768   : > { %3774 = vst.msk [vmem:[%s6366_s22 + $0x60] sm:$0xff] %vm664_vm0, %v3757_v17  ;;  %3773 = vst.msk [vmem:[%s6366_s22 + $0x48] sm:$0xff] %vm664_vm0, %v3755_v8 }
 0x76b   : > { %v3759_v60 = vpop.permute.xlu1 %3758 }
 0x76c   : > { %3775 = vst.msk [vmem:[%s6366_s22 + $0x68] sm:$0xff] %vm664_vm0, %v3759_v60 }
 0x76d   : > { %4767 = shalt.err (!%p4764_p1)
}
 0x76e   : > { %s4768_s9 = scalar_lea.hbm %s6403_s21, 2048  ;;  %s4772_s27 = scalar_lea.hbm %s6568_s25, 4096 }
 0x76f   : > { %p4769_p9 = scmp.ne.s32.totalorder %s6403_s21, %s4768_s9  ;;  %p4773_p12 = scmp.lt.s32.totalorder %s6403_s21, %s6568_s25 }
 0x770   : > { %p4774_p10 = scmp.lt.s32.totalorder %s4772_s27, %s4768_s9 }
 0x771   : > { %p4770_p2 = pnand %p4769_p9, %p4979_p5 }
 0x772   : > { %p4775_p7 = por %p4774_p10, %p4773_p12 }
 0x773   : > { %p4771_p4 = pneg %p4770_p2 }
 0x775   : > { %p4776_p8 = pnand %p4775_p7, %p4771_p4 }
 0x777   : > { %4779 = shalt.err (!%p4776_p8)
}
 0x778   : > { %s4844_s30 = smov 128   ;;  %s4845_s29 = smov 8  }
 0x779   : > { %4413 = dma.vmem_to_hbm [thread:$0]  (%p4979_p5), %s6405_s23, 2048, %s6403_s21, %s6411_s0, %s4844_s30, %s4844_s30, %s4845_s29  }
 0x77a PF: > { %s6569_s11 = sld [smem:[#allocation18_spill]] }
 0x77b   : > { %s6570_s26 = sld [smem:[#allocation16_spill]] }
 0x780   : > { %p4445_p0 = scmp.ge.s32.totalorder %s6569_s11, 2 }
 0x781   : > { %s3926_s22 = sand.u32 1, %s6570_s26  }
 0x782   : > { %p4432_p11 = pnand %p4445_p0, %p4983_p6  ;;  %s3927_s9 = scalar_lea.sflag [#allocation4], %s3926_s22 }
 0x784   : > { %p4433_p3 = pneg %p4432_p11 }
 0x786   : > { %4809 = dma.done.wait (%p4433_p3), %s3927_s9, 2048  }
 0x787   : > { %4811 = vsyncadd (%p4433_p3), %s3927_s9, 4294965248  ;;  %s6572_s30 = sld [smem:[#allocation19_spill]]  ;;  %s6575_s27 = smov %s4818_s28 }
 0x788   : > { %s6573_s19 = sld [smem:[#allocation17_spill]] }
 0x789   : > { %s6574_s29 = sld [smem:[#allocation20_spill]] }
 0x78d   : > { %p31_p13 = scmp.ge.s32.totalorder %s6572_s30, 4  }
 0x78e   : > { %s6576_s28 = smov %s6573_s19 }
 0x78f   :  { %33 = sbr.rel (!%p31_p13) target bundleno = 13 (0xd), region = 159 }
 0x794   :  { %3932 = vsyncpa [#allocation3], 1 }
 0x795   :  { %3934 = vsyncpa [#allocation3 + $0x1], 1 }
 0x796   :  { %3935 = vsyncpa [#allocation6], 1 }
 0x797   :  { %3936 = vsyncpa [#allocation9], 1 }
 0x798   :  { %3937 = vsyncpa [#allocation4], 1 }
 0x799   :  { %3939 = vsyncpa [#allocation4 + $0x1], 1 }

</bundles_post_ra>
